<compile_context>
chip_gen: v6e
topology: v6e:2x2x1
jax: 0.10.0
libtpu: 0.0.40
codegen_flags: <defaults>
</compile_context>

<pallas_src>
import jax
import jax.numpy as jnp
from jax.experimental import pallas as pl
from jax.experimental.pallas import tpu as pltpu


_H1_PAD = 896  # fc1 hidden dim 784 padded up to a multiple of 128


def _dueling_dqn_kernel(
    frame_ref, pose_ref,
    w1_ref, b1_ref,
    w2_ref, b2_ref,
    w3_ref, b3_ref,
    wp_ref, bp_ref,
    wva_f_ref, wva_p_ref, bva_ref,
    whead_ref, bhead_ref,
    q_ref,
):
    x = frame_ref[...]                                        # (TB, 1600) bf16

    # fc1 -> relu : native bf16 x bf16 MXU matmul, f32 accumulate.
    out = jnp.dot(x, w1_ref[...],
                  preferred_element_type=jnp.float32) + b1_ref[...]
    out = jnp.maximum(out, 0.0)                               # (TB, 896) f32

    # fc2 -> relu : cast the activation operand to bf16 (weights already bf16).
    out = jnp.dot(out.astype(jnp.bfloat16), w2_ref[...],
                  preferred_element_type=jnp.float32) + b2_ref[...]
    out = jnp.maximum(out, 0.0)                               # (TB, 256) f32

    # fc3 -> relu (tiny f32 weight)
    out = jnp.dot(out, w3_ref[...],
                  preferred_element_type=jnp.float32) + b3_ref[...]
    out = jnp.maximum(out, 0.0)                               # (TB, 32)

    # fc_pose -> relu on the VPU (two FMAs; avoids a K=2 MXU pass)
    pose = pose_ref[...]                                      # (TB, 2)
    wp = wp_ref[...]                                          # (2, 32)
    out_pose = (pose[:, 0:1] * wp[0:1, :]
                + pose[:, 1:2] * wp[1:2, :]
                + bp_ref[...])
    out_pose = jnp.maximum(out_pose, 0.0)                     # (TB, 32)

    # fused fc_value | fc_adv on concat(out, out_pose), realised as split
    # weights (frame rows / pose rows).  hv lands in lanes 0..127, ha in
    # lanes 128..255 of a single (TB, 256) activation.
    h = (jnp.dot(out, wva_f_ref[...], preferred_element_type=jnp.float32)
         + jnp.dot(out_pose, wva_p_ref[...], preferred_element_type=jnp.float32)
         + bva_ref[...])
    h = jnp.maximum(h, 0.0)                                   # (TB, 256)

    # single pre-folded dueling head:  Q = value + adv - mean(adv)
    q_ref[...] = (jnp.dot(h, whead_ref[...], preferred_element_type=jnp.float32)
                  + bhead_ref[...])                           # (TB, 4)


def init_params(key):
    """Deterministic PyTorch-style (uniform +/- 1/sqrt(fan_in)) init.

    Weights are stored already transposed: (in_features, out_features).
    """
    layer_dims = {
        "fc1": (1600, 784),
        "fc2": (784, 256),
        "fc3": (256, 32),
        "fc_pose": (2, 32),
        "fc_value": (64, 128),
        "fc_adv": (64, 128),
        "value": (128, 1),
        "adv": (128, 4),
    }
    params = {}
    for name, (fan_in, fan_out) in layer_dims.items():
        key, kw, kb = jax.random.split(key, 3)
        bound = 1.0 / jnp.sqrt(jnp.float32(fan_in))
        params[name + "_w"] = jax.random.uniform(
            kw, (fan_in, fan_out), jnp.float32, -bound, bound)
        params[name + "_b"] = jax.random.uniform(
            kb, (1, fan_out), jnp.float32, -bound, bound)
    return params


def _prep_weight_operands(params):
    """Pad fc1/fc2 to 896 lanes, fold concat/dueling-mean, narrow big weights to bf16."""
    pad = _H1_PAD - 784
    w1 = jnp.pad(params["fc1_w"], ((0, 0), (0, pad)))          # (1600, 896)
    b1 = jnp.pad(params["fc1_b"], ((0, 0), (0, pad)))          # (1, 896)
    w2 = jnp.pad(params["fc2_w"], ((0, pad), (0, 0)))          # (896, 256)

    # fc_value | fc_adv fused along the output dim, then split frame/pose rows.
    w_va = jnp.concatenate([params["fc_value_w"], params["fc_adv_w"]], axis=1)  # (64, 256)
    b_va = jnp.concatenate([params["fc_value_b"], params["fc_adv_b"]], axis=1)  # (1, 256)

    # Pre-folded dueling head:  Q = hv @ (Wval*1^T) + ha @ (Wadv - mean(Wadv))
    #                              + (bval + badv - mean(badv))
    wval, bval = params["value_w"], params["value_b"]           # (128,1), (1,1)
    wadv, badv = params["adv_w"], params["adv_b"]               # (128,4), (1,4)
    n_act = wadv.shape[1]
    w_head = jnp.concatenate([
        wval * jnp.ones((1, n_act), jnp.float32),
        wadv - jnp.mean(wadv, axis=1, keepdims=True),
    ], axis=0)                                                  # (256, 4)
    b_head = bval + badv - jnp.mean(badv, axis=1, keepdims=True)   # (1, 4)

    return (
        w1.astype(jnp.bfloat16), b1,                            # ~2.9 MB instead of 5.7 MB
        w2.astype(jnp.bfloat16), params["fc2_b"],
        params["fc3_w"], params["fc3_b"],
        params["fc_pose_w"], params["fc_pose_b"],
        w_va[:32, :], w_va[32:, :], b_va,
        w_head, b_head,
    )


def _round_up(x, m):
    return ((x + m - 1) // m) * m


def dueling_dqn_forward(frame, robot_pose, params, *, batch_tile=512):
    B = frame.shape[0]
    # bf16 frame feeds the bf16 MXU path directly and halves the input DMA.
    frame_flat = frame.reshape(B, -1).astype(jnp.bfloat16)      # (B, 1600)
    pose = robot_pose.astype(jnp.float32)                       # (B, 2)

    weights = _prep_weight_operands(params)

    # Batch tiling:
    #  * tiny B: one full-batch tile (block dims equal to full array dims).
    #  * B >= 16: at least 2 tiles so v7x's two TensorCores both get work,
    #    capped at batch_tile (multiple of 8) for VMEM / pipelining.
    if B < 16:
        tb = B
    else:
        tb = min(_round_up(batch_tile, 8), _round_up(pl.cdiv(B, 2), 8))
    n_tiles = pl.cdiv(B, tb)
    b_pad = n_tiles * tb
    if b_pad != B:
        # Zero padding: padded rows flow through harmlessly and are sliced off.
        frame_flat = jnp.pad(frame_flat, ((0, b_pad - B), (0, 0)))
        pose = jnp.pad(pose, ((0, b_pad - B), (0, 0)))

    def batch_spec(feat):
        return pl.BlockSpec((tb, feat), lambda i: (i, 0))

    def resident_spec(arr):
        # Block index never changes -> weight stays VMEM-resident across tiles.
        # (pipeline_mode=pl.Buffered(1) would also halve its VMEM footprint;
        #  not needed — working set is well under the 32 MiB limit.)
        return pl.BlockSpec(arr.shape, lambda i: (0, 0))

    in_specs = [batch_spec(frame_flat.shape[1]), batch_spec(pose.shape[1])]
    in_specs += [resident_spec(w) for w in weights]

    q = pl.pallas_call(
        _dueling_dqn_kernel,
        out_shape=jax.ShapeDtypeStruct((b_pad, 4), jnp.float32),
        grid=(n_tiles,),
        in_specs=in_specs,
        out_specs=batch_spec(4),
        compiler_params=pltpu.CompilerParams(
            dimension_semantics=("parallel",),
            vmem_limit_bytes=32 << 20,
        ),
    )(frame_flat, pose, *weights)

    return q[:B] if b_pad != B else q


def _reference_forward(frame, robot_pose, params, *, bf16_fc12=False):
    """Plain-JAX reference matching the PyTorch module semantics.

    bf16_fc12=True mirrors the kernel's bf16 weights/activations on fc1/fc2.
    """
    B = frame.shape[0]
    x = frame.reshape(B, -1).astype(jnp.float32)
    w1, w2 = params["fc1_w"], params["fc2_w"]
    if bf16_fc12:
        x1 = x.astype(jnp.bfloat16)
        out = jnp.dot(x1, w1.astype(jnp.bfloat16),
                      preferred_element_type=jnp.float32) + params["fc1_b"]
        out = jnp.maximum(out, 0.0)
        out = jnp.dot(out.astype(jnp.bfloat16), w2.astype(jnp.bfloat16),
                      preferred_element_type=jnp.float32) + params["fc2_b"]
        out = jnp.maximum(out, 0.0)
    else:
        out = jnp.maximum(x @ w1 + params["fc1_b"], 0.0)
        out = jnp.maximum(out @ w2 + params["fc2_b"], 0.0)
    out = jnp.maximum(out @ params["fc3_w"] + params["fc3_b"], 0.0)
    out_pose = jnp.maximum(
        robot_pose.astype(jnp.float32) @ params["fc_pose_w"] + params["fc_pose_b"], 0.0)
    cat = jnp.concatenate([out, out_pose], axis=1)
    hv = jnp.maximum(cat @ params["fc_value_w"] + params["fc_value_b"], 0.0)
    ha = jnp.maximum(cat @ params["fc_adv_w"] + params["fc_adv_b"], 0.0)
    value = hv @ params["value_w"] + params["value_b"]
    adv = ha @ params["adv_w"] + params["adv_b"]
    return value + adv - jnp.mean(adv, axis=1, keepdims=True)


if __name__ == "__main__":
    key = jax.random.PRNGKey(0)
    k_params, k_frame, k_pose = jax.random.split(key, 3)

    params = init_params(k_params)

    # frame: NCHW (B, 1, 40, 40) -> flattens to 1600 features, as fc1 expects.
    B = 2
    frame = jax.random.normal(k_frame, (B, 1, 40, 40), jnp.float32)
    robot_pose = jax.random.normal(k_pose, (B, 2), jnp.float32)

    q = dueling_dqn_forward(frame, robot_pose, params)
    q = jax.block_until_ready(q)
    assert q.shape == (B, 4)

    # Tight check: reference with the same bf16 fc1/fc2 weights *and* bf16
    # activations validates the kernel's algebra (split concat, fused heads,
    # folded dueling mean, 896-lane zero padding).
    q_ref_matched = _reference_forward(frame, robot_pose, params, bf16_fc12=True)
    assert jnp.allclose(q, q_ref_matched, atol=2e-3, rtol=2e-3), (q, q_ref_matched)

    # Loose check vs full-f32 reference (bf16 fc1/fc2 is a bounded numerics change).
    q_ref = _reference_forward(frame, robot_pose, params)
    assert jnp.allclose(q, q_ref, atol=5e-2, rtol=5e-2), (q, q_ref)

    print("KERNEL_OK")
</pallas_src>

<mosaic_0001>
module attributes {stable_mosaic.version = 11 : i64} {
  func.func @_dueling_dqn_kernel(%arg0: i32, %arg1: memref<2x1600xbf16, #tpu.memory_space<vmem>>, %arg2: memref<2x2xf32, #tpu.memory_space<vmem>>, %arg3: memref<1600x896xbf16, #tpu.memory_space<vmem>>, %arg4: memref<1x896xf32, #tpu.memory_space<vmem>>, %arg5: memref<896x256xbf16, #tpu.memory_space<vmem>>, %arg6: memref<1x256xf32, #tpu.memory_space<vmem>>, %arg7: memref<256x32xf32, #tpu.memory_space<vmem>>, %arg8: memref<1x32xf32, #tpu.memory_space<vmem>>, %arg9: memref<2x32xf32, #tpu.memory_space<vmem>>, %arg10: memref<1x32xf32, #tpu.memory_space<vmem>>, %arg11: memref<32x256xf32, #tpu.memory_space<vmem>>, %arg12: memref<32x256xf32, #tpu.memory_space<vmem>>, %arg13: memref<1x256xf32, #tpu.memory_space<vmem>>, %arg14: memref<256x4xf32, #tpu.memory_space<vmem>>, %arg15: memref<1x4xf32, #tpu.memory_space<vmem>>, %arg16: memref<2x4xf32, #tpu.memory_space<vmem>>) attributes {dimension_semantics = [#tpu.dimension_semantics<parallel>], iteration_bounds = array<i64: 1>, scalar_prefetch = 0 : i64, scratch_operands = 0 : i64, tpu.core_type = #tpu.core_type<tc>, window_params = [{transform_indices = @transform_0, window_bounds = array<i64: 2, 1600>}, {transform_indices = @transform_1, window_bounds = array<i64: 2, 2>}, {pipeline_mode = #tpu.pipeline_mode<synchronous>, transform_indices = @transform_2, window_bounds = array<i64: 1600, 896>}, {pipeline_mode = #tpu.pipeline_mode<synchronous>, transform_indices = @transform_3, window_bounds = array<i64: 1, 896>}, {pipeline_mode = #tpu.pipeline_mode<synchronous>, transform_indices = @transform_4, window_bounds = array<i64: 896, 256>}, {pipeline_mode = #tpu.pipeline_mode<synchronous>, transform_indices = @transform_5, window_bounds = array<i64: 1, 256>}, {pipeline_mode = #tpu.pipeline_mode<synchronous>, transform_indices = @transform_6, window_bounds = array<i64: 256, 32>}, {pipeline_mode = #tpu.pipeline_mode<synchronous>, transform_indices = @transform_7, window_bounds = array<i64: 1, 32>}, {pipeline_mode = #tpu.pipeline_mode<synchronous>, transform_indices = @transform_8, window_bounds = array<i64: 2, 32>}, {pipeline_mode = #tpu.pipeline_mode<synchronous>, transform_indices = @transform_9, window_bounds = array<i64: 1, 32>}, {pipeline_mode = #tpu.pipeline_mode<synchronous>, transform_indices = @transform_10, window_bounds = array<i64: 32, 256>}, {pipeline_mode = #tpu.pipeline_mode<synchronous>, transform_indices = @transform_11, window_bounds = array<i64: 32, 256>}, {pipeline_mode = #tpu.pipeline_mode<synchronous>, transform_indices = @transform_12, window_bounds = array<i64: 1, 256>}, {pipeline_mode = #tpu.pipeline_mode<synchronous>, transform_indices = @transform_13, window_bounds = array<i64: 256, 4>}, {pipeline_mode = #tpu.pipeline_mode<synchronous>, transform_indices = @transform_14, window_bounds = array<i64: 1, 4>}, {transform_indices = @transform_15, window_bounds = array<i64: 2, 4>}]} {
    %c0 = arith.constant 0 : index
    %c0_0 = arith.constant 0 : index
    %0 = vector.load %arg1[%c0, %c0_0] : memref<2x1600xbf16, #tpu.memory_space<vmem>>, vector<2x1600xbf16>
    %c0_1 = arith.constant 0 : index
    %c0_2 = arith.constant 0 : index
    %1 = vector.load %arg3[%c0_1, %c0_2] : memref<1600x896xbf16, #tpu.memory_space<vmem>>, vector<1600x896xbf16>
    %cst = arith.constant dense<0.000000e+00> : vector<2x896xf32>
    %2 = tpu.matmul %0, %1, %cst {dimension_numbers = #tpu.dot_dimension_numbers<[1], [0], [0], [1], [0, 0, 1, 1], [], []>} : vector<2x1600xbf16>, vector<1600x896xbf16>, vector<2x896xf32> -> vector<2x896xf32>
    %c0_3 = arith.constant 0 : index
    %c0_4 = arith.constant 0 : index
    %3 = vector.load %arg4[%c0_3, %c0_4] : memref<1x896xf32, #tpu.memory_space<vmem>>, vector<1x896xf32>
    %4 = vector.broadcast %3 : vector<1x896xf32> to vector<2x896xf32>
    %5 = arith.addf %2, %4 : vector<2x896xf32>
    %cst_5 = arith.constant 0.000000e+00 : f32
    %6 = vector.broadcast %cst_5 : f32 to vector<2x896xf32>
    %7 = arith.maximumf %5, %6 : vector<2x896xf32>
    %8 = arith.truncf %7 : vector<2x896xf32> to vector<2x896xbf16>
    %c0_6 = arith.constant 0 : index
    %c0_7 = arith.constant 0 : index
    %9 = vector.load %arg5[%c0_6, %c0_7] : memref<896x256xbf16, #tpu.memory_space<vmem>>, vector<896x256xbf16>
    %cst_8 = arith.constant dense<0.000000e+00> : vector<2x256xf32>
    %10 = tpu.matmul %8, %9, %cst_8 {dimension_numbers = #tpu.dot_dimension_numbers<[1], [0], [0], [1], [0, 0, 1, 1], [], []>} : vector<2x896xbf16>, vector<896x256xbf16>, vector<2x256xf32> -> vector<2x256xf32>
    %c0_9 = arith.constant 0 : index
    %c0_10 = arith.constant 0 : index
    %11 = vector.load %arg6[%c0_9, %c0_10] : memref<1x256xf32, #tpu.memory_space<vmem>>, vector<1x256xf32>
    %12 = vector.broadcast %11 : vector<1x256xf32> to vector<2x256xf32>
    %13 = arith.addf %10, %12 : vector<2x256xf32>
    %cst_11 = arith.constant 0.000000e+00 : f32
    %14 = vector.broadcast %cst_11 : f32 to vector<2x256xf32>
    %15 = arith.maximumf %13, %14 : vector<2x256xf32>
    %c0_12 = arith.constant 0 : index
    %c0_13 = arith.constant 0 : index
    %16 = vector.load %arg7[%c0_12, %c0_13] : memref<256x32xf32, #tpu.memory_space<vmem>>, vector<256x32xf32>
    %cst_14 = arith.constant dense<0.000000e+00> : vector<2x32xf32>
    %17 = tpu.matmul %15, %16, %cst_14 {dimension_numbers = #tpu.dot_dimension_numbers<[1], [0], [0], [1], [0, 0, 1, 1], [], []>} : vector<2x256xf32>, vector<256x32xf32>, vector<2x32xf32> -> vector<2x32xf32>
    %c0_15 = arith.constant 0 : index
    %c0_16 = arith.constant 0 : index
    %18 = vector.load %arg8[%c0_15, %c0_16] : memref<1x32xf32, #tpu.memory_space<vmem>>, vector<1x32xf32>
    %19 = vector.broadcast %18 : vector<1x32xf32> to vector<2x32xf32>
    %20 = arith.addf %17, %19 : vector<2x32xf32>
    %cst_17 = arith.constant 0.000000e+00 : f32
    %21 = vector.broadcast %cst_17 : f32 to vector<2x32xf32>
    %22 = arith.maximumf %20, %21 : vector<2x32xf32>
    %c0_18 = arith.constant 0 : index
    %c0_19 = arith.constant 0 : index
    %23 = vector.load %arg2[%c0_18, %c0_19] : memref<2x2xf32, #tpu.memory_space<vmem>>, vector<2x2xf32>
    %c0_20 = arith.constant 0 : index
    %c0_21 = arith.constant 0 : index
    %24 = vector.load %arg9[%c0_20, %c0_21] : memref<2x32xf32, #tpu.memory_space<vmem>>, vector<2x32xf32>
    %25 = vector.extract_strided_slice %23 {offsets = [0, 0], sizes = [2, 1], strides = [1, 1]} : vector<2x2xf32> to vector<2x1xf32>
    %26 = vector.extract_strided_slice %24 {offsets = [0, 0], sizes = [1, 32], strides = [1, 1]} : vector<2x32xf32> to vector<1x32xf32>
    %27 = vector.broadcast %25 : vector<2x1xf32> to vector<2x32xf32>
    %28 = vector.broadcast %26 : vector<1x32xf32> to vector<2x32xf32>
    %29 = arith.mulf %27, %28 : vector<2x32xf32>
    %30 = vector.extract_strided_slice %23 {offsets = [0, 1], sizes = [2, 1], strides = [1, 1]} : vector<2x2xf32> to vector<2x1xf32>
    %31 = vector.extract_strided_slice %24 {offsets = [1, 0], sizes = [1, 32], strides = [1, 1]} : vector<2x32xf32> to vector<1x32xf32>
    %32 = vector.broadcast %30 : vector<2x1xf32> to vector<2x32xf32>
    %33 = vector.broadcast %31 : vector<1x32xf32> to vector<2x32xf32>
    %34 = arith.mulf %32, %33 : vector<2x32xf32>
    %35 = arith.addf %29, %34 : vector<2x32xf32>
    %c0_22 = arith.constant 0 : index
    %c0_23 = arith.constant 0 : index
    %36 = vector.load %arg10[%c0_22, %c0_23] : memref<1x32xf32, #tpu.memory_space<vmem>>, vector<1x32xf32>
    %37 = vector.broadcast %36 : vector<1x32xf32> to vector<2x32xf32>
    %38 = arith.addf %35, %37 : vector<2x32xf32>
    %cst_24 = arith.constant 0.000000e+00 : f32
    %39 = vector.broadcast %cst_24 : f32 to vector<2x32xf32>
    %40 = arith.maximumf %38, %39 : vector<2x32xf32>
    %c0_25 = arith.constant 0 : index
    %c0_26 = arith.constant 0 : index
    %41 = vector.load %arg11[%c0_25, %c0_26] : memref<32x256xf32, #tpu.memory_space<vmem>>, vector<32x256xf32>
    %cst_27 = arith.constant dense<0.000000e+00> : vector<2x256xf32>
    %42 = tpu.matmul %22, %41, %cst_27 {dimension_numbers = #tpu.dot_dimension_numbers<[1], [0], [0], [1], [0, 0, 1, 1], [], []>} : vector<2x32xf32>, vector<32x256xf32>, vector<2x256xf32> -> vector<2x256xf32>
    %c0_28 = arith.constant 0 : index
    %c0_29 = arith.constant 0 : index
    %43 = vector.load %arg12[%c0_28, %c0_29] : memref<32x256xf32, #tpu.memory_space<vmem>>, vector<32x256xf32>
    %cst_30 = arith.constant dense<0.000000e+00> : vector<2x256xf32>
    %44 = tpu.matmul %40, %43, %cst_30 {dimension_numbers = #tpu.dot_dimension_numbers<[1], [0], [0], [1], [0, 0, 1, 1], [], []>} : vector<2x32xf32>, vector<32x256xf32>, vector<2x256xf32> -> vector<2x256xf32>
    %45 = arith.addf %42, %44 : vector<2x256xf32>
    %c0_31 = arith.constant 0 : index
    %c0_32 = arith.constant 0 : index
    %46 = vector.load %arg13[%c0_31, %c0_32] : memref<1x256xf32, #tpu.memory_space<vmem>>, vector<1x256xf32>
    %47 = vector.broadcast %46 : vector<1x256xf32> to vector<2x256xf32>
    %48 = arith.addf %45, %47 : vector<2x256xf32>
    %cst_33 = arith.constant 0.000000e+00 : f32
    %49 = vector.broadcast %cst_33 : f32 to vector<2x256xf32>
    %50 = arith.maximumf %48, %49 : vector<2x256xf32>
    %c0_34 = arith.constant 0 : index
    %c0_35 = arith.constant 0 : index
    %51 = vector.load %arg14[%c0_34, %c0_35] : memref<256x4xf32, #tpu.memory_space<vmem>>, vector<256x4xf32>
    %cst_36 = arith.constant dense<0.000000e+00> : vector<2x4xf32>
    %52 = tpu.matmul %50, %51, %cst_36 {dimension_numbers = #tpu.dot_dimension_numbers<[1], [0], [0], [1], [0, 0, 1, 1], [], []>} : vector<2x256xf32>, vector<256x4xf32>, vector<2x4xf32> -> vector<2x4xf32>
    %c0_37 = arith.constant 0 : index
    %c0_38 = arith.constant 0 : index
    %53 = vector.load %arg15[%c0_37, %c0_38] : memref<1x4xf32, #tpu.memory_space<vmem>>, vector<1x4xf32>
    %54 = vector.broadcast %53 : vector<1x4xf32> to vector<2x4xf32>
    %55 = arith.addf %52, %54 : vector<2x4xf32>
    %c0_39 = arith.constant 0 : index
    %c0_40 = arith.constant 0 : index
    %56 = vector.load %arg16[%c0_39, %c0_40] : memref<2x4xf32, #tpu.memory_space<vmem>>, vector<2x4xf32>
    tpu.vector_store %arg16[%c0_39, %c0_40], %55 {strides = array<i32>} : memref<2x4xf32, #tpu.memory_space<vmem>>, vector<2x4xf32>,
    return
  }
  func.func @transform_0(%arg0: i32) -> (i32, i32) {
    %c0_i32 = arith.constant 0 : i32
    %c0_i32_0 = arith.constant 0 : i32
    return %arg0, %c0_i32 : i32, i32
  }
  func.func @transform_1(%arg0: i32) -> (i32, i32) {
    %c0_i32 = arith.constant 0 : i32
    %c0_i32_0 = arith.constant 0 : i32
    return %arg0, %c0_i32 : i32, i32
  }
  func.func @transform_2(%arg0: i32) -> (i32, i32) {
    %c0_i32 = arith.constant 0 : i32
    %c0_i32_0 = arith.constant 0 : i32
    %c0_i32_1 = arith.constant 0 : i32
    return %c0_i32, %c0_i32_0 : i32, i32
  }
  func.func @transform_3(%arg0: i32) -> (i32, i32) {
    %c0_i32 = arith.constant 0 : i32
    %c0_i32_0 = arith.constant 0 : i32
    %c0_i32_1 = arith.constant 0 : i32
    return %c0_i32, %c0_i32_0 : i32, i32
  }
  func.func @transform_4(%arg0: i32) -> (i32, i32) {
    %c0_i32 = arith.constant 0 : i32
    %c0_i32_0 = arith.constant 0 : i32
    %c0_i32_1 = arith.constant 0 : i32
    return %c0_i32, %c0_i32_0 : i32, i32
  }
  func.func @transform_5(%arg0: i32) -> (i32, i32) {
    %c0_i32 = arith.constant 0 : i32
    %c0_i32_0 = arith.constant 0 : i32
    %c0_i32_1 = arith.constant 0 : i32
    return %c0_i32, %c0_i32_0 : i32, i32
  }
  func.func @transform_6(%arg0: i32) -> (i32, i32) {
    %c0_i32 = arith.constant 0 : i32
    %c0_i32_0 = arith.constant 0 : i32
    %c0_i32_1 = arith.constant 0 : i32
    return %c0_i32, %c0_i32_0 : i32, i32
  }
  func.func @transform_7(%arg0: i32) -> (i32, i32) {
    %c0_i32 = arith.constant 0 : i32
    %c0_i32_0 = arith.constant 0 : i32
    %c0_i32_1 = arith.constant 0 : i32
    return %c0_i32, %c0_i32_0 : i32, i32
  }
  func.func @transform_8(%arg0: i32) -> (i32, i32) {
    %c0_i32 = arith.constant 0 : i32
    %c0_i32_0 = arith.constant 0 : i32
    %c0_i32_1 = arith.constant 0 : i32
    return %c0_i32, %c0_i32_0 : i32, i32
  }
  func.func @transform_9(%arg0: i32) -> (i32, i32) {
    %c0_i32 = arith.constant 0 : i32
    %c0_i32_0 = arith.constant 0 : i32
    %c0_i32_1 = arith.constant 0 : i32
    return %c0_i32, %c0_i32_0 : i32, i32
  }
  func.func @transform_10(%arg0: i32) -> (i32, i32) {
    %c0_i32 = arith.constant 0 : i32
    %c0_i32_0 = arith.constant 0 : i32
    %c0_i32_1 = arith.constant 0 : i32
    return %c0_i32, %c0_i32_0 : i32, i32
  }
  func.func @transform_11(%arg0: i32) -> (i32, i32) {
    %c0_i32 = arith.constant 0 : i32
    %c0_i32_0 = arith.constant 0 : i32
    %c0_i32_1 = arith.constant 0 : i32
    return %c0_i32, %c0_i32_0 : i32, i32
  }
  func.func @transform_12(%arg0: i32) -> (i32, i32) {
    %c0_i32 = arith.constant 0 : i32
    %c0_i32_0 = arith.constant 0 : i32
    %c0_i32_1 = arith.constant 0 : i32
    return %c0_i32, %c0_i32_0 : i32, i32
  }
  func.func @transform_13(%arg0: i32) -> (i32, i32) {
    %c0_i32 = arith.constant 0 : i32
    %c0_i32_0 = arith.constant 0 : i32
    %c0_i32_1 = arith.constant 0 : i32
    return %c0_i32, %c0_i32_0 : i32, i32
  }
  func.func @transform_14(%arg0: i32) -> (i32, i32) {
    %c0_i32 = arith.constant 0 : i32
    %c0_i32_0 = arith.constant 0 : i32
    %c0_i32_1 = arith.constant 0 : i32
    return %c0_i32, %c0_i32_0 : i32, i32
  }
  func.func @transform_15(%arg0: i32) -> (i32, i32) {
    %c0_i32 = arith.constant 0 : i32
    %c0_i32_0 = arith.constant 0 : i32
    return %arg0, %c0_i32 : i32, i32
  }
}

</mosaic_0001>

<bundles_post_ra>
// kernel: tpu_custom_call.1
= control target key start
LH: loop header
LB: loop body
LE: loop exit
PB: predicated region body
PF: predicated region fallthrough
CT: control target
= control target key end

     0   :  { %20 = vsyncpa [#allocation3], 0  ;;  %s10323_s0 = inlined_call_operand.hbm [shape: bf16[2,1600], index: 0, kind: input, shape index: {}]   ;;  %s10324_s1 = inlined_call_operand.hbm [shape: f32[2,2], index: 1, kind: input, shape index: {}]   ;;  %s10325_s2 = inlined_call_operand.hbm [shape: bf16[1600,896], index: 2, kind: input, shape index: {}]   ;;  %s10326_s3 = inlined_call_operand.hbm [shape: f32[1,896], index: 3, kind: input, shape index: {}]   ;;  %s10327_s4 = inlined_call_operand.hbm [shape: bf16[896,256], index: 4, kind: input, shape index: {}]   ;;  %s10328_s5 = inlined_call_operand.hbm [shape: f32[1,256], index: 5, kind: input, shape index: {}]   ;;  %s10329_s6 = inlined_call_operand.vmem [shape: f32[256,32], index: 6, kind: input, shape index: {}]   ;;  %s10330_s7 = inlined_call_operand.hbm [shape: f32[1,32], index: 7, kind: input, shape index: {}]   ;;  %s10331_s8 = inlined_call_operand.hbm [shape: f32[2,32], index: 8, kind: input, shape index: {}]   ;;  %s10332_s9 = inlined_call_operand.hbm [shape: f32[1,32], index: 9, kind: input, shape index: {}]   ;;  %s10333_s10 = inlined_call_operand.hbm [shape: f32[32,256], index: 10, kind: input, shape index: {}]   ;;  %s10334_s11 = inlined_call_operand.hbm [shape: f32[32,256], index: 11, kind: input, shape index: {}]   ;;  %s10335_s12 = inlined_call_operand.hbm [shape: f32[1,256], index: 12, kind: input, shape index: {}]   ;;  %s10336_s13 = inlined_call_operand.vmem [shape: f32[256,4], index: 13, kind: input, shape index: {}]   ;;  %s10337_s14 = inlined_call_operand.hbm [shape: f32[1,4], index: 14, kind: input, shape index: {}]   ;;  %s10338_s15 = inlined_call_operand.hbm [shape: f32[2,4], index: 15, kind: output, shape index: {}]  }
   0x1   :  { %21 = vsyncpa [#allocation6], 0 }
   0x2   :  { %22 = vsyncpa [#allocation9], 0 }
   0x3   :  { %23 = vsyncpa [#allocation12], 0 }
   0x4   :  { %24 = vsyncpa [#allocation15], 0 }
   0x5   :  { %25 = vsyncpa [#allocation18], 0 }
   0x6   :  { %26 = vsyncpa [#allocation21], 0 }
   0x7   :  { %27 = vsyncpa [#allocation4], 0  ;;  %s9749_s18 = smov [#allocation5]   ;;  %s9750_s20 = smov [#allocation8]  }
   0x8   :  { %s44_s19 = sshll.u32 %s9749_s18, 4  ;;  %s66_s21 = sshll.u32 %s9750_s20, 4  ;;  %s45_s19 = int_to_ptr.vmem [resolvable:$true] %s44_s19  ;;  %s67_s21 = int_to_ptr.vmem [resolvable:$true] %s66_s21 }
   0x9   :  { %s9461_s22 = scalar_lea.vmem %s45_s19, 32  ;;  %p9466_p1 = scmp.lt.s32.totalorder %s45_s19, %s45_s19 }
   0xa   :  { %p9462_p0 = scmp.ne.s32.totalorder %s45_s19, %s9461_s22  ;;  %p9467_p2 = scmp.lt.s32.totalorder %s9461_s22, %s9461_s22 }
   0xc   :  { %p9468_p3 = por %p9467_p2, %p9466_p1 }
   0xe   :  { %p9469_p4 = pnand %p9468_p3, %p9462_p0 }
  0x10   :  { %9472 = shalt.err (!%p9469_p4)
}
  0x11   :  { %47 = dma.hbm_to_vmem [thread:$0]  %s10324_s1, 32, %s45_s19, [#allocation6]  }
  0x12   :  { %s9481_s25 = scalar_lea.vmem %s67_s21, 112  ;;  %s9485_s26 = scalar_lea.vmem %s67_s21, 128 }
  0x13   :  { %p9482_p5 = scmp.ne.s32.totalorder %s67_s21, %s9481_s25  ;;  %p9486_p6 = scmp.lt.s32.totalorder %s67_s21, %s67_s21 }
  0x14   :  { %p9487_p7 = scmp.lt.s32.totalorder %s9485_s26, %s9481_s25 }
  0x16   :  { %p9488_p8 = por %p9487_p7, %p9486_p6 }
  0x18   :  { %p9489_p9 = pnand %p9488_p8, %p9482_p5 }
  0x1a   :  { %9492 = shalt.err (!%p9489_p9)
}
  0x1b   :  { %69 = dma.hbm_to_vmem [thread:$0]  %s10326_s3, 112, %s67_s21, [#allocation9]  }
  0x1c   :  { %s9751_s29 = smov [#allocation11]   ;;  %s9752_s16 = smov [#allocation14]  }
  0x1d   :  { %s88_s30 = sshll.u32 %s9751_s29, 4  ;;  %s110_s17 = sshll.u32 %s9752_s16, 4  ;;  %s89_s30 = int_to_ptr.vmem [resolvable:$true] %s88_s30  ;;  %s111_s17 = int_to_ptr.vmem [resolvable:$true] %s110_s17 }
  0x1e   :  { %s9501_s18 = scalar_lea.vmem %s89_s30, 32  ;;  %p9506_p11 = scmp.lt.s32.totalorder %s89_s30, %s89_s30 }
  0x1f   :  { %p9502_p10 = scmp.ne.s32.totalorder %s89_s30, %s9501_s18  ;;  %p9507_p12 = scmp.lt.s32.totalorder %s9501_s18, %s9501_s18 }
  0x21   :  { %p9508_p13 = por %p9507_p12, %p9506_p11 }
  0x23   :  { %p9509_p0 = pnand %p9508_p13, %p9502_p10 }
  0x25   :  { %9512 = shalt.err (!%p9509_p0)
}
  0x26   :  { %91 = dma.hbm_to_vmem [thread:$0]  %s10328_s5, 32, %s89_s30, [#allocation12]  }
  0x27   :  { %s9521_s20 = scalar_lea.vmem %s111_s17, 32  ;;  %p9526_p2 = scmp.lt.s32.totalorder %s111_s17, %s111_s17 }
  0x28   :  { %p9522_p1 = scmp.ne.s32.totalorder %s111_s17, %s9521_s20  ;;  %p9527_p3 = scmp.lt.s32.totalorder %s9521_s20, %s9521_s20 }
  0x2a   :  { %p9528_p4 = por %p9527_p3, %p9526_p2 }
  0x2c   :  { %p9529_p5 = pnand %p9528_p4, %p9522_p1 }
  0x2e   :  { %9532 = shalt.err (!%p9529_p5)
}
  0x2f   :  { %113 = dma.hbm_to_vmem [thread:$0]  %s10331_s8, 32, %s111_s17, [#allocation15]  }
  0x30   :  { %s9753_s22 = smov [#allocation17]  }
  0x31   :  { %s129_s23 = sshll.u32 %s9753_s22, 4  ;;  %s130_s23 = int_to_ptr.vmem [resolvable:$true] %s129_s23 }
  0x32   :  { %s9541_s24 = scalar_lea.vmem %s130_s23, 1024  ;;  %p9546_p7 = scmp.lt.s32.totalorder %s130_s23, %s130_s23 }
  0x33   :  { %p9542_p6 = scmp.ne.s32.totalorder %s130_s23, %s9541_s24  ;;  %p9547_p8 = scmp.lt.s32.totalorder %s9541_s24, %s9541_s24 }
  0x35   :  { %p9548_p9 = por %p9547_p8, %p9546_p7 }
  0x37   :  { %p9549_p10 = pnand %p9548_p9, %p9542_p6 }
  0x39   :  { %9552 = shalt.err (!%p9549_p10)
}
  0x3a   :  { %s9754_s5 = smov 256   ;;  %s9755_s25 = smov 16  }
  0x3b   :  { %135 = dma.hbm_to_vmem [thread:$0]  %s10333_s10, 1024, %s130_s23, [#allocation18], %s9754_s5, %s9754_s5, %s9755_s25  }
  0x3c   :  { %s9756_s8 = smov [#allocation20]   ;;  %s9757_s29 = smov [#allocation2]  }
  0x3d   :  { %s154_s28 = sshll.u32 %s9756_s8, 4  ;;  %s34_s30 = sshll.u32 %s9757_s29, 4  ;;  %s155_s28 = int_to_ptr.vmem [resolvable:$true] %s154_s28  ;;  %s35_s30 = int_to_ptr.vmem [resolvable:$true] %s34_s30 }
  0x3e   :  { %s9561_s16 = scalar_lea.vmem %s155_s28, 32  ;;  %p9566_p12 = scmp.lt.s32.totalorder %s155_s28, %s155_s28 }
  0x3f   :  { %p9562_p11 = scmp.ne.s32.totalorder %s155_s28, %s9561_s16  ;;  %p9567_p13 = scmp.lt.s32.totalorder %s9561_s16, %s9561_s16 }
  0x41   :  { %p9568_p0 = por %p9567_p13, %p9566_p12 }
  0x43   :  { %p9569_p1 = pnand %p9568_p0, %p9562_p11 }
  0x45   :  { %9572 = shalt.err (!%p9569_p1)
}
  0x46   :  { %157 = dma.hbm_to_vmem [thread:$0]  %s10335_s12, 32, %s155_s28, [#allocation21]  }
  0x47   :  { %s9581_s1 = scalar_lea.vmem %s35_s30, 208  ;;  %s9585_s10 = scalar_lea.vmem %s35_s30, 224 }
  0x48   :  { %p9582_p2 = scmp.ne.s32.totalorder %s35_s30, %s9581_s1  ;;  %p9586_p3 = scmp.lt.s32.totalorder %s35_s30, %s35_s30 }
  0x49   :  { %p9587_p4 = scmp.lt.s32.totalorder %s9585_s10, %s9581_s1 }
  0x4b   :  { %p9588_p5 = por %p9587_p4, %p9586_p3 }
  0x4d   :  { %p9589_p6 = pnand %p9588_p5, %p9582_p2 }
  0x4f   :  { %9592 = shalt.err (!%p9589_p6)
}
  0x50   :  { %37 = dma.hbm_to_vmem [thread:$0]  %s10323_s0, 208, %s35_s30, [#allocation3]  }
  0x51   :  { %s9758_s3 = smov [#allocation7]  }
  0x52   :  { %s53_s21 = sshll.u32 %s9758_s3, 4  ;;  %s54_s21 = int_to_ptr.vmem [resolvable:$true] %s53_s21 }
  0x53   :  { %s9601_s22 = scalar_lea.vmem %s54_s21, 89600  ;;  %p9606_p8 = scmp.lt.s32.totalorder %s54_s21, %s54_s21 }
  0x54   :  { %p9602_p7 = scmp.ne.s32.totalorder %s54_s21, %s9601_s22  ;;  %p9607_p9 = scmp.lt.s32.totalorder %s9601_s22, %s9601_s22 }
  0x56   :  { %p9608_p10 = por %p9607_p9, %p9606_p8 }
  0x58   :  { %p9609_p11 = pnand %p9608_p10, %p9602_p7 }
  0x5a   :  { %9612 = shalt.err (!%p9609_p11)
}
  0x5b   :  { %s9759_s12 = smov 448   ;;  %s9760_s23 = smov 28  }
  0x5c   :  { %59 = dma.hbm_to_vmem [thread:$0]  %s10325_s2, 89600, %s54_s21, [#allocation6], %s9759_s12, %s9759_s12, %s9760_s23  }
  0x5d   :  { %s9761_s27 = smov [#allocation10]  }
  0x5e   :  { %s75_s8 = sshll.u32 %s9761_s27, 4  ;;  %s76_s8 = int_to_ptr.vmem [resolvable:$true] %s75_s8 }
  0x5f   :  { %s9621_s0 = scalar_lea.vmem %s76_s8, 14336  ;;  %p9626_p13 = scmp.lt.s32.totalorder %s76_s8, %s76_s8 }
  0x60   :  { %p9622_p12 = scmp.ne.s32.totalorder %s76_s8, %s9621_s0  ;;  %p9627_p0 = scmp.lt.s32.totalorder %s9621_s0, %s9621_s0 }
  0x62   :  { %p9628_p1 = por %p9627_p0, %p9626_p13 }
  0x64   :  { %p9629_p2 = pnand %p9628_p1, %p9622_p12 }
  0x66   :  { %9632 = shalt.err (!%p9629_p2)
}
  0x67   :  { %s9762_s28 = smov 128   ;;  %s9763_s29 = smov 8  }
  0x68   :  { %81 = dma.hbm_to_vmem [thread:$0]  %s10327_s4, 14336, %s76_s8, [#allocation9], %s9762_s28, %s9762_s28, %s9763_s29  }
  0x69   :  { %s9764_s17 = smov [#allocation13]   ;;  %s9765_s2 = smov [#allocation16]  }
  0x6a   :  { %s100_s18 = sshll.u32 %s9764_s17, 4  ;;  %s120_s1 = sshll.u32 %s9765_s2, 4  ;;  %s101_s18 = int_to_ptr.vmem [resolvable:$true] %s100_s18  ;;  %s121_s1 = int_to_ptr.vmem [resolvable:$true] %s120_s1 }
  0x6b   :  { %s9641_s10 = scalar_lea.vmem %s101_s18, 16  ;;  %s9645_s19 = scalar_lea.vmem %s101_s18, 32 }
  0x6c   :  { %p9642_p3 = scmp.ne.s32.totalorder %s101_s18, %s9641_s10  ;;  %p9646_p4 = scmp.lt.s32.totalorder %s101_s18, %s101_s18 }
  0x6d   :  { %p9647_p5 = scmp.lt.s32.totalorder %s9645_s19, %s9641_s10 }
  0x6f   :  { %p9648_p6 = por %p9647_p5, %p9646_p4 }
  0x71   :  { %p9649_p7 = pnand %p9648_p6, %p9642_p3 }
  0x73   :  { %9652 = shalt.err (!%p9649_p7)
}
  0x74   :  { %103 = dma.hbm_to_vmem [thread:$0]  %s10330_s7, 16, %s101_s18, [#allocation12]  }
  0x75   :  { %s9661_s21 = scalar_lea.vmem %s121_s1, 16  ;;  %s9665_s4 = scalar_lea.vmem %s121_s1, 32 }
  0x76   :  { %p9662_p8 = scmp.ne.s32.totalorder %s121_s1, %s9661_s21  ;;  %p9666_p9 = scmp.lt.s32.totalorder %s121_s1, %s121_s1 }
  0x77   :  { %p9667_p10 = scmp.lt.s32.totalorder %s9665_s4, %s9661_s21 }
  0x79   :  { %p9668_p11 = por %p9667_p10, %p9666_p9 }
  0x7b   :  { %p9669_p12 = pnand %p9668_p11, %p9662_p8 }
  0x7d   :  { %9672 = shalt.err (!%p9669_p12)
}
  0x7e   :  { %123 = dma.hbm_to_vmem [thread:$0]  %s10332_s9, 16, %s121_s1, [#allocation15]  }
  0x7f   :  { %s9766_s23 = smov [#allocation19]   ;;  %s9767_s26 = smov [#allocation22]  }
  0x80   :  { %s141_s24 = sshll.u32 %s9766_s23, 4  ;;  %s166_s27 = sshll.u32 %s9767_s26, 4  ;;  %s142_s24 = int_to_ptr.vmem [resolvable:$true] %s141_s24  ;;  %s167_s27 = int_to_ptr.vmem [resolvable:$true] %s166_s27 }
  0x81   :  { %s9681_s8 = scalar_lea.vmem %s142_s24, 1024  ;;  %p9686_p0 = scmp.lt.s32.totalorder %s142_s24, %s142_s24 }
  0x82   :  { %p9682_p13 = scmp.ne.s32.totalorder %s142_s24, %s9681_s8  ;;  %p9687_p1 = scmp.lt.s32.totalorder %s9681_s8, %s9681_s8 }
  0x84   :  { %p9688_p2 = por %p9687_p1, %p9686_p0 }
  0x86   :  { %p9689_p3 = pnand %p9688_p2, %p9682_p13 }
  0x88   :  { %9692 = shalt.err (!%p9689_p3)
}
  0x89   :  { %147 = dma.hbm_to_vmem [thread:$0]  %s10334_s11, 1024, %s142_s24, [#allocation18], %s9754_s5, %s9754_s5, %s9755_s25  }
  0x8a   :  { %s9701_s9 = scalar_lea.vmem %s167_s27, 16  ;;  %s9705_s28 = scalar_lea.vmem %s167_s27, 32 }
  0x8b   :  { %p9702_p4 = scmp.ne.s32.totalorder %s167_s27, %s9701_s9  ;;  %p9706_p5 = scmp.lt.s32.totalorder %s167_s27, %s167_s27 }
  0x8c   :  { %p9707_p6 = scmp.lt.s32.totalorder %s9705_s28, %s9701_s9 }
  0x8e   :  { %p9708_p7 = por %p9707_p6, %p9706_p5 }
  0x90   :  { %p9709_p8 = pnand %p9708_p7, %p9702_p4 }
  0x92   :  { %9712 = shalt.err (!%p9709_p8)
}
  0x93   :  { %169 = dma.hbm_to_vmem [thread:$0]  %s10337_s14, 16, %s167_s27, [#allocation21]  }
  0x94   :  { %9733 = dma.done.wait [#allocation3], 208  }
  0x95   :  { %9734 = vsyncadd [#allocation3], 4294967088 }
  0x96   :  { %9735 = dma.done.wait [#allocation6], 89632  }
  0x97   :  { %9736 = vsyncadd [#allocation6], 4294877664 }
  0x98   :  { %9737 = dma.done.wait [#allocation9], 14448  }
  0x99   :  { %9738 = vsyncadd [#allocation9], 4294952848 }
  0x9a   :  { %9739 = dma.done.wait [#allocation12], 48  }
  0x9b   :  { %9740 = vsyncadd [#allocation12], 4294967248 }
  0x9c   :  { %9741 = dma.done.wait [#allocation15], 48  }
  0x9d   :  { %9742 = vsyncadd [#allocation15], 4294967248 }
  0x9e   :  { %9743 = dma.done.wait [#allocation18], 2048  }
  0x9f   :  { %9744 = vsyncadd [#allocation18], 4294965248 }
  0xa0   :  { %9745 = dma.done.wait [#allocation21], 48  }
  0xa1   :  { %9746 = vsyncadd [#allocation21], 4294967248  ;;  %v8281_v0 = vld [vmem:[#allocation7 + $0x18c] ss:$28 sps:$4 sm:$0xff]   ;;  %v8287_v4 = vld [vmem:[#allocation7 + $0x154] ss:$28 sps:$4 sm:$0xff]   ;;  %v1014_v36 = vlaneseq }
  0xa2   :  { %v8283_v1 = vld [vmem:[#allocation7 + $0x50c] ss:$28 sps:$4 sm:$0xff]   ;;  %4755 = vmatprep.subr.bf16.mxu0 %v8281_v0  ;;  %v8289_v5 = vld [vmem:[#allocation7 + $0x4d4] ss:$28 sps:$4 sm:$0xff]   ;;  %v8293_v8 = vld [vmem:[#allocation7 + $0x11c] ss:$28 sps:$4 sm:$0xff]  }
  0xa3   :  { %v8285_v2 = vld [vmem:[#allocation7 + $0x188] ss:$28 sps:$4 sm:$0xff]   ;;  %4796 = vmatprep.subr.bf16.mxu1 %v8283_v1  ;;  %v8291_v6 = vld [vmem:[#allocation7 + $0x150] ss:$28 sps:$4 sm:$0xff]   ;;  %v8295_v9 = vld [vmem:[#allocation7 + $0x49c] ss:$28 sps:$4 sm:$0xff]  }
  0xa4   :  { %v8286_v3 = vld [vmem:[#allocation7 + $0x508] ss:$28 sps:$4 sm:$0xff]   ;;  %4756 = vmatpush1.bf16.msra.mxu0 %v8285_v2  ;;  %v8292_v7 = vld [vmem:[#allocation7 + $0x4d0] ss:$28 sps:$4 sm:$0xff]   ;;  %v8297_v10 = vld [vmem:[#allocation7 + $0x118] ss:$28 sps:$4 sm:$0xff]  }
  0xa5   :  { %4797 = vmatpush1.bf16.msra.mxu1 %v8286_v3  ;;  %4757 = vmatprep.subr.bf16.mxu0 %v8287_v4  ;;  %v8298_v11 = vld [vmem:[#allocation7 + $0x498] ss:$28 sps:$4 sm:$0xff]   ;;  %v8299_v12 = vld [vmem:[#allocation7 + $0xe4] ss:$28 sps:$4 sm:$0xff]   ;;  %v8305_v16 = vld [vmem:[#allocation7 + $0xac] ss:$28 sps:$4 sm:$0xff]  }
  0xa6   :  { %4798 = vmatprep.subr.bf16.mxu1 %v8289_v5  ;;  %v8301_v13 = vld [vmem:[#allocation7 + $0x464] ss:$28 sps:$4 sm:$0xff]   ;;  %v8307_v17 = vld [vmem:[#allocation7 + $0x42c] ss:$28 sps:$4 sm:$0xff]   ;;  %v8311_v20 = vld [vmem:[#allocation7 + $0x74] ss:$28 sps:$4 sm:$0xff]  }
  0xa7   :  { %v8303_v14 = vld [vmem:[#allocation7 + $0xe0] ss:$28 sps:$4 sm:$0xff]   ;;  %v8309_v18 = vld [vmem:[#allocation7 + $0xa8] ss:$28 sps:$4 sm:$0xff]   ;;  %v8313_v21 = vld [vmem:[#allocation7 + $0x3f4] ss:$28 sps:$4 sm:$0xff]  }
  0xa8   :  { %4758 = vmatpush1.bf16.msra.mxu0 %v8291_v6  ;;  %v8304_v15 = vld [vmem:[#allocation7 + $0x460] ss:$28 sps:$4 sm:$0xff]   ;;  %v8310_v19 = vld [vmem:[#allocation7 + $0x428] ss:$28 sps:$4 sm:$0xff]   ;;  %v8315_v22 = vld [vmem:[#allocation7 + $0x70] ss:$28 sps:$4 sm:$0xff]  }
  0xa9   :  { %4799 = vmatpush1.bf16.msra.mxu1 %v8292_v7  ;;  %4759 = vmatprep.subr.bf16.mxu0 %v8293_v8  ;;  %v8316_v23 = vld [vmem:[#allocation7 + $0x3f0] ss:$28 sps:$4 sm:$0xff]   ;;  %v8317_v24 = vld [vmem:[#allocation7 + $0x3c] ss:$28 sps:$4 sm:$0xff]   ;;  %v8323_v28 = vld [vmem:[#allocation7 + $0x4] ss:$28 sps:$4 sm:$0xff]  }
  0xaa   :  { %4800 = vmatprep.subr.bf16.mxu1 %v8295_v9  ;;  %v8319_v25 = vld [vmem:[#allocation7 + $0x3bc] ss:$28 sps:$4 sm:$0xff]   ;;  %v8325_v29 = vld [vmem:[#allocation7 + $0x384] ss:$28 sps:$4 sm:$0xff]   ;;  %v8329_v32 = vld [vmem:[#allocation7 + $0x34c] ss:$28 sps:$4 sm:$0xff]  }
  0xab   :  { %v8321_v26 = vld [vmem:[#allocation7 + $0x38] ss:$28 sps:$4 sm:$0xff]   ;;  %v8327_v30 = vld [vmem:[#allocation7] ss:$28 sps:$4 sm:$0xff]   ;;  %v8331_v33 = vld [vmem:[#allocation7 + $0x6cc] ss:$28 sps:$4 sm:$0xff]  }
  0xac   :  { %4760 = vmatpush1.bf16.msra.mxu0 %v8297_v10  ;;  %v8322_v27 = vld [vmem:[#allocation7 + $0x3b8] ss:$28 sps:$4 sm:$0xff]   ;;  %v8328_v31 = vld [vmem:[#allocation7 + $0x380] ss:$28 sps:$4 sm:$0xff]   ;;  %v8333_v34 = vld [vmem:[#allocation7 + $0x348] ss:$28 sps:$4 sm:$0xff]  }
  0xad   :  { %4801 = vmatpush1.bf16.msra.mxu1 %v8298_v11  ;;  %4761 = vmatprep.subr.bf16.mxu0 %v8299_v12  ;;  %v8334_v35 = vld [vmem:[#allocation7 + $0x6c8] ss:$28 sps:$4 sm:$0xff]   ;;  %v9768_v37 = vmov 1966171168   ;;  %v8335_v39 = vld [vmem:[#allocation7 + $0x314] ss:$28 sps:$4 sm:$0xff]  }
  0xae   :  { %4802 = vmatprep.subr.bf16.mxu1 %v8301_v13  ;;  %v1053_v38 = vunpack.c.l.s4 %v9768_v37  ;;  %v8337_v40 = vld [vmem:[#allocation7 + $0x694] ss:$28 sps:$4 sm:$0xff]   ;;  %v9899_v42 = vshrl.u32 %v1014_v36, 7  ;;  %v8341_v45 = vld [vmem:[#allocation7 + $0x2dc] ss:$28 sps:$4 sm:$0xff]   ;;  %vm4751_vm0 = vcmask 523264  }
  0xaf   :  { %v8339_v41 = vld [vmem:[#allocation7 + $0x310] ss:$28 sps:$4 sm:$0xff]   ;;  %v8343_v46 = vld [vmem:[#allocation7 + $0x65c] ss:$28 sps:$4 sm:$0xff]   ;;  %v8347_v50 = vld [vmem:[#allocation7 + $0x2a4] ss:$28 sps:$4 sm:$0xff]  }
  0xb0   :  { %4762 = vmatpush1.bf16.msra.mxu0 %v8303_v14  ;;  %v1054_v43 = vunpack.c.0.s8 %v1053_v38  ;;  %v8340_v44 = vld [vmem:[#allocation7 + $0x690] ss:$28 sps:$4 sm:$0xff]   ;;  %v8345_v47 = vld [vmem:[#allocation7 + $0x2d8] ss:$28 sps:$4 sm:$0xff]   ;;  %v8349_v51 = vld [vmem:[#allocation7 + $0x624] ss:$28 sps:$4 sm:$0xff]  }
  0xb1   :  { %4803 = vmatpush1.bf16.msra.mxu1 %v8304_v15  ;;  %4763 = vmatprep.subr.bf16.mxu0 %v8305_v16  ;;  %v8346_v48 = vld [vmem:[#allocation7 + $0x658] ss:$28 sps:$4 sm:$0xff]   ;;  %v8351_v53 = vld [vmem:[#allocation7 + $0x2a0] ss:$28 sps:$4 sm:$0xff]   ;;  %v8353_v56 = vld [vmem:[#allocation7 + $0x26c] ss:$28 sps:$4 sm:$0xff]  }
  0xb2   :  { %4804 = vmatprep.subr.bf16.mxu1 %v8307_v17  ;;  %v9902_v49 = vsub.s32 %v1054_v43, %v9899_v42  ;;  %v210_v52 = vld [vmem:[#allocation2] sm:$0xff]  ;;  %v8352_v55 = vld [vmem:[#allocation7 + $0x620] ss:$28 sps:$4 sm:$0xff]   ;;  %v8355_v57 = vld [vmem:[#allocation7 + $0x5ec] ss:$28 sps:$4 sm:$0xff]   ;;  %vm9771_vm1 = vmmov 0  }
  0xb3   :  { %v8357_v59 = vld [vmem:[#allocation7 + $0x268] ss:$28 sps:$4 sm:$0xff]   ;;  %v8359_v62 = vld [vmem:[#allocation7 + $0x234] ss:$28 sps:$4 sm:$0xff]   ;;  %v1051_v1 = vcombine.high %v210_v52, %v210_v52  ;;  %v8365_v4 = vld [vmem:[#allocation7 + $0x1fc] ss:$28 sps:$4 sm:$0xff]  }
  0xb4   :  { %4764 = vmatpush1.bf16.msra.mxu0 %v8309_v18  ;;  %v1058_v54 = vrot.slane %v210_v52, %v9902_v49  ;;  %v8358_v61 = vld [vmem:[#allocation7 + $0x5e8] ss:$28 sps:$4 sm:$0xff]   ;;  %v8361_v63 = vld [vmem:[#allocation7 + $0x5b4] ss:$28 sps:$4 sm:$0xff]   ;;  %v8367_v5 = vld [vmem:[#allocation7 + $0x57c] ss:$28 sps:$4 sm:$0xff]  }
  0xb5   :  { %4805 = vmatpush1.bf16.msra.mxu1 %v8310_v19  ;;  %4765 = vmatprep.subr.bf16.mxu0 %v8311_v20  ;;  %v8363_v2 = vld [vmem:[#allocation7 + $0x230] ss:$28 sps:$4 sm:$0xff]   ;;  %v9915_v6 = vrot.slane %v1051_v1, %v9902_v49  ;;  %v8369_v7 = vld [vmem:[#allocation7 + $0x1f8] ss:$28 sps:$4 sm:$0xff]   ;;  %v8371_v9 = vld [vmem:[#allocation7 + $0x1c4] ss:$28 sps:$4 sm:$0xff]  }
  0xb6   :  { %4806 = vmatprep.subr.bf16.mxu1 %v8313_v21  ;;  %v1066_v58 = vcombine.high %v1058_v54, %v1058_v54  ;;  %v8364_v3 = vld [vmem:[#allocation7 + $0x5b0] ss:$28 sps:$4 sm:$0xff]   ;;  %v8370_v8 = vld [vmem:[#allocation7 + $0x578] ss:$28 sps:$4 sm:$0xff]   ;;  %v8373_v10 = vld [vmem:[#allocation7 + $0x544] ss:$28 sps:$4 sm:$0xff]   ;;  %v9920_v13 = vrot.slane %v1058_v54, %v9902_v49 }
  0xb7   :  { %v1067_v11 = vcombine.high %v9915_v6, %v9915_v6  ;;  %v8375_v12 = vld [vmem:[#allocation7 + $0x1c0] ss:$28 sps:$4 sm:$0xff]   ;;  %v8379_v15 = vld [vmem:[#allocation7 + $0x88c] ss:$28 sps:$4 sm:$0xff]   ;;  %v8385_v21 = vld [vmem:[#allocation7 + $0x854] ss:$28 sps:$4 sm:$0xff]  }
  0xb8   :  { %4766 = vmatpush1.bf16.msra.mxu0 %v8315_v22  ;;  %v9906_v60 = vrot.slane %v1066_v58, %v9902_v49  ;;  %v8376_v14 = vld [vmem:[#allocation7 + $0x540] ss:$28 sps:$4 sm:$0xff]   ;;  %v8382_v16 = vld [vmem:[#allocation7 + $0xc0c] ss:$28 sps:$4 sm:$0xff]   ;;  %v9927_v18 = vcombine.high %v9920_v13, %v9920_v13  ;;  %v8388_v22 = vld [vmem:[#allocation7 + $0xbd4] ss:$28 sps:$4 sm:$0xff]  }
  0xb9   :  { %4807 = vmatpush1.bf16.msra.mxu1 %v8316_v23  ;;  %4767 = vmatprep.subr.bf16.mxu0 %v8317_v24  ;;  %v9923_v17 = vrot.slane %v1067_v11, %v9902_v49  ;;  %v8377_v19 = vld [vmem:[#allocation7 + $0x888] ss:$28 sps:$4 sm:$0xff]   ;;  %v8383_v24 = vld [vmem:[#allocation7 + $0x850] ss:$28 sps:$4 sm:$0xff]   ;;  %v8422_v52 = vld [vmem:[#allocation7 + $0xa80] ss:$28 sps:$4 sm:$0xff]  }
  0xba   :  { %4808 = vmatprep.subr.bf16.mxu1 %v8319_v25  ;;  %v9910_v0 = vcombine.high %v9906_v60, %v9906_v60  ;;  %4787 = vmatprep.mubr.bf16.mxu0 %v9906_v60  ;;  %v8380_v20 = vld [vmem:[#allocation7 + $0xc08] ss:$28 sps:$4 sm:$0xff]   ;;  %v8386_v25 = vld [vmem:[#allocation7 + $0xbd0] ss:$28 sps:$4 sm:$0xff]   ;;  %v8437_v1 = vld [vmem:[#allocation7 + $0x9d8] ss:$28 sps:$4 sm:$0xff]  }
  0xbb   :  { %v9931_v23 = vcombine.high %v9923_v17, %v9923_v17  ;;  %v8401_v36 = vld [vmem:[#allocation7 + $0x7a8] ss:$28 sps:$4 sm:$0xff]   ;;  %v8409_v38 = vld [vmem:[#allocation7 + $0x774] ss:$28 sps:$4 sm:$0xff]   ;;  %vm6917_vm2 = vcmask 261120   ;;  %vm7191_vm3 = vcmask 25600  }
  0xbc   :  { %4768 = vmatpush1.bf16.msra.mxu0 %v8321_v26  ;;  %4828 = vmatprep.mubr.bf16.mxu1 %v9910_v0  ;;  %v8391_v26 = vld [vmem:[#allocation7 + $0x81c] ss:$28 sps:$4 sm:$0xff]   ;;  %v8404_v37 = vld [vmem:[#allocation7 + $0xb28] ss:$28 sps:$4 sm:$0xff]   ;;  %v8410_v43 = vld [vmem:[#allocation7 + $0xaf0] ss:$28 sps:$4 sm:$0xff]  }
  0xbd   :  { %4809 = vmatpush1.bf16.msra.mxu1 %v8322_v27  ;;  %4769 = vmatprep.subr.bf16.mxu0 %v8323_v28  ;;  %v8394_v27 = vld [vmem:[#allocation7 + $0xb9c] ss:$28 sps:$4 sm:$0xff]   ;;  %v8430_v54 = vld [vmem:[#allocation7 + $0xdcc] ss:$28 sps:$4 sm:$0xff]   ;;  %v8436_v58 = vld [vmem:[#allocation7 + $0xd94] ss:$28 sps:$4 sm:$0xff]  }
  0xbe   :  { %4810 = vmatprep.subr.bf16.mxu1 %v8325_v29  ;;  %v8389_v28 = vld [vmem:[#allocation7 + $0x818] ss:$28 sps:$4 sm:$0xff]   ;;  %v8452_v11 = vld [vmem:[#allocation7 + $0xce8] ss:$28 sps:$4 sm:$0xff]  }
  0xbf   :  { %v8392_v29 = vld [vmem:[#allocation7 + $0xb98] ss:$28 sps:$4 sm:$0xff]  }
  0xc0   :  { %4770 = vmatpush1.bf16.msra.mxu0 %v8327_v30  ;;  %v8397_v30 = vld [vmem:[#allocation7 + $0x7e4] ss:$28 sps:$4 sm:$0xff]  }
  0xc1   :  { %4811 = vmatpush1.bf16.msra.mxu1 %v8328_v31  ;;  %4771 = vmatprep.subr.bf16.mxu0 %v8329_v32  ;;  %v8400_v31 = vld [vmem:[#allocation7 + $0xb64] ss:$28 sps:$4 sm:$0xff]  }
  0xc2   :  { %4812 = vmatprep.subr.bf16.mxu1 %v8331_v33  ;;  %v8395_v32 = vld [vmem:[#allocation7 + $0x7e0] ss:$28 sps:$4 sm:$0xff]  }
  0xc3   :  { %v8398_v33 = vld [vmem:[#allocation7 + $0xb60] ss:$28 sps:$4 sm:$0xff]  }
  0xc4   :  { %4772 = vmatpush2.bf16.msra.mxu0 %v8333_v34  ;;  %v8403_v34 = vld [vmem:[#allocation7 + $0x7ac] ss:$28 sps:$4 sm:$0xff]  }
  0xc5   :  { %4813 = vmatpush2.bf16.msra.mxu1 %v8334_v35  ;;  %4773 = vmatprep.subr.bf16.mxu0 %v8335_v39  ;;  %v8406_v35 = vld [vmem:[#allocation7 + $0xb2c] ss:$28 sps:$4 sm:$0xff]   ;;  %v8412_v39 = vld [vmem:[#allocation7 + $0xaf4] ss:$28 sps:$4 sm:$0xff]  }
  0xc6   :  { %4814 = vmatprep.subr.bf16.mxu1 %v8337_v40  ;;  %v9769_v40 = vmov 0  }
  0xc7   :  { %8279 = vset.pattern.permute.xlu0 %v9769_v40 }
  0xc8   :  { %4774 = vmatpush2.bf16.msra.mxu0 %v8339_v41  ;;  %v8407_v41 = vld [vmem:[#allocation7 + $0x770] ss:$28 sps:$4 sm:$0xff]  }
  0xc9   :  { %4815 = vmatpush2.bf16.msra.mxu1 %v8340_v44  ;;  %4775 = vmatprep.subr.bf16.mxu0 %v8341_v45  ;;  %v8415_v44 = vld [vmem:[#allocation7 + $0x73c] ss:$28 sps:$4 sm:$0xff]  }
  0xca   :  { %4816 = vmatprep.subr.bf16.mxu1 %v8343_v46  ;;  %v8418_v45 = vld [vmem:[#allocation7 + $0xabc] ss:$28 sps:$4 sm:$0xff]  }
  0xcb   :  { %v8413_v46 = vld [vmem:[#allocation7 + $0x738] ss:$28 sps:$4 sm:$0xff]  }
  0xcc   :  { %4776 = vmatpush2.bf16.msra.mxu0 %v8345_v47  ;;  %v8416_v47 = vld [vmem:[#allocation7 + $0xab8] ss:$28 sps:$4 sm:$0xff]  }
  0xcd   :  { %4817 = vmatpush2.bf16.msra.mxu1 %v8346_v48  ;;  %4777 = vmatprep.subr.bf16.mxu0 %v8347_v50  ;;  %v8421_v48 = vld [vmem:[#allocation7 + $0x704] ss:$28 sps:$4 sm:$0xff]  }
  0xce   :  { %4818 = vmatprep.subr.bf16.mxu1 %v8349_v51  ;;  %v8424_v50 = vld [vmem:[#allocation7 + $0xa84] ss:$28 sps:$4 sm:$0xff]  }
  0xcf   :  { %v8419_v51 = vld [vmem:[#allocation7 + $0x700] ss:$28 sps:$4 sm:$0xff]  }
  0xd0   :  { %4778 = vmatpush2.bf16.msra.mxu0 %v8351_v53  ;;  %v8427_v53 = vld [vmem:[#allocation7 + $0xa4c] ss:$28 sps:$4 sm:$0xff]  }
  0xd1   :  { %4819 = vmatpush2.bf16.msra.mxu1 %v8352_v55  ;;  %4779 = vmatprep.subr.bf16.mxu0 %v8353_v56  ;;  %v8425_v55 = vld [vmem:[#allocation7 + $0xa48] ss:$28 sps:$4 sm:$0xff]  }
  0xd2   :  { %4820 = vmatprep.subr.bf16.mxu1 %v8355_v57  ;;  %v8428_v56 = vld [vmem:[#allocation7 + $0xdc8] ss:$28 sps:$4 sm:$0xff]   ;;  %v8433_v57 = vld [vmem:[#allocation7 + $0xa14] ss:$28 sps:$4 sm:$0xff]  }
  0xd4   :  { %4780 = vmatpush2.bf16.msra.mxu0 %v8357_v59  ;;  %v8431_v59 = vld [vmem:[#allocation7 + $0xa10] ss:$28 sps:$4 sm:$0xff]  }
  0xd5   :  { %4821 = vmatpush2.bf16.msra.mxu1 %v8358_v61  ;;  %4781 = vmatprep.subr.bf16.mxu0 %v8359_v62  ;;  %v8434_v61 = vld [vmem:[#allocation7 + $0xd90] ss:$28 sps:$4 sm:$0xff]   ;;  %v8439_v62 = vld [vmem:[#allocation7 + $0x9dc] ss:$28 sps:$4 sm:$0xff]  }
  0xd6   :  { %4822 = vmatprep.subr.bf16.mxu1 %v8361_v63  ;;  %v8442_v63 = vld [vmem:[#allocation7 + $0xd5c] ss:$28 sps:$4 sm:$0xff]  }
  0xd8   :  { %4782 = vmatpush2.bf16.msra.mxu0 %v8363_v2  ;;  %v8440_v2 = vld [vmem:[#allocation7 + $0xd58] ss:$28 sps:$4 sm:$0xff]  }
  0xd9   :  { %4823 = vmatpush2.bf16.msra.mxu1 %v8364_v3  ;;  %4783 = vmatprep.subr.bf16.mxu0 %v8365_v4  ;;  %v8445_v3 = vld [vmem:[#allocation7 + $0x9a4] ss:$28 sps:$4 sm:$0xff]  }
  0xda   :  { %4824 = vmatprep.subr.bf16.mxu1 %v8367_v5  ;;  %v8448_v4 = vld [vmem:[#allocation7 + $0xd24] ss:$28 sps:$4 sm:$0xff]  }
  0xdb   :  { %v8443_v5 = vld [vmem:[#allocation7 + $0x9a0] ss:$28 sps:$4 sm:$0xff]  }
  0xdc   :  { %4784 = vmatpush2.bf16.msra.mxu0 %v8369_v7  ;;  %v8446_v7 = vld [vmem:[#allocation7 + $0xd20] ss:$28 sps:$4 sm:$0xff]  }
  0xdd   :  { %4825 = vmatpush2.bf16.msra.mxu1 %v8370_v8  ;;  %4785 = vmatprep.subr.bf16.mxu0 %v8371_v9  ;;  %v8451_v8 = vld [vmem:[#allocation7 + $0x96c] ss:$28 sps:$4 sm:$0xff]  }
  0xde   :  { %4826 = vmatprep.subr.bf16.mxu1 %v8373_v10  ;;  %v8454_v9 = vld [vmem:[#allocation7 + $0xcec] ss:$28 sps:$4 sm:$0xff]  }
  0xdf   :  { %v8449_v10 = vld [vmem:[#allocation7 + $0x968] ss:$28 sps:$4 sm:$0xff]  }
  0xe0   :  { %4786 = vmatpush2.bf16.msra.mxu0 %v8375_v12  ;;  %v8457_v12 = vld [vmem:[#allocation7 + $0x934] ss:$28 sps:$4 sm:$0xff]  }
  0xe1   :  { %4827 = vmatpush2.bf16.msra.mxu1 %v8376_v14  ;;  %4837 = vmatprep.subr.bf16.mxu0 %v8379_v15  ;;  %v8460_v14 = vld [vmem:[#allocation7 + $0xcb4] ss:$28 sps:$4 sm:$0xff]  }
  0xe2   :  { %4878 = vmatprep.subr.bf16.mxu1 %v8382_v16  ;;  %v8455_v15 = vld [vmem:[#allocation7 + $0x930] ss:$28 sps:$4 sm:$0xff]  }
  0xe3   :  { %4788 = vmatmul.mubr.bf16.vlgmr.msra.gmra.mxu0 %v9920_v13  ;;  %v8458_v16 = vld [vmem:[#allocation7 + $0xcb0] ss:$28 sps:$4 sm:$0xff]  }
  0xe4   :  { %4829 = vmatmul.mubr.bf16.vlgmr.msra.gmra.mxu1 %v9927_v18  ;;  %4838 = vmatpush1.bf16.msra.mxu0 %v8377_v19  ;;  %v8463_v19 = vld [vmem:[#allocation7 + $0x8fc] ss:$28 sps:$4 sm:$0xff]  }
  0xe5   :  { %4879 = vmatpush1.bf16.msra.mxu1 %v8380_v20  ;;  %4839 = vmatprep.subr.bf16.mxu0 %v8385_v21  ;;  %v8466_v20 = vld [vmem:[#allocation7 + $0xc7c] ss:$28 sps:$4 sm:$0xff]  }
  0xe6   :  { %4880 = vmatprep.subr.bf16.mxu1 %v8388_v22  ;;  %4869 = vmatprep.mubr.bf16.mxu0 %v9923_v17  ;;  %v8461_v21 = vld [vmem:[#allocation7 + $0x8f8] ss:$28 sps:$4 sm:$0xff]  }
  0xe7   :  { %4910 = vmatprep.mubr.bf16.mxu1 %v9931_v23  ;;  %v8464_v22 = vld [vmem:[#allocation7 + $0xc78] ss:$28 sps:$4 sm:$0xff]  }
  0xe8   :  { %4840 = vmatpush1.bf16.msra.mxu0 %v8383_v24  ;;  %v8469_v24 = vld [vmem:[#allocation7 + $0x8c4] ss:$28 sps:$4 sm:$0xff]  }
  0xe9   :  { %4881 = vmatpush1.bf16.msra.mxu1 %v8386_v25  ;;  %4841 = vmatprep.subr.bf16.mxu0 %v8391_v26  ;;  %v8472_v25 = vld [vmem:[#allocation7 + $0xc44] ss:$28 sps:$4 sm:$0xff]  }
  0xea   :  { %4882 = vmatprep.subr.bf16.mxu1 %v8394_v27  ;;  %v8467_v26 = vld [vmem:[#allocation7 + $0x8c0] ss:$28 sps:$4 sm:$0xff]   ;;  %v9940_v27 = vrot.slane %v9915_v6, %v9902_v49  ;;  %v8482_v6 = vld [vmem:[#allocation7 + $0xf54] ss:$28 sps:$4 sm:$0xff]  }
  0xec   :  { %4842 = vmatpush1.bf16.msra.mxu0 %v8389_v28  ;;  %v8470_v28 = vld [vmem:[#allocation7 + $0xc40] ss:$28 sps:$4 sm:$0xff]  }
  0xed   :  { %4883 = vmatpush1.bf16.msra.mxu1 %v8392_v29  ;;  %4843 = vmatprep.subr.bf16.mxu0 %v8397_v30  ;;  %v8476_v29 = vld [vmem:[#allocation7 + $0xf8c] ss:$28 sps:$4 sm:$0xff]  }
  0xee   :  { %4884 = vmatprep.subr.bf16.mxu1 %v8400_v31  ;;  %v8479_v30 = vld [vmem:[#allocation7 + $0x130c] ss:$28 sps:$4 sm:$0xff]   ;;  %v9944_v31 = vcombine.high %v9940_v27, %v9940_v27 }
  0xf0   :  { %4844 = vmatpush1.bf16.msra.mxu0 %v8395_v32  ;;  %v8474_v32 = vld [vmem:[#allocation7 + $0xf88] ss:$28 sps:$4 sm:$0xff]  }
  0xf1   :  { %4885 = vmatpush1.bf16.msra.mxu1 %v8398_v33  ;;  %4845 = vmatprep.subr.bf16.mxu0 %v8403_v34  ;;  %v8477_v33 = vld [vmem:[#allocation7 + $0x1308] ss:$28 sps:$4 sm:$0xff]   ;;  %v9946_v34 = vld [vmem:[#allocation2 + $0x8] sm:$0x1f] }
  0xf2   :  { %4886 = vmatprep.subr.bf16.mxu1 %v8406_v35  ;;  %v8485_v35 = vld [vmem:[#allocation7 + $0x12d4] ss:$28 sps:$4 sm:$0xff]  }
  0xf4   :  { %4846 = vmatpush1.bf16.msra.mxu0 %v8401_v36  ;;  %v9950_v36 = vrot.slane %v9946_v34, %v9902_v49 }
  0xf5   :  { %4887 = vmatpush1.bf16.msra.mxu1 %v8404_v37  ;;  %4847 = vmatprep.subr.bf16.mxu0 %v8409_v38  ;;  %v8480_v38 = vld [vmem:[#allocation7 + $0xf50] ss:$28 sps:$4 sm:$0xff]  }
  0xf6   :  { %4888 = vmatprep.subr.bf16.mxu1 %v8412_v39  ;;  %v1115_v37 = vcombine.high %v9950_v36, %v9950_v36  ;;  %v8483_v39 = vld [vmem:[#allocation7 + $0x12d0] ss:$28 sps:$4 sm:$0xff]  }
  0xf8   :  { %4848 = vmatpush1.bf16.msra.mxu0 %v8407_v41  ;;  %v8488_v41 = vld [vmem:[#allocation7 + $0xf1c] ss:$28 sps:$4 sm:$0xff]  }
  0xf9   :  { %4889 = vmatpush1.bf16.msra.mxu1 %v8410_v43  ;;  %4849 = vmatprep.subr.bf16.mxu0 %v8415_v44  ;;  %v8491_v43 = vld [vmem:[#allocation7 + $0x129c] ss:$28 sps:$4 sm:$0xff]   ;;  %v9957_v44 = vrot.slane %v1115_v37, %v9902_v49  ;;  %v8552_v37 = vld [vmem:[#allocation7 + $0x1030] ss:$28 sps:$4 sm:$0xff]  }
  0xfa   :  { %4890 = vmatprep.subr.bf16.mxu1 %v8418_v45 }
  0xfb   :  { %v9962_v45 = vcombine.high %v9957_v44, %v9957_v44 }
  0xfc   :  { %4850 = vmatpush1.bf16.msra.mxu0 %v8413_v46  ;;  %v8486_v46 = vld [vmem:[#allocation7 + $0xf18] ss:$28 sps:$4 sm:$0xff]  }
  0xfd   :  { %4891 = vmatpush1.bf16.msra.mxu1 %v8416_v47  ;;  %4851 = vmatprep.subr.bf16.mxu0 %v8421_v48  ;;  %v8489_v47 = vld [vmem:[#allocation7 + $0x1298] ss:$28 sps:$4 sm:$0xff]   ;;  %v8494_v48 = vld [vmem:[#allocation7 + $0xee4] ss:$28 sps:$4 sm:$0xff]  }
  0xfe   :  { %4892 = vmatprep.subr.bf16.mxu1 %v8424_v50  ;;  %v8497_v50 = vld [vmem:[#allocation7 + $0x1264] ss:$28 sps:$4 sm:$0xff]  }
 0x100   :  { %4852 = vmatpush1.bf16.msra.mxu0 %v8419_v51  ;;  %v8492_v51 = vld [vmem:[#allocation7 + $0xee0] ss:$28 sps:$4 sm:$0xff]  }
 0x101   :  { %4893 = vmatpush1.bf16.msra.mxu1 %v8422_v52  ;;  %4853 = vmatprep.subr.bf16.mxu0 %v8427_v53  ;;  %v8495_v52 = vld [vmem:[#allocation7 + $0x1260] ss:$28 sps:$4 sm:$0xff]   ;;  %v8500_v53 = vld [vmem:[#allocation7 + $0xeac] ss:$28 sps:$4 sm:$0xff]  }
 0x102   :  { %4894 = vmatprep.subr.bf16.mxu1 %v8430_v54  ;;  %v8503_v54 = vld [vmem:[#allocation7 + $0x122c] ss:$28 sps:$4 sm:$0xff]  }
 0x104   :  { %4854 = vmatpush2.bf16.msra.mxu0 %v8425_v55  ;;  %v8498_v55 = vld [vmem:[#allocation7 + $0xea8] ss:$28 sps:$4 sm:$0xff]  }
 0x105   :  { %4895 = vmatpush2.bf16.msra.mxu1 %v8428_v56  ;;  %4855 = vmatprep.subr.bf16.mxu0 %v8433_v57  ;;  %v8501_v56 = vld [vmem:[#allocation7 + $0x1228] ss:$28 sps:$4 sm:$0xff]   ;;  %v8506_v57 = vld [vmem:[#allocation7 + $0xe74] ss:$28 sps:$4 sm:$0xff]  }
 0x106   :  { %4896 = vmatprep.subr.bf16.mxu1 %v8436_v58  ;;  %v8509_v58 = vld [vmem:[#allocation7 + $0x11f4] ss:$28 sps:$4 sm:$0xff]  }
 0x108   :  { %4856 = vmatpush2.bf16.msra.mxu0 %v8431_v59  ;;  %v8504_v59 = vld [vmem:[#allocation7 + $0xe70] ss:$28 sps:$4 sm:$0xff]  }
 0x109   :  { %4897 = vmatpush2.bf16.msra.mxu1 %v8434_v61  ;;  %4857 = vmatprep.subr.bf16.mxu0 %v8439_v62  ;;  %v8507_v61 = vld [vmem:[#allocation7 + $0x11f0] ss:$28 sps:$4 sm:$0xff]   ;;  %v8512_v62 = vld [vmem:[#allocation7 + $0xe3c] ss:$28 sps:$4 sm:$0xff]  }
 0x10a   :  { %4898 = vmatprep.subr.bf16.mxu1 %v8442_v63  ;;  %v8515_v63 = vld [vmem:[#allocation7 + $0x11bc] ss:$28 sps:$4 sm:$0xff]  }
 0x10c   :  { %4858 = vmatpush2.bf16.msra.mxu0 %v8437_v1  ;;  %v8510_v1 = vld [vmem:[#allocation7 + $0xe38] ss:$28 sps:$4 sm:$0xff]  }
 0x10d   :  { %4899 = vmatpush2.bf16.msra.mxu1 %v8440_v2  ;;  %4859 = vmatprep.subr.bf16.mxu0 %v8445_v3  ;;  %v8513_v2 = vld [vmem:[#allocation7 + $0x11b8] ss:$28 sps:$4 sm:$0xff]   ;;  %v8518_v3 = vld [vmem:[#allocation7 + $0xe04] ss:$28 sps:$4 sm:$0xff]  }
 0x10e   :  { %4900 = vmatprep.subr.bf16.mxu1 %v8448_v4  ;;  %v8521_v4 = vld [vmem:[#allocation7 + $0x1184] ss:$28 sps:$4 sm:$0xff]  }
 0x110   :  { %4860 = vmatpush2.bf16.msra.mxu0 %v8443_v5  ;;  %v8516_v5 = vld [vmem:[#allocation7 + $0xe00] ss:$28 sps:$4 sm:$0xff]  }
 0x111   :  { %4901 = vmatpush2.bf16.msra.mxu1 %v8446_v7  ;;  %4861 = vmatprep.subr.bf16.mxu0 %v8451_v8  ;;  %v8519_v7 = vld [vmem:[#allocation7 + $0x1180] ss:$28 sps:$4 sm:$0xff]   ;;  %v8524_v8 = vld [vmem:[#allocation7 + $0x114c] ss:$28 sps:$4 sm:$0xff]  }
 0x112   :  { %4902 = vmatprep.subr.bf16.mxu1 %v8454_v9  ;;  %v8527_v9 = vld [vmem:[#allocation7 + $0x14cc] ss:$28 sps:$4 sm:$0xff]  }
 0x114   :  { %4862 = vmatpush2.bf16.msra.mxu0 %v8449_v10  ;;  %v8522_v10 = vld [vmem:[#allocation7 + $0x1148] ss:$28 sps:$4 sm:$0xff]  }
 0x115   :  { %4903 = vmatpush2.bf16.msra.mxu1 %v8452_v11  ;;  %4863 = vmatprep.subr.bf16.mxu0 %v8457_v12  ;;  %v8525_v11 = vld [vmem:[#allocation7 + $0x14c8] ss:$28 sps:$4 sm:$0xff]   ;;  %v8530_v12 = vld [vmem:[#allocation7 + $0x1114] ss:$28 sps:$4 sm:$0xff]  }
 0x116   :  { %4904 = vmatprep.subr.bf16.mxu1 %v8460_v14  ;;  %v8533_v14 = vld [vmem:[#allocation7 + $0x1494] ss:$28 sps:$4 sm:$0xff]  }
 0x118   :  { %4864 = vmatpush2.bf16.msra.mxu0 %v8455_v15  ;;  %v8528_v15 = vld [vmem:[#allocation7 + $0x1110] ss:$28 sps:$4 sm:$0xff]  }
 0x119   :  { %4905 = vmatpush2.bf16.msra.mxu1 %v8458_v16  ;;  %4865 = vmatprep.subr.bf16.mxu0 %v8463_v19  ;;  %v8531_v16 = vld [vmem:[#allocation7 + $0x1490] ss:$28 sps:$4 sm:$0xff]   ;;  %v8536_v19 = vld [vmem:[#allocation7 + $0x10dc] ss:$28 sps:$4 sm:$0xff]  }
 0x11a   :  { %4906 = vmatprep.subr.bf16.mxu1 %v8466_v20  ;;  %v8539_v20 = vld [vmem:[#allocation7 + $0x145c] ss:$28 sps:$4 sm:$0xff]  }
 0x11c   :  { %4866 = vmatpush2.bf16.msra.mxu0 %v8461_v21  ;;  %v8534_v21 = vld [vmem:[#allocation7 + $0x10d8] ss:$28 sps:$4 sm:$0xff]  }
 0x11d   :  { %4907 = vmatpush2.bf16.msra.mxu1 %v8464_v22  ;;  %4867 = vmatprep.subr.bf16.mxu0 %v8469_v24  ;;  %v8537_v22 = vld [vmem:[#allocation7 + $0x1458] ss:$28 sps:$4 sm:$0xff]   ;;  %v8542_v24 = vld [vmem:[#allocation7 + $0x10a4] ss:$28 sps:$4 sm:$0xff]  }
 0x11e   :  { %4908 = vmatprep.subr.bf16.mxu1 %v8472_v25  ;;  %v8545_v25 = vld [vmem:[#allocation7 + $0x1424] ss:$28 sps:$4 sm:$0xff]  }
 0x120   :  { %4868 = vmatpush2.bf16.msra.mxu0 %v8467_v26  ;;  %v8540_v26 = vld [vmem:[#allocation7 + $0x10a0] ss:$28 sps:$4 sm:$0xff]  }
 0x121   :  { %4909 = vmatpush2.bf16.msra.mxu1 %v8470_v28  ;;  %4919 = vmatprep.subr.bf16.mxu0 %v8476_v29  ;;  %v8543_v28 = vld [vmem:[#allocation7 + $0x1420] ss:$28 sps:$4 sm:$0xff]   ;;  %v8548_v29 = vld [vmem:[#allocation7 + $0x106c] ss:$28 sps:$4 sm:$0xff]  }
 0x122   :  { %4960 = vmatprep.subr.bf16.mxu1 %v8479_v30  ;;  %v8551_v30 = vld [vmem:[#allocation7 + $0x13ec] ss:$28 sps:$4 sm:$0xff]  }
 0x123   :  { %4870 = vmatmul.mubr.bf16.vlgmr.msra.gmra.mxu0 %v9940_v27 }
 0x124   :  { %4911 = vmatmul.mubr.bf16.vlgmr.msra.gmra.mxu1 %v9944_v31  ;;  %4920 = vmatpush1.bf16.msra.mxu0 %v8474_v32  ;;  %v8546_v32 = vld [vmem:[#allocation7 + $0x1068] ss:$28 sps:$4 sm:$0xff]  }
 0x125   :  { %4961 = vmatpush1.bf16.msra.mxu1 %v8477_v33  ;;  %4921 = vmatprep.subr.bf16.mxu0 %v8482_v6  ;;  %v8549_v33 = vld [vmem:[#allocation7 + $0x13e8] ss:$28 sps:$4 sm:$0xff]   ;;  %v8554_v6 = vld [vmem:[#allocation7 + $0x1034] ss:$28 sps:$4 sm:$0xff]  }
 0x126   :  { %4962 = vmatprep.subr.bf16.mxu1 %v8485_v35  ;;  %4951 = vmatprep.mubr.bf16.mxu0 %v9957_v44  ;;  %v8557_v35 = vld [vmem:[#allocation7 + $0x13b4] ss:$28 sps:$4 sm:$0xff]  }
 0x127   :  { %4992 = vmatprep.mubr.bf16.mxu1 %v9962_v45 }
 0x128   :  { %4922 = vmatpush1.bf16.msra.mxu0 %v8480_v38  ;;  %v8555_v38 = vld [vmem:[#allocation7 + $0x13b0] ss:$28 sps:$4 sm:$0xff]  }
 0x129   :  { %4963 = vmatpush1.bf16.msra.mxu1 %v8483_v39  ;;  %4923 = vmatprep.subr.bf16.mxu0 %v8488_v41  ;;  %v8560_v39 = vld [vmem:[#allocation7 + $0xffc] ss:$28 sps:$4 sm:$0xff]  }
 0x12a   :  { %4964 = vmatprep.subr.bf16.mxu1 %v8491_v43  ;;  %v8563_v41 = vld [vmem:[#allocation7 + $0x137c] ss:$28 sps:$4 sm:$0xff]  }
 0x12b   :  { %v8558_v43 = vld [vmem:[#allocation7 + $0xff8] ss:$28 sps:$4 sm:$0xff]  }
 0x12c   :  { %4924 = vmatpush1.bf16.msra.mxu0 %v8486_v46  ;;  %v8561_v46 = vld [vmem:[#allocation7 + $0x1378] ss:$28 sps:$4 sm:$0xff]  }
 0x12d   :  { %4965 = vmatpush1.bf16.msra.mxu1 %v8489_v47  ;;  %4925 = vmatprep.subr.bf16.mxu0 %v8494_v48  ;;  %v8566_v47 = vld [vmem:[#allocation7 + $0xfc4] ss:$28 sps:$4 sm:$0xff]  }
 0x12e   :  { %4966 = vmatprep.subr.bf16.mxu1 %v8497_v50  ;;  %v8569_v48 = vld [vmem:[#allocation7 + $0x1344] ss:$28 sps:$4 sm:$0xff]  }
 0x12f   :  { %v8564_v50 = vld [vmem:[#allocation7 + $0xfc0] ss:$28 sps:$4 sm:$0xff]  }
 0x130   :  { %4926 = vmatpush1.bf16.msra.mxu0 %v8492_v51  ;;  %v9967_v51 = vrot.slane %v9950_v36, %v9902_v49  ;;  %v8581_v36 = vld [vmem:[#allocation7 + $0x4dc] ss:$28 sps:$4 sm:$0xff]  }
 0x131   :  { %4967 = vmatpush1.bf16.msra.mxu1 %v8495_v52  ;;  %4927 = vmatprep.subr.bf16.mxu0 %v8500_v53  ;;  %v8567_v52 = vld [vmem:[#allocation7 + $0x1340] ss:$28 sps:$4 sm:$0xff]   ;;  %v8572_v53 = vld [vmem:[#allocation7 + $0x15ac] ss:$28 sps:$4 sm:$0xff]  }
 0x132   :  { %4968 = vmatprep.subr.bf16.mxu1 %v8503_v54  ;;  %v8575_v54 = vld [vmem:[#allocation7 + $0x514] ss:$28 sps:$4 sm:$0xff]  }
 0x134   :  { %4928 = vmatpush1.bf16.msra.mxu0 %v8498_v55  ;;  %v9971_v55 = vcombine.high %v9967_v51, %v9967_v51 }
 0x135   :  { %4969 = vmatpush1.bf16.msra.mxu1 %v8501_v56  ;;  %4929 = vmatprep.subr.bf16.mxu0 %v8506_v57  ;;  %v8570_v56 = vld [vmem:[#allocation7 + $0x15a8] ss:$28 sps:$4 sm:$0xff]   ;;  %v8573_v57 = vld [vmem:[#allocation7 + $0x510] ss:$28 sps:$4 sm:$0xff]  }
 0x136   :  { %4970 = vmatprep.subr.bf16.mxu1 %v8509_v58  ;;  %v8578_v58 = vld [vmem:[#allocation7 + $0x1574] ss:$28 sps:$4 sm:$0xff]  }
 0x138   :  { %4930 = vmatpush1.bf16.msra.mxu0 %v8504_v59  ;;  %v8576_v59 = vld [vmem:[#allocation7 + $0x1570] ss:$28 sps:$4 sm:$0xff]  }
 0x139   :  { %4971 = vmatpush1.bf16.msra.mxu1 %v8507_v61  ;;  %4931 = vmatprep.subr.bf16.mxu0 %v8512_v62  ;;  %v8579_v61 = vld [vmem:[#allocation7 + $0x4d8] ss:$28 sps:$4 sm:$0xff]  }
 0x13a   :  { %4972 = vmatprep.subr.bf16.mxu1 %v8515_v63  ;;  %v8584_v62 = vld [vmem:[#allocation7 + $0x153c] ss:$28 sps:$4 sm:$0xff]   ;;  %v8587_v63 = vld [vmem:[#allocation7 + $0x4a4] ss:$28 sps:$4 sm:$0xff]  }
 0x13c   :  { %4932 = vmatpush1.bf16.msra.mxu0 %v8510_v1  ;;  %v8582_v1 = vld [vmem:[#allocation7 + $0x1538] ss:$28 sps:$4 sm:$0xff]  }
 0x13d   :  { %4973 = vmatpush1.bf16.msra.mxu1 %v8513_v2  ;;  %4933 = vmatprep.subr.bf16.mxu0 %v8518_v3  ;;  %v1100_v2 = vcombine.high %v9946_v34, %v9946_v34  ;;  %v8585_v3 = vld [vmem:[#allocation7 + $0x4a0] ss:$28 sps:$4 sm:$0xff]   ;;  %v8595_v34 = vld [vmem:[#allocation7 + $0x190] ss:$28 sps:$4 sm:$0xff]  }
 0x13e   :  { %4974 = vmatprep.subr.bf16.mxu1 %v8521_v4  ;;  %v8590_v4 = vld [vmem:[#allocation7 + $0x1504] ss:$28 sps:$4 sm:$0xff]  }
 0x140   :  { %4934 = vmatpush1.bf16.msra.mxu0 %v8516_v5  ;;  %v8593_v5 = vld [vmem:[#allocation7 + $0x46c] ss:$28 sps:$4 sm:$0xff]  }
 0x141   :  { %4975 = vmatpush1.bf16.msra.mxu1 %v8519_v7  ;;  %4935 = vmatprep.subr.bf16.mxu0 %v8524_v8  ;;  %v8588_v7 = vld [vmem:[#allocation7 + $0x1500] ss:$28 sps:$4 sm:$0xff]   ;;  %v1114_v8 = vrot.slane %v1100_v2, %v9902_v49 }
 0x142   :  { %4976 = vmatprep.subr.bf16.mxu1 %v8527_v9  ;;  %v8591_v9 = vld [vmem:[#allocation7 + $0x468] ss:$28 sps:$4 sm:$0xff]   ;;  %v8655_v2 = vld [vmem:[#allocation7 + $0x2e0] ss:$28 sps:$4 sm:$0xff]  }
 0x144   :  { %4936 = vmatpush2.bf16.msra.mxu0 %v8522_v10  ;;  %v8597_v10 = vld [vmem:[#allocation7 + $0x194] ss:$28 sps:$4 sm:$0xff]  }
 0x145   :  { %4977 = vmatpush2.bf16.msra.mxu1 %v8525_v11  ;;  %4937 = vmatprep.subr.bf16.mxu0 %v8530_v12  ;;  %v8600_v11 = vld [vmem:[#allocation7 + $0x434] ss:$28 sps:$4 sm:$0xff]   ;;  %v9981_v12 = vrot.slane %v1114_v8, %v9902_v49  ;;  %v8612_v49 = vld [vmem:[#allocation7 + $0x3c4] ss:$28 sps:$4 sm:$0xff]  }
 0x146   :  { %4978 = vmatprep.subr.bf16.mxu1 %v8533_v14  ;;  %v8598_v14 = vld [vmem:[#allocation7 + $0x430] ss:$28 sps:$4 sm:$0xff]   ;;  %v8664_v8 = vld [vmem:[#allocation7 + $0x548] ss:$28 sps:$4 sm:$0xff]  }
 0x148   :  { %4938 = vmatpush2.bf16.msra.mxu0 %v8528_v15  ;;  %v8603_v15 = vld [vmem:[#allocation7 + $0x15c] ss:$28 sps:$4 sm:$0xff]  }
 0x149   :  { %4979 = vmatpush2.bf16.msra.mxu1 %v8531_v16  ;;  %4939 = vmatprep.subr.bf16.mxu0 %v8536_v19  ;;  %v8606_v16 = vld [vmem:[#allocation7 + $0x3fc] ss:$28 sps:$4 sm:$0xff]  }
 0x14a   :  { %4980 = vmatprep.subr.bf16.mxu1 %v8539_v20  ;;  %v8601_v19 = vld [vmem:[#allocation7 + $0x158] ss:$28 sps:$4 sm:$0xff]  }
 0x14b   :  { %v8604_v20 = vld [vmem:[#allocation7 + $0x3f8] ss:$28 sps:$4 sm:$0xff]  }
 0x14c   :  { %4940 = vmatpush2.bf16.msra.mxu0 %v8534_v21  ;;  %v8609_v21 = vld [vmem:[#allocation7 + $0x124] ss:$28 sps:$4 sm:$0xff]  }
 0x14d   :  { %4981 = vmatpush2.bf16.msra.mxu1 %v8537_v22  ;;  %4941 = vmatprep.subr.bf16.mxu0 %v8542_v24  ;;  %v8607_v22 = vld [vmem:[#allocation7 + $0x120] ss:$28 sps:$4 sm:$0xff]  }
 0x14e   :  { %4982 = vmatprep.subr.bf16.mxu1 %v8545_v25  ;;  %v8610_v24 = vld [vmem:[#allocation7 + $0x3c0] ss:$28 sps:$4 sm:$0xff]   ;;  %v8615_v25 = vld [vmem:[#allocation7 + $0xec] ss:$28 sps:$4 sm:$0xff]  }
 0x150   :  { %4942 = vmatpush2.bf16.msra.mxu0 %v8540_v26  ;;  %v8618_v26 = vld [vmem:[#allocation7 + $0x38c] ss:$28 sps:$4 sm:$0xff]  }
 0x151   :  { %4983 = vmatpush2.bf16.msra.mxu1 %v8543_v28  ;;  %4943 = vmatprep.subr.bf16.mxu0 %v8548_v29  ;;  %v8613_v28 = vld [vmem:[#allocation7 + $0xe8] ss:$28 sps:$4 sm:$0xff]  }
 0x152   :  { %4984 = vmatprep.subr.bf16.mxu1 %v8551_v30  ;;  %v8616_v29 = vld [vmem:[#allocation7 + $0x388] ss:$28 sps:$4 sm:$0xff]   ;;  %v8621_v30 = vld [vmem:[#allocation7 + $0xb4] ss:$28 sps:$4 sm:$0xff]  }
 0x154   :  { %4944 = vmatpush2.bf16.msra.mxu0 %v8546_v32  ;;  %v8624_v32 = vld [vmem:[#allocation7 + $0x6d4] ss:$28 sps:$4 sm:$0xff]  }
 0x155   :  { %4985 = vmatpush2.bf16.msra.mxu1 %v8549_v33  ;;  %4945 = vmatprep.subr.bf16.mxu0 %v8554_v6  ;;  %v8619_v33 = vld [vmem:[#allocation7 + $0xb0] ss:$28 sps:$4 sm:$0xff]  }
 0x156   :  { %4986 = vmatprep.subr.bf16.mxu1 %v8557_v35  ;;  %v8622_v6 = vld [vmem:[#allocation7 + $0x6d0] ss:$28 sps:$4 sm:$0xff]   ;;  %v8627_v35 = vld [vmem:[#allocation7 + $0x7c] ss:$28 sps:$4 sm:$0xff]  }
 0x158   :  { %4946 = vmatpush2.bf16.msra.mxu0 %v8552_v37  ;;  %v8630_v37 = vld [vmem:[#allocation7 + $0x69c] ss:$28 sps:$4 sm:$0xff]  }
 0x159   :  { %4987 = vmatpush2.bf16.msra.mxu1 %v8555_v38  ;;  %4947 = vmatprep.subr.bf16.mxu0 %v8560_v39  ;;  %v8625_v38 = vld [vmem:[#allocation7 + $0x78] ss:$28 sps:$4 sm:$0xff]  }
 0x15a   :  { %4988 = vmatprep.subr.bf16.mxu1 %v8563_v41  ;;  %v8628_v39 = vld [vmem:[#allocation7 + $0x698] ss:$28 sps:$4 sm:$0xff]   ;;  %v8633_v41 = vld [vmem:[#allocation7 + $0x44] ss:$28 sps:$4 sm:$0xff]  }
 0x15c   :  { %4948 = vmatpush2.bf16.msra.mxu0 %v8558_v43  ;;  %v8636_v43 = vld [vmem:[#allocation7 + $0x664] ss:$28 sps:$4 sm:$0xff]  }
 0x15d   :  { %4989 = vmatpush2.bf16.msra.mxu1 %v8561_v46  ;;  %4949 = vmatprep.subr.bf16.mxu0 %v8566_v47  ;;  %v8631_v46 = vld [vmem:[#allocation7 + $0x40] ss:$28 sps:$4 sm:$0xff]  }
 0x15e   :  { %4990 = vmatprep.subr.bf16.mxu1 %v8569_v48  ;;  %v8634_v47 = vld [vmem:[#allocation7 + $0x660] ss:$28 sps:$4 sm:$0xff]   ;;  %v8639_v48 = vld [vmem:[#allocation7 + $0xc] ss:$28 sps:$4 sm:$0xff]  }
 0x160   :  { %4950 = vmatpush2.bf16.msra.mxu0 %v8564_v50  ;;  %v8642_v50 = vld [vmem:[#allocation7 + $0x62c] ss:$28 sps:$4 sm:$0xff]  }
 0x161   :  { %4991 = vmatpush2.bf16.msra.mxu1 %v8567_v52  ;;  %5083 = vmatprep.subr.bf16.mxu0 %v8575_v54  ;;  %v8637_v52 = vld [vmem:[#allocation7 + $0x8] ss:$28 sps:$4 sm:$0xff]   ;;  %v8645_v54 = vld [vmem:[#allocation7 + $0x354] ss:$28 sps:$4 sm:$0xff]  }
 0x162   :  { %5009 = vmatprep.subr.bf16.mxu1 %v8572_v53  ;;  %v8640_v53 = vld [vmem:[#allocation7 + $0x628] ss:$28 sps:$4 sm:$0xff]  }
 0x163   :  { %4952 = vmatmul.mubr.bf16.vlgmr.msra.gmra.mxu0 %v9967_v51 }
 0x164   :  { %4993 = vmatmul.mubr.bf16.vlgmr.msra.gmra.mxu1 %v9971_v55  ;;  %5084 = vmatpush1.bf16.msra.mxu0 %v8573_v57  ;;  %v8643_v57 = vld [vmem:[#allocation7 + $0x350] ss:$28 sps:$4 sm:$0xff]  }
 0x165   :  { %5010 = vmatpush1.bf16.msra.mxu1 %v8570_v56  ;;  %5085 = vmatprep.subr.bf16.mxu0 %v8581_v36  ;;  %v8648_v56 = vld [vmem:[#allocation7 + $0x5f4] ss:$28 sps:$4 sm:$0xff]   ;;  %v8651_v36 = vld [vmem:[#allocation7 + $0x31c] ss:$28 sps:$4 sm:$0xff]  }
 0x166   :  { %5011 = vmatprep.subr.bf16.mxu1 %v8578_v58  ;;  %5033 = vmatprep.mubr.bf16.mxu1 %v9769_v40  ;;  %v8646_v58 = vld [vmem:[#allocation7 + $0x5f0] ss:$28 sps:$4 sm:$0xff]  }
 0x167   :  { %5115 = vmatprep.mubr.bf16.mxu0 %v9910_v0 }
 0x168   :  { %5086 = vmatpush1.bf16.msra.mxu0 %v8579_v61  ;;  %v8649_v61 = vld [vmem:[#allocation7 + $0x318] ss:$28 sps:$4 sm:$0xff]  }
 0x169   :  { %5012 = vmatpush1.bf16.msra.mxu1 %v8576_v59  ;;  %5087 = vmatprep.subr.bf16.mxu0 %v8587_v63  ;;  %v8654_v59 = vld [vmem:[#allocation7 + $0x5bc] ss:$28 sps:$4 sm:$0xff]   ;;  %v8657_v63 = vld [vmem:[#allocation7 + $0x2e4] ss:$28 sps:$4 sm:$0xff]  }
 0x16a   :  { %5013 = vmatprep.subr.bf16.mxu1 %v8584_v62  ;;  %v8652_v62 = vld [vmem:[#allocation7 + $0x5b8] ss:$28 sps:$4 sm:$0xff]  }
 0x16c   :  { %5088 = vmatpush1.bf16.msra.mxu0 %v8585_v3  ;;  %v8658_v3 = vld [vmem:[#allocation7 + $0x580] ss:$28 sps:$4 sm:$0xff]  }
 0x16d   :  { %5014 = vmatpush1.bf16.msra.mxu1 %v8582_v1  ;;  %5089 = vmatprep.subr.bf16.mxu0 %v8593_v5  ;;  %v8660_v1 = vld [vmem:[#allocation7 + $0x584] ss:$28 sps:$4 sm:$0xff]   ;;  %v8666_v5 = vld [vmem:[#allocation7 + $0x54c] ss:$28 sps:$4 sm:$0xff]  }
 0x16e   :  { %5015 = vmatprep.subr.bf16.mxu1 %v8590_v4  ;;  %v8663_v4 = vld [vmem:[#allocation7 + $0x2ac] ss:$28 sps:$4 sm:$0xff]  }
 0x170   :  { %5090 = vmatpush1.bf16.msra.mxu0 %v8591_v9  ;;  %v1012_v9 = vld [vmem:[#allocation8] sm:$0xff] }
 0x171   :  { %5016 = vmatpush1.bf16.msra.mxu1 %v8588_v7  ;;  %5091 = vmatprep.subr.bf16.mxu0 %v8600_v11  ;;  %v8661_v7 = vld [vmem:[#allocation7 + $0x2a8] ss:$28 sps:$4 sm:$0xff]   ;;  %v8669_v11 = vld [vmem:[#allocation7 + $0x274] ss:$28 sps:$4 sm:$0xff]  }
 0x172   :  { %5042 = vmatprep.subr.bf16.mxu1 %v8597_v10  ;;  %v9987_v10 = vsub.s32 0, %v9899_v42 }
 0x174   :  { %7914 = vmatmul.mubr.msk.bf16.vlgmr.msra.gmra.mxu1 %vm4751_vm0, %v9981_v12  ;;  %5092 = vmatpush1.bf16.msra.mxu0 %v8598_v14  ;;  %v9990_v14 = vsub.s32 1, %v9899_v42 }
 0x175   :  { %5043 = vmatpush1.bf16.msra.mxu1 %v8595_v34  ;;  %5093 = vmatprep.subr.bf16.mxu0 %v8606_v16  ;;  %v8672_v34 = vld [vmem:[#allocation7 + $0xc14] ss:$28 sps:$4 sm:$0xff]   ;;  %v1017_v16 = vrot.slane %v1012_v9, %v9987_v10 }
 0x176   :  { %5044 = vmatprep.subr.bf16.mxu1 %v8603_v15  ;;  %5074 = vmatprep.mubr.bf16.mxu1 %v9906_v60  ;;  %v8667_v15 = vld [vmem:[#allocation7 + $0x270] ss:$28 sps:$4 sm:$0xff]  }
 0x178   :  { %5094 = vmatpush1.bf16.msra.mxu0 %v8604_v20  ;;  %v8675_v20 = vld [vmem:[#allocation7 + $0x23c] ss:$28 sps:$4 sm:$0xff]  }
 0x179   :  { %5045 = vmatpush1.bf16.msra.mxu1 %v8601_v19  ;;  %5095 = vmatprep.subr.bf16.mxu0 %v8612_v49  ;;  %v8670_v19 = vld [vmem:[#allocation7 + $0xc10] ss:$28 sps:$4 sm:$0xff]   ;;  %v1021_v49 = vrot.slane %v1012_v9, %v9990_v14 }
 0x17a   :  { %5046 = vmatprep.subr.bf16.mxu1 %v8609_v21  ;;  %v8678_v21 = vld [vmem:[#allocation7 + $0xbdc] ss:$28 sps:$4 sm:$0xff]   ;;  %v8717_v9 = vld [vmem:[#allocation7 + $0x7b4] ss:$28 sps:$4 sm:$0xff]  }
 0x17c   :  { %5096 = vmatpush1.bf16.msra.mxu0 %v8610_v24 }
 0x17d   :  { %5047 = vmatpush1.bf16.msra.mxu1 %v8607_v22  ;;  %5097 = vmatprep.subr.bf16.mxu0 %v8618_v26  ;;  %v8676_v26 = vld [vmem:[#allocation7 + $0xbd8] ss:$28 sps:$4 sm:$0xff]  }
 0x17e   :  { %5048 = vmatprep.subr.bf16.mxu1 %v8615_v25  ;;  %v8673_v25 = vld [vmem:[#allocation7 + $0x238] ss:$28 sps:$4 sm:$0xff]  }
 0x180   :  { %5098 = vmatpush1.bf16.msra.mxu0 %v8616_v29 }
 0x181   :  { %5049 = vmatpush1.bf16.msra.mxu1 %v8613_v28  ;;  %5099 = vmatprep.subr.bf16.mxu0 %v8624_v32  ;;  %v8681_v32 = vld [vmem:[#allocation7 + $0x204] ss:$28 sps:$4 sm:$0xff]  }
 0x182   :  { %5050 = vmatprep.subr.bf16.mxu1 %v8621_v30 }
 0x184   :  { %5100 = vmatpush2.bf16.msra.mxu0 %v8622_v6 }
 0x185   :  { %5051 = vmatpush1.bf16.msra.mxu1 %v8619_v33  ;;  %5101 = vmatprep.subr.bf16.mxu0 %v8630_v37  ;;  %v8684_v33 = vld [vmem:[#allocation7 + $0xba4] ss:$28 sps:$4 sm:$0xff]  }
 0x186   :  { %5052 = vmatprep.subr.bf16.mxu1 %v8627_v35  ;;  %v8679_v37 = vld [vmem:[#allocation7 + $0x200] ss:$28 sps:$4 sm:$0xff]  }
 0x188   :  { %5102 = vmatpush2.bf16.msra.mxu0 %v8628_v39 }
 0x189   :  { %5053 = vmatpush1.bf16.msra.mxu1 %v8625_v38  ;;  %5103 = vmatprep.subr.bf16.mxu0 %v8636_v43  ;;  %v8682_v38 = vld [vmem:[#allocation7 + $0xba0] ss:$28 sps:$4 sm:$0xff]  }
 0x18a   :  { %5054 = vmatprep.subr.bf16.mxu1 %v8633_v41 }
 0x18c   :  { %5104 = vmatpush2.bf16.msra.mxu0 %v8634_v47  ;;  %v8687_v47 = vld [vmem:[#allocation7 + $0x1cc] ss:$28 sps:$4 sm:$0xff]  }
 0x18d   :  { %5055 = vmatpush1.bf16.msra.mxu1 %v8631_v46  ;;  %5105 = vmatprep.subr.bf16.mxu0 %v8642_v50 }
 0x18e   :  { %5056 = vmatprep.subr.bf16.mxu1 %v8639_v48  ;;  %v8690_v48 = vld [vmem:[#allocation7 + $0xb6c] ss:$28 sps:$4 sm:$0xff]  }
 0x190   :  { %5106 = vmatpush2.bf16.msra.mxu0 %v8640_v53  ;;  %v8688_v53 = vld [vmem:[#allocation7 + $0xb68] ss:$28 sps:$4 sm:$0xff]  }
 0x191   :  { %5057 = vmatpush1.bf16.msra.mxu1 %v8637_v52  ;;  %5107 = vmatprep.subr.bf16.mxu0 %v8648_v56  ;;  %v8685_v52 = vld [vmem:[#allocation7 + $0x1c8] ss:$28 sps:$4 sm:$0xff]   ;;  %v8696_v56 = vld [vmem:[#allocation7 + $0xb34] ss:$28 sps:$4 sm:$0xff]  }
 0x192   :  { %5058 = vmatprep.subr.bf16.mxu1 %v8645_v54  ;;  %v8693_v54 = vld [vmem:[#allocation7 + $0x894] ss:$28 sps:$4 sm:$0xff]  }
 0x194   :  { %5108 = vmatpush2.bf16.msra.mxu0 %v8646_v58  ;;  %v8694_v58 = vld [vmem:[#allocation7 + $0xb30] ss:$28 sps:$4 sm:$0xff]  }
 0x195   :  { %5059 = vmatpush2.bf16.msra.mxu1 %v8643_v57  ;;  %5109 = vmatprep.subr.bf16.mxu0 %v8654_v59  ;;  %v8691_v57 = vld [vmem:[#allocation7 + $0x890] ss:$28 sps:$4 sm:$0xff]   ;;  %v8702_v59 = vld [vmem:[#allocation7 + $0xafc] ss:$28 sps:$4 sm:$0xff]  }
 0x196   :  { %5060 = vmatprep.subr.bf16.mxu1 %v8651_v36  ;;  %v8699_v36 = vld [vmem:[#allocation7 + $0x85c] ss:$28 sps:$4 sm:$0xff]  }
 0x198   :  { %5110 = vmatpush2.bf16.msra.mxu0 %v8652_v62  ;;  %v8700_v62 = vld [vmem:[#allocation7 + $0xaf8] ss:$28 sps:$4 sm:$0xff]  }
 0x199   :  { %5061 = vmatpush2.bf16.msra.mxu1 %v8649_v61  ;;  %5111 = vmatprep.subr.bf16.mxu0 %v8660_v1  ;;  %v8697_v61 = vld [vmem:[#allocation7 + $0x858] ss:$28 sps:$4 sm:$0xff]   ;;  %v8708_v1 = vld [vmem:[#allocation7 + $0xac4] ss:$28 sps:$4 sm:$0xff]  }
 0x19a   :  { %5062 = vmatprep.subr.bf16.mxu1 %v8657_v63  ;;  %v8705_v63 = vld [vmem:[#allocation7 + $0x824] ss:$28 sps:$4 sm:$0xff]  }
 0x19c   :  { %5112 = vmatpush2.bf16.msra.mxu0 %v8658_v3  ;;  %v8706_v3 = vld [vmem:[#allocation7 + $0xac0] ss:$28 sps:$4 sm:$0xff]  }
 0x19d   :  { %5063 = vmatpush2.bf16.msra.mxu1 %v8655_v2  ;;  %5113 = vmatprep.subr.bf16.mxu0 %v8666_v5  ;;  %v8703_v2 = vld [vmem:[#allocation7 + $0x820] ss:$28 sps:$4 sm:$0xff]   ;;  %v8714_v5 = vld [vmem:[#allocation7 + $0xa8c] ss:$28 sps:$4 sm:$0xff]  }
 0x19e   :  { %5064 = vmatprep.subr.bf16.mxu1 %v8663_v4  ;;  %v8711_v4 = vld [vmem:[#allocation7 + $0x7ec] ss:$28 sps:$4 sm:$0xff]  }
 0x1a0   :  { %5114 = vmatpush2.bf16.msra.mxu0 %v8664_v8  ;;  %v8712_v8 = vld [vmem:[#allocation7 + $0xa88] ss:$28 sps:$4 sm:$0xff]  }
 0x1a1   :  { %5065 = vmatpush2.bf16.msra.mxu1 %v8661_v7  ;;  %5165 = vmatprep.subr.bf16.mxu0 %v8672_v34  ;;  %v8709_v7 = vld [vmem:[#allocation7 + $0x7e8] ss:$28 sps:$4 sm:$0xff]   ;;  %v8715_v34 = vld [vmem:[#allocation7 + $0x7b0] ss:$28 sps:$4 sm:$0xff]  }
 0x1a2   :  { %5066 = vmatprep.subr.bf16.mxu1 %v8669_v11  ;;  %v8720_v11 = vld [vmem:[#allocation7 + $0xdd4] ss:$28 sps:$4 sm:$0xff]  }
 0x1a3   :  { %v4789_v22 = vpop.f32.mrf.mxu0  ;;  %5116 = vmatmul.mubr.bf16.vlgmr.msra.gmra.mxu0 %v9927_v18 }
 0x1a4   :  { %v4830_v24 = vpop.f32.mrf.mxu1  ;;  %v4790_v28 = vadd.f32 %v4789_v22, %v1017_v16  ;;  %5166 = vmatpush1.bf16.msra.mxu0 %v8670_v19  ;;  %5197 = vmatprep.mubr.bf16.mxu0 %v9931_v23  ;;  %v8723_v16 = vld [vmem:[#allocation7 + $0x77c] ss:$28 sps:$4 sm:$0xff]   ;;  %v8732_v22 = vld [vmem:[#allocation7 + $0xd64] ss:$28 sps:$4 sm:$0xff]  }
 0x1a5   :  { %5067 = vmatpush2.bf16.msra.mxu1 %v8667_v15  ;;  %v4791_v29 = vpop.f32.mrf.mxu0  ;;  %5167 = vmatprep.subr.bf16.mxu0 %v8678_v21  ;;  %v8718_v15 = vld [vmem:[#allocation7 + $0xdd0] ss:$28 sps:$4 sm:$0xff]   ;;  %v8726_v19 = vld [vmem:[#allocation7 + $0xd9c] ss:$28 sps:$4 sm:$0xff]  }
 0x1a6   :  { %v4832_v30 = vpop.f32.mrf.mxu1  ;;  %5068 = vmatprep.subr.bf16.mxu1 %v8675_v20  ;;  %v9995_v6 = vadd.f32 %v4830_v24, %v4790_v28  ;;  %v4792_v35 = vadd.f32 %v4791_v29, %v1021_v49  ;;  %v8721_v20 = vld [vmem:[#allocation7 + $0x778] ss:$28 sps:$4 sm:$0xff]   ;;  %v8729_v49 = vld [vmem:[#allocation7 + $0x744] ss:$28 sps:$4 sm:$0xff]   ;;  %v8738_v28 = vld [vmem:[#allocation7 + $0xd2c] ss:$28 sps:$4 sm:$0xff]  }
 0x1a7   :  { %v4793_v41 = vpop.f32.mrf.mxu0  ;;  %v8724_v21 = vld [vmem:[#allocation7 + $0xd98] ss:$28 sps:$4 sm:$0xff]   ;;  %v8727_v24 = vld [vmem:[#allocation7 + $0x740] ss:$28 sps:$4 sm:$0xff]   ;;  %v8733_v29 = vld [vmem:[#allocation7 + $0x708] ss:$28 sps:$4 sm:$0xff]  }
 0x1a8   :  { %v4834_v39 = vpop.f32.mrf.mxu1  ;;  %v9998_v43 = vadd.f32 %v4832_v30, %v4792_v35  ;;  %5168 = vmatpush1.bf16.msra.mxu0 %v8676_v26  ;;  %v8735_v26 = vld [vmem:[#allocation7 + $0x70c] ss:$28 sps:$4 sm:$0xff]   ;;  %v8745_v41 = vld [vmem:[#allocation7 + $0xa18] ss:$28 sps:$4 sm:$0xff]  }
 0x1a9   :  { %5069 = vmatpush2.bf16.msra.mxu1 %v8673_v25  ;;  %5169 = vmatprep.subr.bf16.mxu0 %v8684_v33  ;;  %v4794_v50 = vpop.f32.mrf.mxu0  ;;  %v8730_v25 = vld [vmem:[#allocation7 + $0xd60] ss:$28 sps:$4 sm:$0xff]   ;;  %v8736_v30 = vld [vmem:[#allocation7 + $0xd28] ss:$28 sps:$4 sm:$0xff]   ;;  %v8744_v33 = vld [vmem:[#allocation7 + $0xcf4] ss:$28 sps:$4 sm:$0xff]  }
 0x1aa   :  { %v4835_v46 = vpop.f32.mrf.mxu1  ;;  %5070 = vmatprep.subr.bf16.mxu1 %v8681_v32  ;;  %v8741_v32 = vld [vmem:[#allocation7 + $0xa54] ss:$28 sps:$4 sm:$0xff]   ;;  %v8750_v39 = vld [vmem:[#allocation7 + $0xcbc] ss:$28 sps:$4 sm:$0xff]  }
 0x1ab   :  { %v8739_v35 = vld [vmem:[#allocation7 + $0xa50] ss:$28 sps:$4 sm:$0xff]   ;;  %v8748_v46 = vld [vmem:[#allocation7 + $0xcb8] ss:$28 sps:$4 sm:$0xff]   ;;  %v8751_v50 = vld [vmem:[#allocation7 + $0x9e0] ss:$28 sps:$4 sm:$0xff]  }
 0x1ac   :  { %5170 = vmatpush1.bf16.msra.mxu0 %v8682_v38  ;;  %v8747_v38 = vld [vmem:[#allocation7 + $0xa1c] ss:$28 sps:$4 sm:$0xff]  }
 0x1ad   :  { %5071 = vmatpush2.bf16.msra.mxu1 %v8679_v37  ;;  %5171 = vmatprep.subr.bf16.mxu0 %v8690_v48  ;;  %v8742_v37 = vld [vmem:[#allocation7 + $0xcf0] ss:$28 sps:$4 sm:$0xff]   ;;  %v8756_v48 = vld [vmem:[#allocation7 + $0xc84] ss:$28 sps:$4 sm:$0xff]  }
 0x1ae   :  { %5072 = vmatprep.subr.bf16.mxu1 %v8687_v47  ;;  %v8753_v47 = vld [vmem:[#allocation7 + $0x9e4] ss:$28 sps:$4 sm:$0xff]  }
 0x1b0   :  { %5172 = vmatpush1.bf16.msra.mxu0 %v8688_v53  ;;  %v8759_v53 = vld [vmem:[#allocation7 + $0x9ac] ss:$28 sps:$4 sm:$0xff]  }
 0x1b1   :  { %5073 = vmatpush2.bf16.msra.mxu1 %v8685_v52  ;;  %5173 = vmatprep.subr.bf16.mxu0 %v8696_v56  ;;  %v8754_v52 = vld [vmem:[#allocation7 + $0xc80] ss:$28 sps:$4 sm:$0xff]   ;;  %v8757_v56 = vld [vmem:[#allocation7 + $0x9a8] ss:$28 sps:$4 sm:$0xff]  }
 0x1b2   :  { %5124 = vmatprep.subr.bf16.mxu1 %v8693_v54  ;;  %v8762_v54 = vld [vmem:[#allocation7 + $0xc4c] ss:$28 sps:$4 sm:$0xff]  }
 0x1b4   :  { %5075 = vmatmul.mubr.bf16.vlgmr.msra.gmra.mxu1 %v9920_v13  ;;  %5174 = vmatpush1.bf16.msra.mxu0 %v8694_v58  ;;  %v8765_v58 = vld [vmem:[#allocation7 + $0x974] ss:$28 sps:$4 sm:$0xff]  }
 0x1b5   :  { %5125 = vmatpush1.bf16.msra.mxu1 %v8691_v57  ;;  %5175 = vmatprep.subr.bf16.mxu0 %v8702_v59  ;;  %v8760_v57 = vld [vmem:[#allocation7 + $0xc48] ss:$28 sps:$4 sm:$0xff]   ;;  %v8763_v59 = vld [vmem:[#allocation7 + $0x970] ss:$28 sps:$4 sm:$0xff]  }
 0x1b6   :  { %5126 = vmatprep.subr.bf16.mxu1 %v8699_v36  ;;  %5156 = vmatprep.mubr.bf16.mxu1 %v9923_v17  ;;  %v8768_v36 = vld [vmem:[#allocation7 + $0x1314] ss:$28 sps:$4 sm:$0xff]  }
 0x1b8   :  { %5176 = vmatpush1.bf16.msra.mxu0 %v8700_v62  ;;  %v8771_v62 = vld [vmem:[#allocation7 + $0x93c] ss:$28 sps:$4 sm:$0xff]  }
 0x1b9   :  { %5127 = vmatpush1.bf16.msra.mxu1 %v8697_v61  ;;  %5177 = vmatprep.subr.bf16.mxu0 %v8708_v1  ;;  %v8766_v61 = vld [vmem:[#allocation7 + $0x1310] ss:$28 sps:$4 sm:$0xff]  }
 0x1ba   :  { %5128 = vmatprep.subr.bf16.mxu1 %v8705_v63  ;;  %v8774_v63 = vld [vmem:[#allocation7 + $0x12dc] ss:$28 sps:$4 sm:$0xff]  }
 0x1bc   :  { %5178 = vmatpush1.bf16.msra.mxu0 %v8706_v3 }
 0x1bd   :  { %5129 = vmatpush1.bf16.msra.mxu1 %v8703_v2  ;;  %5179 = vmatprep.subr.bf16.mxu0 %v8714_v5  ;;  %v8772_v5 = vld [vmem:[#allocation7 + $0x12d8] ss:$28 sps:$4 sm:$0xff]  }
 0x1be   :  { %5130 = vmatprep.subr.bf16.mxu1 %v8711_v4  ;;  %v8769_v4 = vld [vmem:[#allocation7 + $0x938] ss:$28 sps:$4 sm:$0xff]  }
 0x1c0   :  { %5180 = vmatpush1.bf16.msra.mxu0 %v8712_v8 }
 0x1c1   :  { %5131 = vmatpush1.bf16.msra.mxu1 %v8709_v7  ;;  %5181 = vmatprep.subr.bf16.mxu0 %v8720_v11  ;;  %v8780_v11 = vld [vmem:[#allocation7 + $0x12a4] ss:$28 sps:$4 sm:$0xff]  }
 0x1c2   :  { %5132 = vmatprep.subr.bf16.mxu1 %v8717_v9  ;;  %v8777_v9 = vld [vmem:[#allocation7 + $0x904] ss:$28 sps:$4 sm:$0xff]  }
 0x1c4   :  { %5182 = vmatpush2.bf16.msra.mxu0 %v8718_v15 }
 0x1c5   :  { %5133 = vmatpush1.bf16.msra.mxu1 %v8715_v34  ;;  %5183 = vmatprep.subr.bf16.mxu0 %v8726_v19 }
 0x1c6   :  { %5134 = vmatprep.subr.bf16.mxu1 %v8723_v16 }
 0x1c8   :  { %5184 = vmatpush2.bf16.msra.mxu0 %v8724_v21  ;;  %v8778_v21 = vld [vmem:[#allocation7 + $0x12a0] ss:$28 sps:$4 sm:$0xff]  }
 0x1c9   :  { %5135 = vmatpush1.bf16.msra.mxu1 %v8721_v20  ;;  %5185 = vmatprep.subr.bf16.mxu0 %v8732_v22  ;;  %v8783_v22 = vld [vmem:[#allocation7 + $0x8cc] ss:$28 sps:$4 sm:$0xff]  }
 0x1ca   :  { %5136 = vmatprep.subr.bf16.mxu1 %v8729_v49 }
 0x1cc   :  { %5186 = vmatpush2.bf16.msra.mxu0 %v8730_v25 }
 0x1cd   :  { %5137 = vmatpush1.bf16.msra.mxu1 %v8727_v24  ;;  %5187 = vmatprep.subr.bf16.mxu0 %v8738_v28  ;;  %v8786_v24 = vld [vmem:[#allocation7 + $0x126c] ss:$28 sps:$4 sm:$0xff]   ;;  %v8789_v28 = vld [vmem:[#allocation7 + $0xf94] ss:$28 sps:$4 sm:$0xff]  }
 0x1ce   :  { %5138 = vmatprep.subr.bf16.mxu1 %v8735_v26  ;;  %v8781_v26 = vld [vmem:[#allocation7 + $0x8c8] ss:$28 sps:$4 sm:$0xff]  }
 0x1d0   :  { %5188 = vmatpush2.bf16.msra.mxu0 %v8736_v30  ;;  %v8787_v30 = vld [vmem:[#allocation7 + $0xf90] ss:$28 sps:$4 sm:$0xff]  }
 0x1d1   :  { %5139 = vmatpush1.bf16.msra.mxu1 %v8733_v29  ;;  %5189 = vmatprep.subr.bf16.mxu0 %v8744_v33  ;;  %v8792_v29 = vld [vmem:[#allocation7 + $0x1234] ss:$28 sps:$4 sm:$0xff]   ;;  %v8795_v33 = vld [vmem:[#allocation7 + $0xf5c] ss:$28 sps:$4 sm:$0xff]  }
 0x1d2   :  { %5140 = vmatprep.subr.bf16.mxu1 %v8741_v32  ;;  %v8790_v32 = vld [vmem:[#allocation7 + $0x1230] ss:$28 sps:$4 sm:$0xff]  }
 0x1d4   :  { %5190 = vmatpush2.bf16.msra.mxu0 %v8742_v37  ;;  %v8793_v37 = vld [vmem:[#allocation7 + $0xf58] ss:$28 sps:$4 sm:$0xff]  }
 0x1d5   :  { %5141 = vmatpush2.bf16.msra.mxu1 %v8739_v35  ;;  %5191 = vmatprep.subr.bf16.mxu0 %v8750_v39  ;;  %v8798_v35 = vld [vmem:[#allocation7 + $0x11fc] ss:$28 sps:$4 sm:$0xff]   ;;  %v8801_v39 = vld [vmem:[#allocation7 + $0xf24] ss:$28 sps:$4 sm:$0xff]  }
 0x1d6   :  { %5142 = vmatprep.subr.bf16.mxu1 %v8747_v38  ;;  %v8796_v38 = vld [vmem:[#allocation7 + $0x11f8] ss:$28 sps:$4 sm:$0xff]  }
 0x1d8   :  { %5192 = vmatpush2.bf16.msra.mxu0 %v8748_v46  ;;  %v8799_v46 = vld [vmem:[#allocation7 + $0xf20] ss:$28 sps:$4 sm:$0xff]  }
 0x1d9   :  { %5143 = vmatpush2.bf16.msra.mxu1 %v8745_v41  ;;  %5193 = vmatprep.subr.bf16.mxu0 %v8756_v48  ;;  %v8804_v41 = vld [vmem:[#allocation7 + $0x11c4] ss:$28 sps:$4 sm:$0xff]   ;;  %v8807_v48 = vld [vmem:[#allocation7 + $0xeec] ss:$28 sps:$4 sm:$0xff]  }
 0x1da   :  { %5144 = vmatprep.subr.bf16.mxu1 %v8753_v47  ;;  %v8802_v47 = vld [vmem:[#allocation7 + $0x11c0] ss:$28 sps:$4 sm:$0xff]  }
 0x1dc   :  { %5194 = vmatpush2.bf16.msra.mxu0 %v8754_v52  ;;  %v8805_v52 = vld [vmem:[#allocation7 + $0xee8] ss:$28 sps:$4 sm:$0xff]  }
 0x1dd   :  { %5145 = vmatpush2.bf16.msra.mxu1 %v8751_v50  ;;  %5195 = vmatprep.subr.bf16.mxu0 %v8762_v54  ;;  %v8810_v50 = vld [vmem:[#allocation7 + $0x118c] ss:$28 sps:$4 sm:$0xff]   ;;  %v8813_v54 = vld [vmem:[#allocation7 + $0xeb4] ss:$28 sps:$4 sm:$0xff]  }
 0x1de   :  { %5146 = vmatprep.subr.bf16.mxu1 %v8759_v53  ;;  %v8808_v53 = vld [vmem:[#allocation7 + $0x1188] ss:$28 sps:$4 sm:$0xff]  }
 0x1e0   :  { %5196 = vmatpush2.bf16.msra.mxu0 %v8760_v57  ;;  %v8811_v57 = vld [vmem:[#allocation7 + $0xeb0] ss:$28 sps:$4 sm:$0xff]  }
 0x1e1   :  { %5147 = vmatpush2.bf16.msra.mxu1 %v8757_v56  ;;  %5247 = vmatprep.subr.bf16.mxu0 %v8768_v36  ;;  %v8816_v56 = vld [vmem:[#allocation7 + $0x14d4] ss:$28 sps:$4 sm:$0xff]   ;;  %v8819_v36 = vld [vmem:[#allocation7 + $0xe7c] ss:$28 sps:$4 sm:$0xff]  }
 0x1e2   :  { %5148 = vmatprep.subr.bf16.mxu1 %v8765_v58  ;;  %v8814_v58 = vld [vmem:[#allocation7 + $0x14d0] ss:$28 sps:$4 sm:$0xff]  }
 0x1e3   :  { %v4871_v1 = vpop.f32.mrf.mxu0  ;;  %5198 = vmatmul.mubr.bf16.vlgmr.msra.gmra.mxu0 %v9944_v31 }
 0x1e4   :  { %v4912_v2 = vpop.f32.mrf.mxu1  ;;  %v4872_v3 = vadd.f32 %v4871_v1, %v9995_v6  ;;  %5248 = vmatpush1.bf16.msra.mxu0 %v8766_v61  ;;  %5279 = vmatprep.mubr.bf16.mxu0 %v9962_v45  ;;  %v8775_v6 = vld [vmem:[#allocation7 + $0x900] ss:$28 sps:$4 sm:$0xff]   ;;  %v8817_v61 = vld [vmem:[#allocation7 + $0xe78] ss:$28 sps:$4 sm:$0xff]  }
 0x1e5   :  { %5149 = vmatpush2.bf16.msra.mxu1 %v8763_v59  ;;  %v4873_v7 = vpop.f32.mrf.mxu0  ;;  %5249 = vmatprep.subr.bf16.mxu0 %v8774_v63  ;;  %v8822_v59 = vld [vmem:[#allocation7 + $0x149c] ss:$28 sps:$4 sm:$0xff]   ;;  %v8825_v63 = vld [vmem:[#allocation7 + $0xe44] ss:$28 sps:$4 sm:$0xff]  }
 0x1e6   :  { %v4914_v8 = vpop.f32.mrf.mxu1  ;;  %5150 = vmatprep.subr.bf16.mxu1 %v8771_v62  ;;  %v10004_v34 = vadd.f32 %v4912_v2, %v4872_v3  ;;  %v4874_v15 = vadd.f32 %v4873_v7, %v9998_v43  ;;  %v8784_v43 = vld [vmem:[#allocation7 + $0x1268] ss:$28 sps:$4 sm:$0xff]   ;;  %v8820_v62 = vld [vmem:[#allocation7 + $0x1498] ss:$28 sps:$4 sm:$0xff]   ;;  %v8823_v2 = vld [vmem:[#allocation7 + $0xe40] ss:$28 sps:$4 sm:$0xff]  }
 0x1e7   :  { %v4875_v19 = vpop.f32.mrf.mxu0  ;;  %v8828_v1 = vld [vmem:[#allocation7 + $0x1464] ss:$28 sps:$4 sm:$0xff]  }
 0x1e8   :  { %v4916_v16 = vpop.f32.mrf.mxu1  ;;  %v10008_v20 = vadd.f32 %v4914_v8, %v4874_v15  ;;  %5250 = vmatpush1.bf16.msra.mxu0 %v8772_v5  ;;  %v8826_v3 = vld [vmem:[#allocation7 + $0x1460] ss:$28 sps:$4 sm:$0xff]   ;;  %v8834_v5 = vld [vmem:[#allocation7 + $0x142c] ss:$28 sps:$4 sm:$0xff]  }
 0x1e9   :  { %5151 = vmatpush2.bf16.msra.mxu1 %v8769_v4  ;;  %5251 = vmatprep.subr.bf16.mxu0 %v8780_v11  ;;  %v4876_v25 = vpop.f32.mrf.mxu0  ;;  %v8831_v4 = vld [vmem:[#allocation7 + $0xe0c] ss:$28 sps:$4 sm:$0xff]   ;;  %v8840_v11 = vld [vmem:[#allocation7 + $0x13f4] ss:$28 sps:$4 sm:$0xff]   ;;  %v8843_v19 = vld [vmem:[#allocation7 + $0x111c] ss:$28 sps:$4 sm:$0xff]  }
 0x1ea   :  { %v4917_v49 = vpop.f32.mrf.mxu1  ;;  %5152 = vmatprep.subr.bf16.mxu1 %v8777_v9  ;;  %v8829_v7 = vld [vmem:[#allocation7 + $0xe08] ss:$28 sps:$4 sm:$0xff]   ;;  %v8837_v9 = vld [vmem:[#allocation7 + $0x1154] ss:$28 sps:$4 sm:$0xff]   ;;  %v8847_v25 = vld [vmem:[#allocation7 + $0x10e0] ss:$28 sps:$4 sm:$0xff]  }
 0x1eb   :  { %v8832_v8 = vld [vmem:[#allocation7 + $0x1428] ss:$28 sps:$4 sm:$0xff]   ;;  %v8835_v15 = vld [vmem:[#allocation7 + $0x1150] ss:$28 sps:$4 sm:$0xff]   ;;  %v8844_v49 = vld [vmem:[#allocation7 + $0x13b8] ss:$28 sps:$4 sm:$0xff]  }
 0x1ec   :  { %5252 = vmatpush1.bf16.msra.mxu0 %v8778_v21  ;;  %v8838_v16 = vld [vmem:[#allocation7 + $0x13f0] ss:$28 sps:$4 sm:$0xff]   ;;  %v8841_v21 = vld [vmem:[#allocation7 + $0x1118] ss:$28 sps:$4 sm:$0xff]  }
 0x1ed   :  { %5153 = vmatpush2.bf16.msra.mxu1 %v8775_v6  ;;  %5253 = vmatprep.subr.bf16.mxu0 %v8786_v24  ;;  %v8846_v6 = vld [vmem:[#allocation7 + $0x13bc] ss:$28 sps:$4 sm:$0xff]   ;;  %v8852_v24 = vld [vmem:[#allocation7 + $0x1384] ss:$28 sps:$4 sm:$0xff]  }
 0x1ee   :  { %5154 = vmatprep.subr.bf16.mxu1 %v8783_v22  ;;  %v8849_v22 = vld [vmem:[#allocation7 + $0x10e4] ss:$28 sps:$4 sm:$0xff]  }
 0x1f0   :  { %5254 = vmatpush1.bf16.msra.mxu0 %v8784_v43  ;;  %v8855_v43 = vld [vmem:[#allocation7 + $0x10ac] ss:$28 sps:$4 sm:$0xff]  }
 0x1f1   :  { %5155 = vmatpush2.bf16.msra.mxu1 %v8781_v26  ;;  %5255 = vmatprep.subr.bf16.mxu0 %v8792_v29  ;;  %v8850_v26 = vld [vmem:[#allocation7 + $0x1380] ss:$28 sps:$4 sm:$0xff]   ;;  %v8853_v29 = vld [vmem:[#allocation7 + $0x10a8] ss:$28 sps:$4 sm:$0xff]  }
 0x1f2   :  { %5206 = vmatprep.subr.bf16.mxu1 %v8789_v28  ;;  %v8858_v28 = vld [vmem:[#allocation7 + $0x134c] ss:$28 sps:$4 sm:$0xff]  }
 0x1f4   :  { %5157 = vmatmul.mubr.bf16.vlgmr.msra.gmra.mxu1 %v9940_v27  ;;  %5256 = vmatpush1.bf16.msra.mxu0 %v8790_v32  ;;  %v8861_v32 = vld [vmem:[#allocation7 + $0x1074] ss:$28 sps:$4 sm:$0xff]  }
 0x1f5   :  { %5207 = vmatpush1.bf16.msra.mxu1 %v8787_v30  ;;  %5257 = vmatprep.subr.bf16.mxu0 %v8798_v35  ;;  %v8856_v30 = vld [vmem:[#allocation7 + $0x1348] ss:$28 sps:$4 sm:$0xff]   ;;  %v8859_v35 = vld [vmem:[#allocation7 + $0x1070] ss:$28 sps:$4 sm:$0xff]  }
 0x1f6   :  { %5208 = vmatprep.subr.bf16.mxu1 %v8795_v33  ;;  %5238 = vmatprep.mubr.bf16.mxu1 %v9957_v44  ;;  %v8864_v33 = vld [vmem:[#allocation7 + $0x19c] ss:$28 sps:$4 sm:$0xff]  }
 0x1f8   :  { %5258 = vmatpush1.bf16.msra.mxu0 %v8796_v38  ;;  %v8867_v38 = vld [vmem:[#allocation7 + $0x103c] ss:$28 sps:$4 sm:$0xff]  }
 0x1f9   :  { %5209 = vmatpush1.bf16.msra.mxu1 %v8793_v37  ;;  %5259 = vmatprep.subr.bf16.mxu0 %v8804_v41  ;;  %v8862_v37 = vld [vmem:[#allocation7 + $0x198] ss:$28 sps:$4 sm:$0xff]  }
 0x1fa   :  { %5210 = vmatprep.subr.bf16.mxu1 %v8801_v39  ;;  %v8870_v39 = vld [vmem:[#allocation7 + $0x164] ss:$28 sps:$4 sm:$0xff]  }
 0x1fc   :  { %5260 = vmatpush1.bf16.msra.mxu0 %v8802_v47 }
 0x1fd   :  { %5211 = vmatpush1.bf16.msra.mxu1 %v8799_v46  ;;  %5261 = vmatprep.subr.bf16.mxu0 %v8810_v50  ;;  %v8868_v50 = vld [vmem:[#allocation7 + $0x160] ss:$28 sps:$4 sm:$0xff]  }
 0x1fe   :  { %5212 = vmatprep.subr.bf16.mxu1 %v8807_v48  ;;  %v8865_v48 = vld [vmem:[#allocation7 + $0x1038] ss:$28 sps:$4 sm:$0xff]  }
 0x200   :  { %5262 = vmatpush1.bf16.msra.mxu0 %v8808_v53 }
 0x201   :  { %5213 = vmatpush1.bf16.msra.mxu1 %v8805_v52  ;;  %5263 = vmatprep.subr.bf16.mxu0 %v8816_v56  ;;  %v8876_v56 = vld [vmem:[#allocation7 + $0x12c] ss:$28 sps:$4 sm:$0xff]  }
 0x202   :  { %5214 = vmatprep.subr.bf16.mxu1 %v8813_v54  ;;  %v8873_v54 = vld [vmem:[#allocation7 + $0x1004] ss:$28 sps:$4 sm:$0xff]  }
 0x204   :  { %5264 = vmatpush2.bf16.msra.mxu0 %v8814_v58 }
 0x205   :  { %5215 = vmatpush1.bf16.msra.mxu1 %v8811_v57  ;;  %5265 = vmatprep.subr.bf16.mxu0 %v8822_v59 }
 0x206   :  { %5216 = vmatprep.subr.bf16.mxu1 %v8819_v36 }
 0x208   :  { %5266 = vmatpush2.bf16.msra.mxu0 %v8820_v62  ;;  %v8874_v62 = vld [vmem:[#allocation7 + $0x128] ss:$28 sps:$4 sm:$0xff]  }
 0x209   :  { %5217 = vmatpush1.bf16.msra.mxu1 %v8817_v61  ;;  %5267 = vmatprep.subr.bf16.mxu0 %v8828_v1  ;;  %v8879_v1 = vld [vmem:[#allocation7 + $0xfcc] ss:$28 sps:$4 sm:$0xff]  }
 0x20a   :  { %5218 = vmatprep.subr.bf16.mxu1 %v8825_v63 }
 0x20c   :  { %5268 = vmatpush2.bf16.msra.mxu0 %v8826_v3 }
 0x20d   :  { %5219 = vmatpush1.bf16.msra.mxu1 %v8823_v2  ;;  %5269 = vmatprep.subr.bf16.mxu0 %v8834_v5  ;;  %v8882_v2 = vld [vmem:[#allocation7 + $0xf4] ss:$28 sps:$4 sm:$0xff]  }
 0x20e   :  { %5220 = vmatprep.subr.bf16.mxu1 %v8831_v4  ;;  %v8877_v4 = vld [vmem:[#allocation7 + $0xfc8] ss:$28 sps:$4 sm:$0xff]   ;;  %v8880_v5 = vld [vmem:[#allocation7 + $0xf0] ss:$28 sps:$4 sm:$0xff]  }
 0x210   :  { %5270 = vmatpush2.bf16.msra.mxu0 %v8832_v8  ;;  %v8883_v8 = vld [vmem:[#allocation7 + $0x15b0] ss:$28 sps:$4 sm:$0xff]  }
 0x211   :  { %5221 = vmatpush1.bf16.msra.mxu1 %v8829_v7  ;;  %5271 = vmatprep.subr.bf16.mxu0 %v8840_v11  ;;  %v8888_v7 = vld [vmem:[#allocation7 + $0xbc] ss:$28 sps:$4 sm:$0xff]  }
 0x212   :  { %5222 = vmatprep.subr.bf16.mxu1 %v8837_v9  ;;  %v8886_v9 = vld [vmem:[#allocation7 + $0xb8] ss:$28 sps:$4 sm:$0xff]  }
 0x213   :  { %v8891_v11 = vld [vmem:[#allocation7 + $0x157c] ss:$28 sps:$4 sm:$0xff]  }
 0x214   :  { %5272 = vmatpush2.bf16.msra.mxu0 %v8838_v16  ;;  %v8889_v16 = vld [vmem:[#allocation7 + $0x1578] ss:$28 sps:$4 sm:$0xff]  }
 0x215   :  { %5223 = vmatpush2.bf16.msra.mxu1 %v8835_v15  ;;  %5273 = vmatprep.subr.bf16.mxu0 %v8846_v6  ;;  %v8894_v15 = vld [vmem:[#allocation7 + $0x84] ss:$28 sps:$4 sm:$0xff]  }
 0x216   :  { %5224 = vmatprep.subr.bf16.mxu1 %v8843_v19  ;;  %v8892_v19 = vld [vmem:[#allocation7 + $0x80] ss:$28 sps:$4 sm:$0xff]  }
 0x218   :  { %5274 = vmatpush2.bf16.msra.mxu0 %v8844_v49 }
 0x219   :  { %5225 = vmatpush2.bf16.msra.mxu1 %v8841_v21  ;;  %5275 = vmatprep.subr.bf16.mxu0 %v8852_v24  ;;  %v8900_v24 = vld [vmem:[#allocation7 + $0x4c] ss:$28 sps:$4 sm:$0xff]  }
 0x21a   :  { %5226 = vmatprep.subr.bf16.mxu1 %v8849_v22  ;;  %v8897_v22 = vld [vmem:[#allocation7 + $0x1544] ss:$28 sps:$4 sm:$0xff]  }
 0x21c   :  { %5276 = vmatpush2.bf16.msra.mxu0 %v8850_v26  ;;  %v8895_v26 = vld [vmem:[#allocation7 + $0x1540] ss:$28 sps:$4 sm:$0xff]  }
 0x21d   :  { %5227 = vmatpush2.bf16.msra.mxu1 %v8847_v25  ;;  %5277 = vmatprep.subr.bf16.mxu0 %v8858_v28 }
 0x21e   :  { %5228 = vmatprep.subr.bf16.mxu1 %v8855_v43  ;;  %v8898_v43 = vld [vmem:[#allocation7 + $0x48] ss:$28 sps:$4 sm:$0xff]  }
 0x220   :  { %5278 = vmatpush2.bf16.msra.mxu0 %v8856_v30  ;;  %v8903_v30 = vld [vmem:[#allocation7 + $0x150c] ss:$28 sps:$4 sm:$0xff]  }
 0x221   :  { %5229 = vmatpush2.bf16.msra.mxu1 %v8853_v29  ;;  %5329 = vmatprep.subr.bf16.mxu0 %v8864_v33  ;;  %v8901_v33 = vld [vmem:[#allocation7 + $0x1508] ss:$28 sps:$4 sm:$0xff]  }
 0x222   :  { %5230 = vmatprep.subr.bf16.mxu1 %v8861_v32  ;;  %v8906_v32 = vld [vmem:[#allocation7 + $0x14] ss:$28 sps:$4 sm:$0xff]  }
 0x223   :  { %v4953_v41 = vpop.f32.mrf.mxu0  ;;  %5280 = vmatmul.mubr.bf16.vlgmr.msra.gmra.mxu0 %v9971_v55 }
 0x224   :  { %v4994_v46 = vpop.f32.mrf.mxu1  ;;  %v4954_v47 = vadd.f32 %v4953_v41, %v10004_v34  ;;  %5330 = vmatpush1.bf16.msra.mxu0 %v8862_v37  ;;  %5361 = vmatprep.mubr.bf16.mxu0 %v9906_v60  ;;  %v8871_v34 = vld [vmem:[#allocation7 + $0x1000] ss:$28 sps:$4 sm:$0xff]   ;;  %v8910_v41 = vld [vmem:[#allocation7 + $0x518] ss:$28 sps:$4 sm:$0xff]  }
 0x225   :  { %5231 = vmatpush2.bf16.msra.mxu1 %v8859_v35  ;;  %v4955_v52 = vpop.f32.mrf.mxu0  ;;  %5331 = vmatprep.subr.bf16.mxu0 %v8870_v39  ;;  %v8904_v35 = vld [vmem:[#allocation7 + $0x10] ss:$28 sps:$4 sm:$0xff]   ;;  %v8909_v37 = vld [vmem:[#allocation7 + $0x35c] ss:$28 sps:$4 sm:$0xff]  }
 0x226   :  { %v4996_v53 = vpop.f32.mrf.mxu1  ;;  %5232 = vmatprep.subr.bf16.mxu1 %v8867_v38  ;;  %v4995_v57 = vadd.f32 %v4994_v46, %v4954_v47  ;;  %v4956_v58 = vadd.f32 %v4955_v52, %v10008_v20  ;;  %v8885_v20 = vld [vmem:[#allocation7 + $0x15b4] ss:$28 sps:$4 sm:$0xff]   ;;  %v8912_v38 = vld [vmem:[#allocation7 + $0x51c] ss:$28 sps:$4 sm:$0xff]   ;;  %v8915_v46 = vld [vmem:[#allocation7 + $0x324] ss:$28 sps:$4 sm:$0xff]  }
 0x227   :  { %v4957_v59 = vpop.f32.mrf.mxu0  ;;  %v8907_v39 = vld [vmem:[#allocation7 + $0x358] ss:$28 sps:$4 sm:$0xff]   ;;  %v8918_v47 = vld [vmem:[#allocation7 + $0x4e4] ss:$28 sps:$4 sm:$0xff]   ;;  %v8921_v52 = vld [vmem:[#allocation7 + $0x2ec] ss:$28 sps:$4 sm:$0xff]  }
 0x228   :  { %v4998_v36 = vpop.f32.mrf.mxu1  ;;  %v4997_v61 = vadd.f32 %v4996_v53, %v4956_v58  ;;  %5332 = vmatpush1.bf16.msra.mxu0 %v8868_v50  ;;  %v8916_v50 = vld [vmem:[#allocation7 + $0x4e0] ss:$28 sps:$4 sm:$0xff]   ;;  %v8924_v53 = vld [vmem:[#allocation7 + $0x4ac] ss:$28 sps:$4 sm:$0xff]   ;;  %v8930_v58 = vld [vmem:[#allocation7 + $0x474] ss:$28 sps:$4 sm:$0xff]  }
 0x229   :  { %5233 = vmatpush2.bf16.msra.mxu1 %v8865_v48  ;;  %5333 = vmatprep.subr.bf16.mxu0 %v8876_v56  ;;  %v4958_v3 = vpop.f32.mrf.mxu0  ;;  %v8913_v48 = vld [vmem:[#allocation7 + $0x320] ss:$28 sps:$4 sm:$0xff]   ;;  %v8922_v56 = vld [vmem:[#allocation7 + $0x4a8] ss:$28 sps:$4 sm:$0xff]   ;;  %v8925_v36 = vld [vmem:[#allocation7 + $0x2b0] ss:$28 sps:$4 sm:$0xff]  }
 0x22a   :  { %v4999_v63 = vpop.f32.mrf.mxu1  ;;  %5234 = vmatprep.subr.bf16.mxu1 %v8873_v54  ;;  %v8919_v54 = vld [vmem:[#allocation7 + $0x2e8] ss:$28 sps:$4 sm:$0xff]   ;;  %v8928_v59 = vld [vmem:[#allocation7 + $0x470] ss:$28 sps:$4 sm:$0xff]   ;;  %v8937_v3 = vld [vmem:[#allocation7 + $0x240] ss:$28 sps:$4 sm:$0xff]  }
 0x22b   :  { %v8934_v63 = vld [vmem:[#allocation7 + $0x438] ss:$28 sps:$4 sm:$0xff]  }
 0x22c   :  { %5334 = vmatpush1.bf16.msra.mxu0 %v8874_v62  ;;  %v8931_v62 = vld [vmem:[#allocation7 + $0x278] ss:$28 sps:$4 sm:$0xff]  }
 0x22d   :  { %5235 = vmatpush2.bf16.msra.mxu1 %v8871_v34  ;;  %5335 = vmatprep.subr.bf16.mxu0 %v8882_v2  ;;  %v8936_v34 = vld [vmem:[#allocation7 + $0x43c] ss:$28 sps:$4 sm:$0xff]   ;;  %v8942_v2 = vld [vmem:[#allocation7 + $0x404] ss:$28 sps:$4 sm:$0xff]  }
 0x22e   :  { %5236 = vmatprep.subr.bf16.mxu1 %v8879_v1  ;;  %v8939_v1 = vld [vmem:[#allocation7 + $0x244] ss:$28 sps:$4 sm:$0xff]  }
 0x230   :  { %5336 = vmatpush1.bf16.msra.mxu0 %v8880_v5  ;;  %v8945_v5 = vld [vmem:[#allocation7 + $0x20c] ss:$28 sps:$4 sm:$0xff]  }
 0x231   :  { %5237 = vmatpush2.bf16.msra.mxu1 %v8877_v4  ;;  %5337 = vmatprep.subr.bf16.mxu0 %v8888_v7  ;;  %v8940_v4 = vld [vmem:[#allocation7 + $0x400] ss:$28 sps:$4 sm:$0xff]   ;;  %v8943_v7 = vld [vmem:[#allocation7 + $0x208] ss:$28 sps:$4 sm:$0xff]  }
 0x232   :  { %5296 = vmatprep.subr.bf16.mxu1 %v8885_v20  ;;  %v8948_v20 = vld [vmem:[#allocation7 + $0x3cc] ss:$28 sps:$4 sm:$0xff]  }
 0x234   :  { %v5035_v6 = vpop.f32.mrf.mxu1  ;;  %5239 = vmatmul.mubr.bf16.vlgmr.msra.gmra.mxu1 %v9967_v51  ;;  %5338 = vmatpush1.bf16.msra.mxu0 %v8886_v9  ;;  %v8951_v9 = vld [vmem:[#allocation7 + $0x1d4] ss:$28 sps:$4 sm:$0xff]  }
 0x235   :  { %v10017_v21 = vadd.f32 %v5035_v6, %v4995_v57  ;;  %5297 = vmatpush1.bf16.msra.mxu1 %v8883_v8  ;;  %5339 = vmatprep.subr.bf16.mxu0 %v8894_v15  ;;  %v8927_v57 = vld [vmem:[#allocation7 + $0x2b4] ss:$28 sps:$4 sm:$0xff]   ;;  %v8946_v8 = vld [vmem:[#allocation7 + $0x3c8] ss:$28 sps:$4 sm:$0xff]   ;;  %v8960_v6 = vld [vmem:[#allocation7 + $0x89c] ss:$28 sps:$4 sm:$0xff]  }
 0x236   :  { %v5037_v49 = vpop.f32.mrf.mxu1  ;;  %5298 = vmatprep.subr.bf16.mxu1 %v8891_v11  ;;  %5320 = vmatprep.mubr.bf16.mxu1 %v9769_v40  ;;  %v8954_v11 = vld [vmem:[#allocation7 + $0x394] ss:$28 sps:$4 sm:$0xff]  }
 0x237   :  { %v10019_v25 = vadd.f32 %v5037_v49, %v4997_v61  ;;  %v8933_v61 = vld [vmem:[#allocation7 + $0x27c] ss:$28 sps:$4 sm:$0xff]   ;;  %v8949_v15 = vld [vmem:[#allocation7 + $0x1d0] ss:$28 sps:$4 sm:$0xff]  }
 0x238   :  { %v5039_v28 = vpop.f32.mrf.mxu1  ;;  %5340 = vmatpush1.bf16.msra.mxu0 %v8892_v19  ;;  %v8957_v19 = vld [vmem:[#allocation7 + $0x6dc] ss:$28 sps:$4 sm:$0xff]  }
 0x239   :  { %5299 = vmatpush1.bf16.msra.mxu1 %v8889_v16  ;;  %5341 = vmatprep.subr.bf16.mxu0 %v8900_v24  ;;  %v8952_v16 = vld [vmem:[#allocation7 + $0x390] ss:$28 sps:$4 sm:$0xff]   ;;  %v8955_v49 = vld [vmem:[#allocation7 + $0x6d8] ss:$28 sps:$4 sm:$0xff]   ;;  %v8963_v24 = vld [vmem:[#allocation7 + $0x6a4] ss:$28 sps:$4 sm:$0xff]  }
 0x23a   :  { %v5040_v29 = vpop.f32.mrf.mxu1  ;;  %5300 = vmatprep.subr.bf16.mxu1 %v8897_v22  ;;  %v8958_v22 = vld [vmem:[#allocation7 + $0x898] ss:$28 sps:$4 sm:$0xff]   ;;  %v8961_v28 = vld [vmem:[#allocation7 + $0x6a0] ss:$28 sps:$4 sm:$0xff]  }
 0x23b   :  { %v8964_v29 = vld [vmem:[#allocation7 + $0x860] ss:$28 sps:$4 sm:$0xff]  }
 0x23c   :  { %5342 = vmatpush1.bf16.msra.mxu0 %v8898_v43 }
 0x23d   :  { %5301 = vmatpush1.bf16.msra.mxu1 %v8895_v26  ;;  %5343 = vmatprep.subr.bf16.mxu0 %v8906_v32  ;;  %v8966_v26 = vld [vmem:[#allocation7 + $0x864] ss:$28 sps:$4 sm:$0xff]   ;;  %v8972_v32 = vld [vmem:[#allocation7 + $0x82c] ss:$28 sps:$4 sm:$0xff]  }
 0x23e   :  { %5302 = vmatprep.subr.bf16.mxu1 %v8903_v30  ;;  %v8969_v30 = vld [vmem:[#allocation7 + $0x66c] ss:$28 sps:$4 sm:$0xff]  }
 0x240   :  { %5344 = vmatpush1.bf16.msra.mxu0 %v8904_v35 }
 0x241   :  { %5303 = vmatpush1.bf16.msra.mxu1 %v8901_v33  ;;  %5345 = vmatprep.subr.bf16.mxu0 %v8909_v37  ;;  %v8967_v37 = vld [vmem:[#allocation7 + $0x668] ss:$28 sps:$4 sm:$0xff]  }
 0x242   :  { %5370 = vmatprep.subr.bf16.mxu1 %v8912_v38  ;;  %v8970_v38 = vld [vmem:[#allocation7 + $0x828] ss:$28 sps:$4 sm:$0xff]  }
 0x244   :  { %7915 = vmatmul.mubr.msk.bf16.vlgmr.msra.gmra.mxu1 %vm4751_vm0, %v9981_v12  ;;  %5346 = vmatpush2.bf16.msra.mxu0 %v8907_v39  ;;  %v8975_v39 = vld [vmem:[#allocation7 + $0x634] ss:$28 sps:$4 sm:$0xff]  }
 0x245   :  { %5371 = vmatpush1.bf16.msra.mxu1 %v8910_v41  ;;  %5347 = vmatprep.subr.bf16.mxu0 %v8915_v46  ;;  %v8978_v41 = vld [vmem:[#allocation7 + $0x7f4] ss:$28 sps:$4 sm:$0xff]  }
 0x246   :  { %5372 = vmatprep.subr.bf16.mxu1 %v8918_v47  ;;  %5402 = vmatprep.mubr.bf16.mxu1 %v9910_v0  ;;  %v8973_v47 = vld [vmem:[#allocation7 + $0x630] ss:$28 sps:$4 sm:$0xff]  }
 0x248   :  { %5348 = vmatpush2.bf16.msra.mxu0 %v8913_v48  ;;  %v8976_v48 = vld [vmem:[#allocation7 + $0x7f0] ss:$28 sps:$4 sm:$0xff]  }
 0x249   :  { %5373 = vmatpush1.bf16.msra.mxu1 %v8916_v50  ;;  %5349 = vmatprep.subr.bf16.mxu0 %v8921_v52  ;;  %v1024_v50 = vsub.s32 2, %v9899_v42  ;;  %v8981_v52 = vld [vmem:[#allocation7 + $0x5fc] ss:$28 sps:$4 sm:$0xff]  }
 0x24a   :  { %5374 = vmatprep.subr.bf16.mxu1 %v8924_v53  ;;  %v8984_v53 = vld [vmem:[#allocation7 + $0x7bc] ss:$28 sps:$4 sm:$0xff]  }
 0x24c   :  { %5350 = vmatpush2.bf16.msra.mxu0 %v8919_v54  ;;  %v8979_v54 = vld [vmem:[#allocation7 + $0x5f8] ss:$28 sps:$4 sm:$0xff]  }
 0x24d   :  { %5375 = vmatpush1.bf16.msra.mxu1 %v8922_v56  ;;  %5351 = vmatprep.subr.bf16.mxu0 %v8927_v57  ;;  %v8982_v56 = vld [vmem:[#allocation7 + $0x7b8] ss:$28 sps:$4 sm:$0xff]   ;;  %v1028_v57 = vsub.s32 3, %v9899_v42 }
 0x24e   :  { %5376 = vmatprep.subr.bf16.mxu1 %v8930_v58  ;;  %v9451_v58 = vld [vmem:[#allocation8] sm:$0xff] }
 0x250   :  { %5352 = vmatpush2.bf16.msra.mxu0 %v8925_v36  ;;  %v1025_v36 = vrot.slane %v9451_v58, %v1024_v50  ;;  %v9029_v50 = vld [vmem:[#allocation7 + $0x97c] ss:$28 sps:$4 sm:$0xff]  }
 0x251   :  { %5377 = vmatpush1.bf16.msra.mxu1 %v8928_v59  ;;  %5353 = vmatprep.subr.bf16.mxu0 %v8933_v61  ;;  %v8987_v59 = vld [vmem:[#allocation7 + $0x5c4] ss:$28 sps:$4 sm:$0xff]  }
 0x252   :  { %5378 = vmatprep.subr.bf16.mxu1 %v8936_v34  ;;  %v8990_v61 = vld [vmem:[#allocation7 + $0x784] ss:$28 sps:$4 sm:$0xff]   ;;  %v1029_v34 = vrot.slane %v9451_v58, %v1028_v57 }
 0x253   :  { %v9038_v57 = vld [vmem:[#allocation7 + $0xb04] ss:$28 sps:$4 sm:$0xff]  }
 0x254   :  { %5354 = vmatpush2.bf16.msra.mxu0 %v8931_v62  ;;  %v8985_v62 = vld [vmem:[#allocation7 + $0x5c0] ss:$28 sps:$4 sm:$0xff]  }
 0x255   :  { %5379 = vmatpush1.bf16.msra.mxu1 %v8934_v63  ;;  %5355 = vmatprep.subr.bf16.mxu0 %v8939_v1  ;;  %v8988_v63 = vld [vmem:[#allocation7 + $0x780] ss:$28 sps:$4 sm:$0xff]  }
 0x256   :  { %5380 = vmatprep.subr.bf16.mxu1 %v8942_v2  ;;  %v9033_v58 = vld [vmem:[#allocation7 + $0x940] ss:$28 sps:$4 sm:$0xff]  }
 0x258   :  { %5356 = vmatpush2.bf16.msra.mxu0 %v8937_v3 }
 0x259   :  { %5381 = vmatpush1.bf16.msra.mxu1 %v8940_v4  ;;  %5357 = vmatprep.subr.bf16.mxu0 %v8945_v5  ;;  %v8993_v4 = vld [vmem:[#allocation7 + $0x58c] ss:$28 sps:$4 sm:$0xff]  }
 0x25a   :  { %5382 = vmatprep.subr.bf16.mxu1 %v8948_v20  ;;  %v8996_v5 = vld [vmem:[#allocation7 + $0x74c] ss:$28 sps:$4 sm:$0xff]  }
 0x25c   :  { %5358 = vmatpush2.bf16.msra.mxu0 %v8943_v7 }
 0x25d   :  { %5383 = vmatpush1.bf16.msra.mxu1 %v8946_v8  ;;  %5359 = vmatprep.subr.bf16.mxu0 %v8951_v9  ;;  %v8991_v8 = vld [vmem:[#allocation7 + $0x588] ss:$28 sps:$4 sm:$0xff]  }
 0x25e   :  { %5384 = vmatprep.subr.bf16.mxu1 %v8954_v11  ;;  %v8994_v9 = vld [vmem:[#allocation7 + $0x748] ss:$28 sps:$4 sm:$0xff]  }
 0x260   :  { %5360 = vmatpush2.bf16.msra.mxu0 %v8949_v15 }
 0x261   :  { %5385 = vmatpush1.bf16.msra.mxu1 %v8952_v16  ;;  %5411 = vmatprep.subr.bf16.mxu0 %v8960_v6  ;;  %v9002_v6 = vld [vmem:[#allocation7 + $0x714] ss:$28 sps:$4 sm:$0xff]  }
 0x262   :  { %5386 = vmatprep.subr.bf16.mxu1 %v8957_v19  ;;  %v8999_v19 = vld [vmem:[#allocation7 + $0x554] ss:$28 sps:$4 sm:$0xff]  }
 0x263   :  { %5362 = vmatmul.mubr.bf16.vlgmr.msra.gmra.mxu0 %v9920_v13  ;;  %v5117_v43 = vpop.f32.mrf.mxu0 }
 0x264   :  { %5412 = vmatpush1.bf16.msra.mxu0 %v8958_v22  ;;  %5443 = vmatprep.mubr.bf16.mxu0 %v9923_v17  ;;  %v9000_v22 = vld [vmem:[#allocation7 + $0x710] ss:$28 sps:$4 sm:$0xff]  }
 0x265   :  { %5387 = vmatpush2.bf16.msra.mxu1 %v8955_v49  ;;  %5413 = vmatprep.subr.bf16.mxu0 %v8966_v26  ;;  %v5119_v33 = vpop.f32.mrf.mxu0  ;;  %v8997_v49 = vld [vmem:[#allocation7 + $0x550] ss:$28 sps:$4 sm:$0xff]   ;;  %v9008_v26 = vld [vmem:[#allocation7 + $0xc1c] ss:$28 sps:$4 sm:$0xff]  }
 0x266   :  { %5388 = vmatprep.subr.bf16.mxu1 %v8963_v24  ;;  %v9005_v24 = vld [vmem:[#allocation7 + $0xa5c] ss:$28 sps:$4 sm:$0xff]  }
 0x267   :  { %v5121_v35 = vpop.f32.mrf.mxu0 }
 0x268   :  { %5414 = vmatpush1.bf16.msra.mxu0 %v8964_v29  ;;  %v9011_v29 = vld [vmem:[#allocation7 + $0xa24] ss:$28 sps:$4 sm:$0xff]   ;;  %v9017_v35 = vld [vmem:[#allocation7 + $0x9ec] ss:$28 sps:$4 sm:$0xff]  }
 0x269   :  { %5389 = vmatpush2.bf16.msra.mxu1 %v8961_v28  ;;  %5415 = vmatprep.subr.bf16.mxu0 %v8972_v32  ;;  %v5122_v46 = vpop.f32.mrf.mxu0  ;;  %v9006_v28 = vld [vmem:[#allocation7 + $0xc18] ss:$28 sps:$4 sm:$0xff]   ;;  %v9009_v32 = vld [vmem:[#allocation7 + $0xa20] ss:$28 sps:$4 sm:$0xff]  }
 0x26a   :  { %5390 = vmatprep.subr.bf16.mxu1 %v8969_v30  ;;  %v9014_v30 = vld [vmem:[#allocation7 + $0xbe4] ss:$28 sps:$4 sm:$0xff]   ;;  %v9026_v46 = vld [vmem:[#allocation7 + $0xb74] ss:$28 sps:$4 sm:$0xff]  }
 0x26c   :  { %5416 = vmatpush1.bf16.msra.mxu0 %v8970_v38  ;;  %v9015_v38 = vld [vmem:[#allocation7 + $0x9e8] ss:$28 sps:$4 sm:$0xff]  }
 0x26d   :  { %5391 = vmatpush2.bf16.msra.mxu1 %v8967_v37  ;;  %5417 = vmatprep.subr.bf16.mxu0 %v8978_v41  ;;  %v9020_v37 = vld [vmem:[#allocation7 + $0xbac] ss:$28 sps:$4 sm:$0xff]   ;;  %v9023_v41 = vld [vmem:[#allocation7 + $0x9b4] ss:$28 sps:$4 sm:$0xff]  }
 0x26e   :  { %5392 = vmatprep.subr.bf16.mxu1 %v8975_v39  ;;  %v9018_v39 = vld [vmem:[#allocation7 + $0xba8] ss:$28 sps:$4 sm:$0xff]  }
 0x270   :  { %5418 = vmatpush1.bf16.msra.mxu0 %v8976_v48  ;;  %v9024_v48 = vld [vmem:[#allocation7 + $0xb70] ss:$28 sps:$4 sm:$0xff]  }
 0x271   :  { %5393 = vmatpush2.bf16.msra.mxu1 %v8973_v47  ;;  %5419 = vmatprep.subr.bf16.mxu0 %v8984_v53  ;;  %v9021_v47 = vld [vmem:[#allocation7 + $0x9b0] ss:$28 sps:$4 sm:$0xff]   ;;  %v9027_v53 = vld [vmem:[#allocation7 + $0x978] ss:$28 sps:$4 sm:$0xff]  }
 0x272   :  { %5394 = vmatprep.subr.bf16.mxu1 %v8981_v52  ;;  %v9032_v52 = vld [vmem:[#allocation7 + $0xb3c] ss:$28 sps:$4 sm:$0xff]  }
 0x274   :  { %v5076_v1 = vpop.f32.mrf.mxu1  ;;  %5420 = vmatpush1.bf16.msra.mxu0 %v8982_v56  ;;  %v9035_v56 = vld [vmem:[#allocation7 + $0x944] ss:$28 sps:$4 sm:$0xff]  }
 0x275   :  { %v5077_v2 = vadd.f32 %v5076_v1, %v1025_v36  ;;  %5395 = vmatpush2.bf16.msra.mxu1 %v8979_v54  ;;  %5421 = vmatprep.subr.bf16.mxu0 %v8990_v61  ;;  %v9030_v54 = vld [vmem:[#allocation7 + $0xb38] ss:$28 sps:$4 sm:$0xff]   ;;  %v9036_v36 = vld [vmem:[#allocation7 + $0xb00] ss:$28 sps:$4 sm:$0xff]   ;;  %v9044_v61 = vld [vmem:[#allocation7 + $0xacc] ss:$28 sps:$4 sm:$0xff]  }
 0x276   :  { %v5078_v3 = vpop.f32.mrf.mxu1  ;;  %5396 = vmatprep.subr.bf16.mxu1 %v8987_v59  ;;  %v9041_v59 = vld [vmem:[#allocation7 + $0x90c] ss:$28 sps:$4 sm:$0xff]   ;;  %v9050_v1 = vld [vmem:[#allocation7 + $0xa94] ss:$28 sps:$4 sm:$0xff]  }
 0x277   :  { %v5079_v20 = vadd.f32 %v5078_v3, %v1029_v34  ;;  %v10029_v7 = vadd.f32 %v5117_v43, %v5077_v2  ;;  %v9003_v43 = vld [vmem:[#allocation7 + $0xa58] ss:$28 sps:$4 sm:$0xff]   ;;  %v9039_v34 = vld [vmem:[#allocation7 + $0x908] ss:$28 sps:$4 sm:$0xff]   ;;  %v9045_v2 = vld [vmem:[#allocation7 + $0x8d0] ss:$28 sps:$4 sm:$0xff]  }
 0x278   :  { %v5080_v11 = vpop.f32.mrf.mxu1  ;;  %5422 = vmatpush1.bf16.msra.mxu0 %v8988_v63  ;;  %v9047_v63 = vld [vmem:[#allocation7 + $0x8d4] ss:$28 sps:$4 sm:$0xff]  }
 0x279   :  { %v10031_v15 = vadd.f32 %v5119_v33, %v5079_v20  ;;  %5397 = vmatpush2.bf16.msra.mxu1 %v8985_v62  ;;  %5423 = vmatprep.subr.bf16.mxu0 %v8996_v5  ;;  %v9012_v33 = vld [vmem:[#allocation7 + $0xbe0] ss:$28 sps:$4 sm:$0xff]   ;;  %v9042_v62 = vld [vmem:[#allocation7 + $0xac8] ss:$28 sps:$4 sm:$0xff]   ;;  %v9048_v3 = vld [vmem:[#allocation7 + $0xa90] ss:$28 sps:$4 sm:$0xff]  }
 0x27a   :  { %v5081_v16 = vpop.f32.mrf.mxu1  ;;  %5398 = vmatprep.subr.bf16.mxu1 %v8993_v4  ;;  %v9053_v4 = vld [vmem:[#allocation7 + $0xddc] ss:$28 sps:$4 sm:$0xff]   ;;  %v9062_v11 = vld [vmem:[#allocation7 + $0xf64] ss:$28 sps:$4 sm:$0xff]  }
 0x27b   :  { %v9056_v5 = vld [vmem:[#allocation7 + $0xf9c] ss:$28 sps:$4 sm:$0xff]  }
 0x27c   :  { %5424 = vmatpush1.bf16.msra.mxu0 %v8994_v9  ;;  %v9051_v20 = vld [vmem:[#allocation7 + $0xdd8] ss:$28 sps:$4 sm:$0xff]   ;;  %v9059_v9 = vld [vmem:[#allocation7 + $0xda4] ss:$28 sps:$4 sm:$0xff]  }
 0x27d   :  { %5399 = vmatpush2.bf16.msra.mxu1 %v8991_v8  ;;  %5425 = vmatprep.subr.bf16.mxu0 %v9002_v6  ;;  %v9054_v8 = vld [vmem:[#allocation7 + $0xf98] ss:$28 sps:$4 sm:$0xff]   ;;  %v9057_v16 = vld [vmem:[#allocation7 + $0xda0] ss:$28 sps:$4 sm:$0xff]  }
 0x27e   :  { %5400 = vmatprep.subr.bf16.mxu1 %v8999_v19  ;;  %v9060_v6 = vld [vmem:[#allocation7 + $0xf60] ss:$28 sps:$4 sm:$0xff]  }
 0x280   :  { %5426 = vmatpush1.bf16.msra.mxu0 %v9000_v22  ;;  %v9068_v22 = vld [vmem:[#allocation7 + $0xf2c] ss:$28 sps:$4 sm:$0xff]  }
 0x281   :  { %5401 = vmatpush2.bf16.msra.mxu1 %v8997_v49  ;;  %5427 = vmatprep.subr.bf16.mxu0 %v9005_v24  ;;  %v9065_v49 = vld [vmem:[#allocation7 + $0xd6c] ss:$28 sps:$4 sm:$0xff]  }
 0x282   :  { %5452 = vmatprep.subr.bf16.mxu1 %v9008_v26  ;;  %v9063_v26 = vld [vmem:[#allocation7 + $0xd68] ss:$28 sps:$4 sm:$0xff]  }
 0x284   :  { %5403 = vmatmul.mubr.bf16.vlgmr.msra.gmra.mxu1 %v9927_v18  ;;  %5428 = vmatpush2.bf16.msra.mxu0 %v9003_v43 }
 0x285   :  { %5453 = vmatpush1.bf16.msra.mxu1 %v9006_v28  ;;  %5429 = vmatprep.subr.bf16.mxu0 %v9011_v29  ;;  %v9066_v28 = vld [vmem:[#allocation7 + $0xf28] ss:$28 sps:$4 sm:$0xff]   ;;  %v9071_v29 = vld [vmem:[#allocation7 + $0xd34] ss:$28 sps:$4 sm:$0xff]  }
 0x286   :  { %5454 = vmatprep.subr.bf16.mxu1 %v9014_v30  ;;  %5484 = vmatprep.mubr.bf16.mxu1 %v9931_v23  ;;  %v9074_v30 = vld [vmem:[#allocation7 + $0xef4] ss:$28 sps:$4 sm:$0xff]  }
 0x288   :  { %5430 = vmatpush2.bf16.msra.mxu0 %v9009_v32 }
 0x289   :  { %5455 = vmatpush1.bf16.msra.mxu1 %v9012_v33  ;;  %5431 = vmatprep.subr.bf16.mxu0 %v9017_v35  ;;  %v9069_v33 = vld [vmem:[#allocation7 + $0xd30] ss:$28 sps:$4 sm:$0xff]  }
 0x28a   :  { %5456 = vmatprep.subr.bf16.mxu1 %v9020_v37  ;;  %v9072_v35 = vld [vmem:[#allocation7 + $0xef0] ss:$28 sps:$4 sm:$0xff]   ;;  %v9077_v37 = vld [vmem:[#allocation7 + $0xcfc] ss:$28 sps:$4 sm:$0xff]  }
 0x28c   :  { %5432 = vmatpush2.bf16.msra.mxu0 %v9015_v38  ;;  %v9080_v38 = vld [vmem:[#allocation7 + $0xebc] ss:$28 sps:$4 sm:$0xff]  }
 0x28d   :  { %5457 = vmatpush1.bf16.msra.mxu1 %v9018_v39  ;;  %5433 = vmatprep.subr.bf16.mxu0 %v9023_v41  ;;  %v9075_v39 = vld [vmem:[#allocation7 + $0xcf8] ss:$28 sps:$4 sm:$0xff]  }
 0x28e   :  { %5458 = vmatprep.subr.bf16.mxu1 %v9026_v46  ;;  %v9078_v41 = vld [vmem:[#allocation7 + $0xeb8] ss:$28 sps:$4 sm:$0xff]   ;;  %v9083_v46 = vld [vmem:[#allocation7 + $0xcc4] ss:$28 sps:$4 sm:$0xff]  }
 0x290   :  { %5434 = vmatpush2.bf16.msra.mxu0 %v9021_v47  ;;  %v9086_v47 = vld [vmem:[#allocation7 + $0xe84] ss:$28 sps:$4 sm:$0xff]  }
 0x291   :  { %5459 = vmatpush1.bf16.msra.mxu1 %v9024_v48  ;;  %5435 = vmatprep.subr.bf16.mxu0 %v9029_v50 }
 0x292   :  { %5460 = vmatprep.subr.bf16.mxu1 %v9032_v52  ;;  %v9081_v52 = vld [vmem:[#allocation7 + $0xcc0] ss:$28 sps:$4 sm:$0xff]  }
 0x294   :  { %5436 = vmatpush2.bf16.msra.mxu0 %v9027_v53  ;;  %v9084_v53 = vld [vmem:[#allocation7 + $0xe80] ss:$28 sps:$4 sm:$0xff]  }
 0x295   :  { %5461 = vmatpush1.bf16.msra.mxu1 %v9030_v54  ;;  %5437 = vmatprep.subr.bf16.mxu0 %v9035_v56  ;;  %v9089_v56 = vld [vmem:[#allocation7 + $0xc8c] ss:$28 sps:$4 sm:$0xff]  }
 0x296   :  { %5462 = vmatprep.subr.bf16.mxu1 %v9038_v57  ;;  %v9092_v57 = vld [vmem:[#allocation7 + $0xe4c] ss:$28 sps:$4 sm:$0xff]  }
 0x298   :  { %5438 = vmatpush2.bf16.msra.mxu0 %v9033_v58 }
 0x299   :  { %5463 = vmatpush1.bf16.msra.mxu1 %v9036_v36  ;;  %5439 = vmatprep.subr.bf16.mxu0 %v9041_v59 }
 0x29a   :  { %5464 = vmatprep.subr.bf16.mxu1 %v9044_v61 }
 0x29c   :  { %5440 = vmatpush2.bf16.msra.mxu0 %v9039_v34  ;;  %v9087_v34 = vld [vmem:[#allocation7 + $0xc88] ss:$28 sps:$4 sm:$0xff]  }
 0x29d   :  { %5465 = vmatpush1.bf16.msra.mxu1 %v9042_v62  ;;  %5441 = vmatprep.subr.bf16.mxu0 %v9047_v63  ;;  %v9095_v63 = vld [vmem:[#allocation7 + $0xc54] ss:$28 sps:$4 sm:$0xff]  }
 0x29e   :  { %5466 = vmatprep.subr.bf16.mxu1 %v9050_v1  ;;  %v9098_v1 = vld [vmem:[#allocation7 + $0xe14] ss:$28 sps:$4 sm:$0xff]  }
 0x2a0   :  { %5442 = vmatpush2.bf16.msra.mxu0 %v9045_v2  ;;  %v9093_v2 = vld [vmem:[#allocation7 + $0xc50] ss:$28 sps:$4 sm:$0xff]  }
 0x2a1   :  { %5467 = vmatpush1.bf16.msra.mxu1 %v9048_v3  ;;  %5493 = vmatprep.subr.bf16.mxu0 %v9056_v5  ;;  %v9096_v3 = vld [vmem:[#allocation7 + $0xe10] ss:$28 sps:$4 sm:$0xff]   ;;  %v9099_v5 = vld [vmem:[#allocation7 + $0x1158] ss:$28 sps:$4 sm:$0xff]  }
 0x2a2   :  { %5468 = vmatprep.subr.bf16.mxu1 %v9053_v4  ;;  %v9104_v4 = vld [vmem:[#allocation7 + $0x131c] ss:$28 sps:$4 sm:$0xff]  }
 0x2a3   :  { %5444 = vmatmul.mubr.bf16.vlgmr.msra.gmra.mxu0 %v9940_v27  ;;  %v5199_v19 = vpop.f32.mrf.mxu0 }
 0x2a4   :  { %5494 = vmatpush1.bf16.msra.mxu0 %v9054_v8  ;;  %5525 = vmatprep.mubr.bf16.mxu0 %v9957_v44  ;;  %v9107_v8 = vld [vmem:[#allocation7 + $0x1124] ss:$28 sps:$4 sm:$0xff]  }
 0x2a5   :  { %5469 = vmatpush2.bf16.msra.mxu1 %v9051_v20  ;;  %5495 = vmatprep.subr.bf16.mxu0 %v9062_v11  ;;  %v5201_v24 = vpop.f32.mrf.mxu0  ;;  %v9102_v20 = vld [vmem:[#allocation7 + $0x1318] ss:$28 sps:$4 sm:$0xff]   ;;  %v9105_v11 = vld [vmem:[#allocation7 + $0x1120] ss:$28 sps:$4 sm:$0xff]  }
 0x2a6   :  { %5470 = vmatprep.subr.bf16.mxu1 %v9059_v9  ;;  %v9110_v9 = vld [vmem:[#allocation7 + $0x12e4] ss:$28 sps:$4 sm:$0xff]  }
 0x2a7   :  { %v5203_v43 = vpop.f32.mrf.mxu0 }
 0x2a8   :  { %5496 = vmatpush1.bf16.msra.mxu0 %v9060_v6  ;;  %v9116_v6 = vld [vmem:[#allocation7 + $0x12ac] ss:$28 sps:$4 sm:$0xff]  }
 0x2a9   :  { %5471 = vmatpush2.bf16.msra.mxu1 %v9057_v16  ;;  %5497 = vmatprep.subr.bf16.mxu0 %v9068_v22  ;;  %v5204_v32 = vpop.f32.mrf.mxu0  ;;  %v9108_v16 = vld [vmem:[#allocation7 + $0x12e0] ss:$28 sps:$4 sm:$0xff]   ;;  %v9114_v22 = vld [vmem:[#allocation7 + $0x12a8] ss:$28 sps:$4 sm:$0xff]   ;;  %v9117_v43 = vld [vmem:[#allocation7 + $0x10b0] ss:$28 sps:$4 sm:$0xff]  }
 0x2aa   :  { %5472 = vmatprep.subr.bf16.mxu1 %v9065_v49  ;;  %v9111_v49 = vld [vmem:[#allocation7 + $0x10e8] ss:$28 sps:$4 sm:$0xff]   ;;  %v9123_v32 = vld [vmem:[#allocation7 + $0x1078] ss:$28 sps:$4 sm:$0xff]  }
 0x2ac   :  { %5498 = vmatpush1.bf16.msra.mxu0 %v9066_v28  ;;  %v9120_v28 = vld [vmem:[#allocation7 + $0x1270] ss:$28 sps:$4 sm:$0xff]  }
 0x2ad   :  { %5473 = vmatpush2.bf16.msra.mxu1 %v9063_v26  ;;  %5499 = vmatprep.subr.bf16.mxu0 %v9074_v30  ;;  %v9122_v26 = vld [vmem:[#allocation7 + $0x1274] ss:$28 sps:$4 sm:$0xff]   ;;  %v9128_v30 = vld [vmem:[#allocation7 + $0x123c] ss:$28 sps:$4 sm:$0xff]  }
 0x2ae   :  { %5474 = vmatprep.subr.bf16.mxu1 %v9071_v29  ;;  %v9125_v29 = vld [vmem:[#allocation7 + $0x107c] ss:$28 sps:$4 sm:$0xff]  }
 0x2b0   :  { %5500 = vmatpush1.bf16.msra.mxu0 %v9072_v35  ;;  %v9131_v35 = vld [vmem:[#allocation7 + $0x1044] ss:$28 sps:$4 sm:$0xff]  }
 0x2b1   :  { %5475 = vmatpush2.bf16.msra.mxu1 %v9069_v33  ;;  %5501 = vmatprep.subr.bf16.mxu0 %v9080_v38  ;;  %v9126_v33 = vld [vmem:[#allocation7 + $0x1238] ss:$28 sps:$4 sm:$0xff]   ;;  %v9129_v38 = vld [vmem:[#allocation7 + $0x1040] ss:$28 sps:$4 sm:$0xff]  }
 0x2b2   :  { %5476 = vmatprep.subr.bf16.mxu1 %v9077_v37  ;;  %v9134_v37 = vld [vmem:[#allocation7 + $0x1204] ss:$28 sps:$4 sm:$0xff]  }
 0x2b4   :  { %v5158_v48 = vpop.f32.mrf.mxu1  ;;  %5502 = vmatpush1.bf16.msra.mxu0 %v9078_v41  ;;  %v9137_v41 = vld [vmem:[#allocation7 + $0x100c] ss:$28 sps:$4 sm:$0xff]  }
 0x2b5   :  { %v5159_v50 = vadd.f32 %v5158_v48, %v10029_v7  ;;  %5477 = vmatpush2.bf16.msra.mxu1 %v9075_v39  ;;  %5503 = vmatprep.subr.bf16.mxu0 %v9086_v47  ;;  %v9090_v7 = vld [vmem:[#allocation7 + $0xe48] ss:$28 sps:$4 sm:$0xff]   ;;  %v9132_v39 = vld [vmem:[#allocation7 + $0x1200] ss:$28 sps:$4 sm:$0xff]  }
 0x2b6   :  { %v5160_v54 = vpop.f32.mrf.mxu1  ;;  %5478 = vmatprep.subr.bf16.mxu1 %v9083_v46  ;;  %v9140_v46 = vld [vmem:[#allocation7 + $0x11cc] ss:$28 sps:$4 sm:$0xff]  }
 0x2b7   :  { %v5161_v58 = vadd.f32 %v5160_v54, %v10031_v15  ;;  %v10039_v36 = vadd.f32 %v5199_v19, %v5159_v50  ;;  %v9101_v15 = vld [vmem:[#allocation7 + $0x115c] ss:$28 sps:$4 sm:$0xff]   ;;  %v9113_v19 = vld [vmem:[#allocation7 + $0x10ec] ss:$28 sps:$4 sm:$0xff]   ;;  %v9143_v50 = vld [vmem:[#allocation7 + $0xfd4] ss:$28 sps:$4 sm:$0xff]  }
 0x2b8   :  { %v5162_v59 = vpop.f32.mrf.mxu1  ;;  %5504 = vmatpush1.bf16.msra.mxu0 %v9084_v53  ;;  %v9135_v47 = vld [vmem:[#allocation7 + $0x1008] ss:$28 sps:$4 sm:$0xff]   ;;  %v9141_v53 = vld [vmem:[#allocation7 + $0xfd0] ss:$28 sps:$4 sm:$0xff]  }
 0x2b9   :  { %v10041_v61 = vadd.f32 %v5201_v24, %v5161_v58  ;;  %5479 = vmatpush2.bf16.msra.mxu1 %v9081_v52  ;;  %5505 = vmatprep.subr.bf16.mxu0 %v9092_v57  ;;  %v9119_v24 = vld [vmem:[#allocation7 + $0x10b4] ss:$28 sps:$4 sm:$0xff]   ;;  %v9138_v48 = vld [vmem:[#allocation7 + $0x11c8] ss:$28 sps:$4 sm:$0xff]   ;;  %v9152_v57 = vld [vmem:[#allocation7 + $0x15bc] ss:$28 sps:$4 sm:$0xff]  }
 0x2ba   :  { %v5163_v62 = vpop.f32.mrf.mxu1  ;;  %5480 = vmatprep.subr.bf16.mxu1 %v9089_v56  ;;  %v9146_v52 = vld [vmem:[#allocation7 + $0x1194] ss:$28 sps:$4 sm:$0xff]   ;;  %v9149_v56 = vld [vmem:[#allocation7 + $0x14dc] ss:$28 sps:$4 sm:$0xff]  }
 0x2bb   :  { %v9144_v54 = vld [vmem:[#allocation7 + $0x1190] ss:$28 sps:$4 sm:$0xff]   ;;  %v9147_v58 = vld [vmem:[#allocation7 + $0x14d8] ss:$28 sps:$4 sm:$0xff]  }
 0x2bc   :  { %5506 = vmatpush1.bf16.msra.mxu0 %v9090_v7  ;;  %v9150_v59 = vld [vmem:[#allocation7 + $0x15b8] ss:$28 sps:$4 sm:$0xff]   ;;  %v9158_v7 = vld [vmem:[#allocation7 + $0x1584] ss:$28 sps:$4 sm:$0xff]  }
 0x2bd   :  { %5481 = vmatpush2.bf16.msra.mxu1 %v9087_v34  ;;  %5507 = vmatprep.subr.bf16.mxu0 %v9098_v1  ;;  %v9155_v34 = vld [vmem:[#allocation7 + $0x14a4] ss:$28 sps:$4 sm:$0xff]  }
 0x2be   :  { %5482 = vmatprep.subr.bf16.mxu1 %v9095_v63  ;;  %v9153_v63 = vld [vmem:[#allocation7 + $0x14a0] ss:$28 sps:$4 sm:$0xff]  }
 0x2bf   :  { %v9156_v1 = vld [vmem:[#allocation7 + $0x1580] ss:$28 sps:$4 sm:$0xff]  }
 0x2c0   :  { %5508 = vmatpush1.bf16.msra.mxu0 %v9096_v3  ;;  %v9164_v3 = vld [vmem:[#allocation7 + $0x154c] ss:$28 sps:$4 sm:$0xff]  }
 0x2c1   :  { %5483 = vmatpush2.bf16.msra.mxu1 %v9093_v2  ;;  %5509 = vmatprep.subr.bf16.mxu0 %v9101_v15  ;;  %v9161_v2 = vld [vmem:[#allocation7 + $0x146c] ss:$28 sps:$4 sm:$0xff]  }
 0x2c2   :  { %5534 = vmatprep.subr.bf16.mxu1 %v9104_v4 }
 0x2c4   :  { %5485 = vmatmul.mubr.bf16.vlgmr.msra.gmra.mxu1 %v9944_v31  ;;  %5510 = vmatpush2.bf16.msra.mxu0 %v9099_v5  ;;  %v9159_v5 = vld [vmem:[#allocation7 + $0x1468] ss:$28 sps:$4 sm:$0xff]  }
 0x2c5   :  { %5535 = vmatpush1.bf16.msra.mxu1 %v9102_v20  ;;  %5511 = vmatprep.subr.bf16.mxu0 %v9107_v8  ;;  %v9162_v20 = vld [vmem:[#allocation7 + $0x1548] ss:$28 sps:$4 sm:$0xff]   ;;  %v9167_v8 = vld [vmem:[#allocation7 + $0x1434] ss:$28 sps:$4 sm:$0xff]  }
 0x2c6   :  { %5536 = vmatprep.subr.bf16.mxu1 %v9110_v9  ;;  %5566 = vmatprep.mubr.bf16.mxu1 %v9962_v45  ;;  %v9170_v9 = vld [vmem:[#allocation7 + $0x1514] ss:$28 sps:$4 sm:$0xff]  }
 0x2c8   :  { %5512 = vmatpush2.bf16.msra.mxu0 %v9105_v11 }
 0x2c9   :  { %5537 = vmatpush1.bf16.msra.mxu1 %v9108_v16  ;;  %5513 = vmatprep.subr.bf16.mxu0 %v9113_v19  ;;  %v9165_v16 = vld [vmem:[#allocation7 + $0x1430] ss:$28 sps:$4 sm:$0xff]  }
 0x2ca   :  { %5538 = vmatprep.subr.bf16.mxu1 %v9116_v6  ;;  %v9168_v19 = vld [vmem:[#allocation7 + $0x1510] ss:$28 sps:$4 sm:$0xff]   ;;  %v9173_v6 = vld [vmem:[#allocation7 + $0x13fc] ss:$28 sps:$4 sm:$0xff]  }
 0x2cc   :  { %5514 = vmatpush2.bf16.msra.mxu0 %v9111_v49  ;;  %v9174_v49 = vld [vmem:[#allocation7 + $0x6e0] ss:$28 sps:$4 sm:$0xff]  }
 0x2cd   :  { %5539 = vmatpush1.bf16.msra.mxu1 %v9114_v22  ;;  %5515 = vmatprep.subr.bf16.mxu0 %v9119_v24  ;;  %v9171_v22 = vld [vmem:[#allocation7 + $0x13f8] ss:$28 sps:$4 sm:$0xff]   ;;  %v9175_v24 = vld [vmem:[#allocation7 + $0x520] ss:$28 sps:$4 sm:$0xff]  }
 0x2ce   :  { %5540 = vmatprep.subr.bf16.mxu1 %v9122_v26  ;;  %v9178_v26 = vld [vmem:[#allocation7 + $0x13c4] ss:$28 sps:$4 sm:$0xff]  }
 0x2d0   :  { %5516 = vmatpush2.bf16.msra.mxu0 %v9117_v43  ;;  %v9179_v43 = vld [vmem:[#allocation7 + $0x6a8] ss:$28 sps:$4 sm:$0xff]  }
 0x2d1   :  { %5541 = vmatpush1.bf16.msra.mxu1 %v9120_v28  ;;  %5517 = vmatprep.subr.bf16.mxu0 %v9125_v29 }
 0x2d2   :  { %5542 = vmatprep.subr.bf16.mxu1 %v9128_v30  ;;  %v9176_v30 = vld [vmem:[#allocation7 + $0x13c0] ss:$28 sps:$4 sm:$0xff]  }
 0x2d4   :  { %5518 = vmatpush2.bf16.msra.mxu0 %v9123_v32  ;;  %v9180_v32 = vld [vmem:[#allocation7 + $0x4e8] ss:$28 sps:$4 sm:$0xff]  }
 0x2d5   :  { %5543 = vmatpush1.bf16.msra.mxu1 %v9126_v33  ;;  %5519 = vmatprep.subr.bf16.mxu0 %v9131_v35  ;;  %v9183_v35 = vld [vmem:[#allocation7 + $0x138c] ss:$28 sps:$4 sm:$0xff]  }
 0x2d6   :  { %5544 = vmatprep.subr.bf16.mxu1 %v9134_v37  ;;  %v9184_v37 = vld [vmem:[#allocation7 + $0x670] ss:$28 sps:$4 sm:$0xff]  }
 0x2d8   :  { %5520 = vmatpush2.bf16.msra.mxu0 %v9129_v38 }
 0x2d9   :  { %5545 = vmatpush1.bf16.msra.mxu1 %v9132_v39  ;;  %5521 = vmatprep.subr.bf16.mxu0 %v9137_v41 }
 0x2da   :  { %5546 = vmatprep.subr.bf16.mxu1 %v9140_v46 }
 0x2dc   :  { %5522 = vmatpush2.bf16.msra.mxu0 %v9135_v47  ;;  %v9181_v47 = vld [vmem:[#allocation7 + $0x1388] ss:$28 sps:$4 sm:$0xff]  }
 0x2dd   :  { %5547 = vmatpush1.bf16.msra.mxu1 %v9138_v48  ;;  %5523 = vmatprep.subr.bf16.mxu0 %v9143_v50  ;;  %v9188_v50 = vld [vmem:[#allocation7 + $0x1354] ss:$28 sps:$4 sm:$0xff]  }
 0x2de   :  { %5548 = vmatprep.subr.bf16.mxu1 %v9146_v52  ;;  %v9189_v52 = vld [vmem:[#allocation7 + $0x638] ss:$28 sps:$4 sm:$0xff]  }
 0x2e0   :  { %5524 = vmatpush2.bf16.msra.mxu0 %v9141_v53  ;;  %v9186_v53 = vld [vmem:[#allocation7 + $0x1350] ss:$28 sps:$4 sm:$0xff]  }
 0x2e1   :  { %5549 = vmatpush1.bf16.msra.mxu1 %v9144_v54  ;;  %5583 = vmatprep.subr.bf16.mxu0 %v9152_v57  ;;  %v9190_v54 = vld [vmem:[#allocation7 + $0x478] ss:$28 sps:$4 sm:$0xff]   ;;  %v9194_v57 = vld [vmem:[#allocation7 + $0x440] ss:$28 sps:$4 sm:$0xff]  }
 0x2e2   :  { %5550 = vmatprep.subr.bf16.mxu1 %v9149_v56  ;;  %v9192_v56 = vld [vmem:[#allocation7 + $0x600] ss:$28 sps:$4 sm:$0xff]  }
 0x2e3   :  { %5526 = vmatmul.mubr.bf16.vlgmr.msra.gmra.mxu0 %v9967_v51  ;;  %v5281_v62 = vpop.f32.mrf.mxu0 }
 0x2e4   :  { %5584 = vmatpush1.bf16.msra.mxu0 %v9150_v59  ;;  %5607 = vmatprep.mubr.bf16.mxu0 %v9769_v40  ;;  %v9196_v59 = vld [vmem:[#allocation7 + $0x5c8] ss:$28 sps:$4 sm:$0xff]  }
 0x2e5   :  { %5551 = vmatpush2.bf16.msra.mxu1 %v9147_v58  ;;  %5585 = vmatprep.subr.bf16.mxu0 %v9158_v7  ;;  %v5283_v15 = vpop.f32.mrf.mxu0  ;;  %v9195_v58 = vld [vmem:[#allocation7 + $0x328] ss:$28 sps:$4 sm:$0xff]  }
 0x2e6   :  { %5552 = vmatprep.subr.bf16.mxu1 %v9155_v34 }
 0x2e7   :  { %v5285_v4 = vpop.f32.mrf.mxu0 }
 0x2e8   :  { %5586 = vmatpush1.bf16.msra.mxu0 %v9156_v1 }
 0x2e9   :  { %5553 = vmatpush2.bf16.msra.mxu1 %v9153_v63  ;;  %5587 = vmatprep.subr.bf16.mxu0 %v9164_v3  ;;  %v5286_v11 = vpop.f32.mrf.mxu0  ;;  %v9198_v63 = vld [vmem:[#allocation7 + $0x408] ss:$28 sps:$4 sm:$0xff]   ;;  %v9200_v3 = vld [vmem:[#allocation7 + $0x590] ss:$28 sps:$4 sm:$0xff]  }
 0x2ea   :  { %5554 = vmatprep.subr.bf16.mxu1 %v9161_v2  ;;  %v9199_v2 = vld [vmem:[#allocation7 + $0x2f0] ss:$28 sps:$4 sm:$0xff]   ;;  %v9204_v11 = vld [vmem:[#allocation7 + $0x558] ss:$28 sps:$4 sm:$0xff]  }
 0x2ec   :  { %5588 = vmatpush1.bf16.msra.mxu0 %v9162_v20  ;;  %v9202_v20 = vld [vmem:[#allocation7 + $0x3d0] ss:$28 sps:$4 sm:$0xff]  }
 0x2ed   :  { %5555 = vmatpush2.bf16.msra.mxu1 %v9159_v5  ;;  %5589 = vmatprep.subr.bf16.mxu0 %v9170_v9  ;;  %v9201_v5 = vld [vmem:[#allocation7 + $0x130] ss:$28 sps:$4 sm:$0xff]   ;;  %v9203_v9 = vld [vmem:[#allocation7 + $0x2b8] ss:$28 sps:$4 sm:$0xff]  }
 0x2ee   :  { %5556 = vmatprep.subr.bf16.mxu1 %v9167_v8 }
 0x2f0   :  { %5590 = vmatpush1.bf16.msra.mxu0 %v9168_v19  ;;  %v9206_v19 = vld [vmem:[#allocation7 + $0x398] ss:$28 sps:$4 sm:$0xff]  }
 0x2f1   :  { %5557 = vmatpush2.bf16.msra.mxu1 %v9165_v16  ;;  %8057 = vmatprep.subr.bf16.mxu0 %v9174_v49  ;;  %v9205_v16 = vld [vmem:[#allocation7 + $0xf8] ss:$28 sps:$4 sm:$0xff]   ;;  %v9208_v49 = vld [vmem:[#allocation7 + $0xde0] ss:$28 sps:$4 sm:$0xff]  }
 0x2f2   :  { %5558 = vmatprep.subr.bf16.mxu1 %v9173_v6  ;;  %v9207_v6 = vld [vmem:[#allocation7 + $0x280] ss:$28 sps:$4 sm:$0xff]  }
 0x2f3   :  { %7916 = vmatmul.mubr.msk.bf16.vlgmr.msra.gmra.mxu0 %vm4751_vm0, %v9981_v12 }
 0x2f4   :  { %v5240_v28 = vpop.f32.mrf.mxu1  ;;  %8058 = vmatpush3.bf16.msra.mxu0 %v9175_v24  ;;  %5688 = vmatprep.mubr.bf16.mxu0 %v9910_v0  ;;  %v9193_v0 = vld [vmem:[#allocation7 + $0x1a0] ss:$28 sps:$4 sm:$0xff]   ;;  %v9211_v24 = vld [vmem:[#allocation7 + $0x248] ss:$28 sps:$4 sm:$0xff]  }
 0x2f5   :  { %v5241_v29 = vadd.f32 %v5240_v28, %v10039_v36  ;;  %5559 = vmatpush2.bf16.msra.mxu1 %v9171_v22  ;;  %8059 = vmatprep.subr.bf16.mxu0 %v9179_v43  ;;  %v9185_v36 = vld [vmem:[#allocation7 + $0x4b0] ss:$28 sps:$4 sm:$0xff]   ;;  %v9210_v22 = vld [vmem:[#allocation7 + $0xc20] ss:$28 sps:$4 sm:$0xff]   ;;  %v9213_v43 = vld [vmem:[#allocation7 + $0x88] ss:$28 sps:$4 sm:$0xff]  }
 0x2f6   :  { %v5242_v33 = vpop.f32.mrf.mxu1  ;;  %5560 = vmatprep.subr.bf16.mxu1 %v9178_v26  ;;  %v9212_v26 = vld [vmem:[#allocation7 + $0xda8] ss:$28 sps:$4 sm:$0xff]  }
 0x2f7   :  { %v5243_v38 = vadd.f32 %v5242_v33, %v10041_v61  ;;  %v5282_v39 = vadd.f32 %v5281_v62, %v5241_v29  ;;  %v9191_v61 = vld [vmem:[#allocation7 + $0x360] ss:$28 sps:$4 sm:$0xff]   ;;  %v9197_v62 = vld [vmem:[#allocation7 + $0x168] ss:$28 sps:$4 sm:$0xff]   ;;  %v9215_v29 = vld [vmem:[#allocation7 + $0x210] ss:$28 sps:$4 sm:$0xff]  }
 0x2f8   :  { %v5244_v41 = vpop.f32.mrf.mxu1  ;;  %8060 = vmatpush3.bf16.msra.mxu0 %v9180_v32  ;;  %v9214_v28 = vld [vmem:[#allocation7 + $0xbe8] ss:$28 sps:$4 sm:$0xff]   ;;  %v9217_v32 = vld [vmem:[#allocation7 + $0x50] ss:$28 sps:$4 sm:$0xff]  }
 0x2f9   :  { %v5284_v46 = vadd.f32 %v5283_v15, %v5243_v38  ;;  %5561 = vmatpush2.bf16.msra.mxu1 %v9176_v30  ;;  %8061 = vmatprep.subr.bf16.mxu0 %v9184_v37  ;;  %v9216_v30 = vld [vmem:[#allocation7 + $0xd70] ss:$28 sps:$4 sm:$0xff]   ;;  %v9220_v37 = vld [vmem:[#allocation7 + $0xd38] ss:$28 sps:$4 sm:$0xff]   ;;  %v9224_v41 = vld [vmem:[#allocation7 + $0xd00] ss:$28 sps:$4 sm:$0xff]  }
 0x2fa   :  { %v5245_v48 = vpop.f32.mrf.mxu1  ;;  %5562 = vmatprep.subr.bf16.mxu1 %v9183_v35  ;;  %v9218_v33 = vld [vmem:[#allocation7 + $0xbb0] ss:$28 sps:$4 sm:$0xff]   ;;  %v9219_v35 = vld [vmem:[#allocation7 + $0x1d8] ss:$28 sps:$4 sm:$0xff]  }
 0x2fb   :  { %v9222_v38 = vld [vmem:[#allocation7 + $0xb78] ss:$28 sps:$4 sm:$0xff]  }
 0x2fc   :  { %8062 = vmatpush3.bf16.msra.mxu0 %v9185_v36  ;;  %v9228_v36 = vld [vmem:[#allocation7 + $0xcc8] ss:$28 sps:$4 sm:$0xff]  }
 0x2fd   :  { %5563 = vmatpush2.bf16.msra.mxu1 %v9181_v47  ;;  %8063 = vmatprep.subr.bf16.mxu0 %v9189_v52  ;;  %v9227_v47 = vld [vmem:[#allocation7 + $0xa28] ss:$28 sps:$4 sm:$0xff]  }
 0x2fe   :  { %5564 = vmatprep.subr.bf16.mxu1 %v9188_v50  ;;  %v9229_v50 = vld [vmem:[#allocation7 + $0x868] ss:$28 sps:$4 sm:$0xff]  }
 0x2ff   :  { %v9230_v52 = vld [vmem:[#allocation7 + $0xb08] ss:$28 sps:$4 sm:$0xff]  }
 0x300   :  { %8064 = vmatpush3.bf16.msra.mxu0 %v9190_v54  ;;  %v9232_v54 = vld [vmem:[#allocation7 + $0xc90] ss:$28 sps:$4 sm:$0xff]  }
 0x301   :  { %5565 = vmatpush2.bf16.msra.mxu1 %v9186_v53  ;;  %8065 = vmatprep.subr.bf16.mxu0 %v9192_v56  ;;  %v9231_v53 = vld [vmem:[#allocation7 + $0x9f0] ss:$28 sps:$4 sm:$0xff]  }
 0x302   :  { %8035 = vmatprep.subr.bf16.mxu1 %v9191_v61 }
 0x304   :  { %v5322_v34 = vpop.f32.mrf.mxu1  ;;  %5567 = vmatmul.mubr.bf16.vlgmr.msra.gmra.mxu1 %v9971_v55  ;;  %8066 = vmatpush3.bf16.msra.mxu0 %v9194_v57  ;;  %v9234_v57 = vld [vmem:[#allocation7 + $0xad0] ss:$28 sps:$4 sm:$0xff]  }
 0x305   :  { %v10053_v7 = vadd.f32 %v5322_v34, %v5282_v39  ;;  %8036 = vmatpush3.bf16.msra.mxu1 %v9193_v0  ;;  %8067 = vmatprep.subr.bf16.mxu0 %v9196_v59  ;;  %v9223_v39 = vld [vmem:[#allocation7 + $0xa60] ss:$28 sps:$4 sm:$0xff]   ;;  %v9233_v0 = vld [vmem:[#allocation7 + $0x830] ss:$28 sps:$4 sm:$0xff]   ;;  %v9237_v34 = vld [vmem:[#allocation7 + $0x7f8] ss:$28 sps:$4 sm:$0xff]  }
 0x306   :  { %v5324_v1 = vpop.f32.mrf.mxu1  ;;  %8037 = vmatprep.subr.bf16.mxu1 %v9195_v58  ;;  %5648 = vmatprep.mubr.bf16.mxu1 %v9906_v60  ;;  %v9209_v60 = vld [vmem:[#allocation7 + $0xc0] ss:$28 sps:$4 sm:$0xff]   ;;  %v9236_v58 = vld [vmem:[#allocation7 + $0xc58] ss:$28 sps:$4 sm:$0xff]  }
 0x307   :  { %v10055_v15 = vadd.f32 %v5324_v1, %v5284_v46  ;;  %v9225_v46 = vld [vmem:[#allocation7 + $0x8a0] ss:$28 sps:$4 sm:$0xff]  }
 0x308   :  { %v5326_v4 = vpop.f32.mrf.mxu1  ;;  %8068 = vmatpush3.bf16.msra.mxu0 %v9198_v63  ;;  %v9239_v63 = vld [vmem:[#allocation7 + $0x980] ss:$28 sps:$4 sm:$0xff]  }
 0x309   :  { %8038 = vmatpush3.bf16.msra.mxu1 %v9197_v62  ;;  %8069 = vmatprep.subr.bf16.mxu0 %v9200_v3  ;;  %v9238_v62 = vld [vmem:[#allocation7 + $0xa98] ss:$28 sps:$4 sm:$0xff]   ;;  %v9240_v1 = vld [vmem:[#allocation7 + $0x14e0] ss:$28 sps:$4 sm:$0xff]   ;;  %v9243_v3 = vld [vmem:[#allocation7 + $0x948] ss:$28 sps:$4 sm:$0xff]  }
 0x30a   :  { %v5327_v8 = vpop.f32.mrf.mxu1  ;;  %8039 = vmatprep.subr.bf16.mxu1 %v9199_v2  ;;  %v9242_v2 = vld [vmem:[#allocation7 + $0x1320] ss:$28 sps:$4 sm:$0xff]   ;;  %v9244_v4 = vld [vmem:[#allocation7 + $0x14a8] ss:$28 sps:$4 sm:$0xff]  }
 0x30b   :  { %v9247_v8 = vld [vmem:[#allocation7 + $0x910] ss:$28 sps:$4 sm:$0xff]  }
 0x30c   :  { %8070 = vmatpush3.bf16.msra.mxu0 %v9202_v20  ;;  %v9246_v20 = vld [vmem:[#allocation7 + $0x12e8] ss:$28 sps:$4 sm:$0xff]  }
 0x30d   :  { %8040 = vmatpush3.bf16.msra.mxu1 %v9201_v5  ;;  %8071 = vmatprep.subr.bf16.mxu0 %v9204_v11  ;;  %v9245_v5 = vld [vmem:[#allocation7 + $0x788] ss:$28 sps:$4 sm:$0xff]   ;;  %v9249_v11 = vld [vmem:[#allocation7 + $0x750] ss:$28 sps:$4 sm:$0xff]  }
 0x30e   :  { %8041 = vmatprep.subr.bf16.mxu1 %v9203_v9  ;;  %v9248_v9 = vld [vmem:[#allocation7 + $0x1470] ss:$28 sps:$4 sm:$0xff]  }
 0x310   :  { %8072 = vmatpush3.bf16.msra.mxu0 %v9206_v19  ;;  %v9251_v19 = vld [vmem:[#allocation7 + $0x8d8] ss:$28 sps:$4 sm:$0xff]  }
 0x311   :  { %8042 = vmatpush3.bf16.msra.mxu1 %v9205_v16  ;;  %8101 = vmatprep.subr.bf16.mxu0 %v9208_v49  ;;  %v9250_v16 = vld [vmem:[#allocation7 + $0x12b0] ss:$28 sps:$4 sm:$0xff]   ;;  %v1036_v49 = vsub.s32 5, %v9899_v42 }
 0x312   :  { %8043 = vmatprep.subr.bf16.mxu1 %v9207_v6  ;;  %v9252_v6 = vld [vmem:[#allocation7 + $0x1438] ss:$28 sps:$4 sm:$0xff]  }
 0x313   :  { %5689 = vmatmul.mubr.bf16.vlgmr.msra.gmra.mxu0 %v9927_v18  ;;  %v9221_v18 = vld [vmem:[#allocation7 + $0x18] ss:$28 sps:$4 sm:$0xff]  }
 0x314   :  { %8102 = vmatpush3.bf16.msra.mxu0 %v9210_v22  ;;  %5768 = vmatprep.mubr.bf16.mxu0 %v9931_v23  ;;  %v9226_v23 = vld [vmem:[#allocation7 + $0xb40] ss:$28 sps:$4 sm:$0xff]   ;;  %v9254_v22 = vld [vmem:[#allocation7 + $0x1278] ss:$28 sps:$4 sm:$0xff]  }
 0x315   :  { %8044 = vmatpush3.bf16.msra.mxu1 %v9209_v60  ;;  %8103 = vmatprep.subr.bf16.mxu0 %v9212_v26  ;;  %v9253_v60 = vld [vmem:[#allocation7 + $0x718] ss:$28 sps:$4 sm:$0xff]   ;;  %v10070_v26 = vld [vmem:[#allocation8] sm:$0xff] }
 0x316   :  { %8045 = vmatprep.subr.bf16.mxu1 %v9211_v24  ;;  %v9255_v24 = vld [vmem:[#allocation7 + $0x1160] ss:$28 sps:$4 sm:$0xff]  }
 0x318   :  { %8104 = vmatpush3.bf16.msra.mxu0 %v9214_v28  ;;  %v1037_v28 = vrot.slane %v10070_v26, %v1036_v49  ;;  %v9295_v49 = vld [vmem:[#allocation10 + $0x20] ss:$8 sps:$4 sm:$0xff]  }
 0x319   :  { %8046 = vmatpush3.bf16.msra.mxu1 %v9213_v43  ;;  %8105 = vmatprep.subr.bf16.mxu0 %v9216_v30  ;;  %v9258_v30 = vld [vmem:[#allocation7 + $0x1240] ss:$28 sps:$4 sm:$0xff]  }
 0x31a   :  { %8047 = vmatprep.subr.bf16.mxu1 %v9215_v29  ;;  %v9257_v29 = vld [vmem:[#allocation7 + $0xfa0] ss:$28 sps:$4 sm:$0xff]  }
 0x31c   :  { %8106 = vmatpush3.bf16.msra.mxu0 %v9218_v33  ;;  %v9260_v33 = vld [vmem:[#allocation7 + $0x13c8] ss:$28 sps:$4 sm:$0xff]  }
 0x31d   :  { %8048 = vmatpush3.bf16.msra.mxu1 %v9217_v32  ;;  %8107 = vmatprep.subr.bf16.mxu0 %v9220_v37  ;;  %v9259_v32 = vld [vmem:[#allocation7 + $0x1128] ss:$28 sps:$4 sm:$0xff]  }
 0x31e   :  { %8049 = vmatprep.subr.bf16.mxu1 %v9219_v35 }
 0x320   :  { %8108 = vmatpush3.bf16.msra.mxu0 %v9222_v38 }
 0x321   :  { %8050 = vmatpush3.bf16.msra.mxu1 %v9221_v18  ;;  %8109 = vmatprep.subr.bf16.mxu0 %v9224_v41  ;;  %v9262_v41 = vld [vmem:[#allocation7 + $0x1208] ss:$28 sps:$4 sm:$0xff]  }
 0x322   :  { %8079 = vmatprep.subr.bf16.mxu1 %v9223_v39  ;;  %v9261_v39 = vld [vmem:[#allocation7 + $0xf68] ss:$28 sps:$4 sm:$0xff]  }
 0x323   :  { %v10061_v48 = vpop.f32.mrf.mxu0 }
 0x324   :  { %5649 = vmatmul.mubr.bf16.vlgmr.msra.gmra.mxu1 %v9920_v13  ;;  %8110 = vmatpush3.bf16.msra.mxu0 %v9226_v23  ;;  %v9235_v13 = vld [vmem:[#allocation7 + $0x9b8] ss:$28 sps:$4 sm:$0xff]   ;;  %v9263_v23 = vld [vmem:[#allocation7 + $0x10f0] ss:$28 sps:$4 sm:$0xff]  }
 0x325   :  { %8080 = vmatpush3.bf16.msra.mxu1 %v9225_v46  ;;  %8111 = vmatprep.subr.bf16.mxu0 %v9228_v36  ;;  %v10063_v61 = vpop.f32.mrf.mxu0 }
 0x326   :  { %8081 = vmatprep.subr.bf16.mxu1 %v9227_v47  ;;  %5728 = vmatprep.mubr.bf16.mxu1 %v9923_v17  ;;  %v9241_v17 = vld [vmem:[#allocation7 + $0x7c0] ss:$28 sps:$4 sm:$0xff]   ;;  %v5366_v18 = vadd.f32 %v10063_v61, %v1037_v28  ;;  %v9264_v47 = vld [vmem:[#allocation7 + $0x1390] ss:$28 sps:$4 sm:$0xff]   ;;  %v9269_v61 = vld [vmem:[#allocation7 + $0xef8] ss:$28 sps:$4 sm:$0xff]  }
 0x327   :  { %v5367_v56 = vpop.f32.mrf.mxu0  ;;  %v9302_v28 = vld [vmem:[#allocation7 + $0x1550] ss:$28 sps:$4 sm:$0xff]  }
 0x328   :  { %8112 = vmatpush3.bf16.msra.mxu0 %v9230_v52  ;;  %v9270_v56 = vld [vmem:[#allocation7 + $0x1198] ss:$28 sps:$4 sm:$0xff]  }
 0x329   :  { %8082 = vmatpush3.bf16.msra.mxu1 %v9229_v50  ;;  %8113 = vmatprep.subr.bf16.mxu0 %v9232_v54  ;;  %v5368_v59 = vpop.f32.mrf.mxu0  ;;  %v9266_v50 = vld [vmem:[#allocation7 + $0x11d0] ss:$28 sps:$4 sm:$0xff]   ;;  %v9268_v54 = vld [vmem:[#allocation7 + $0x1358] ss:$28 sps:$4 sm:$0xff]  }
 0x32a   :  { %8083 = vmatprep.subr.bf16.mxu1 %v9231_v53  ;;  %v9267_v53 = vld [vmem:[#allocation7 + $0x10b8] ss:$28 sps:$4 sm:$0xff]   ;;  %v9276_v59 = vld [vmem:[#allocation7 + $0x1048] ss:$28 sps:$4 sm:$0xff]  }
 0x32c   :  { %8114 = vmatpush3.bf16.msra.mxu0 %v9234_v57  ;;  %v9274_v57 = vld [vmem:[#allocation10 + $0x74] ss:$8 sps:$4 sm:$0xff]  }
 0x32d   :  { %8084 = vmatpush3.bf16.msra.mxu1 %v9233_v0  ;;  %8115 = vmatprep.subr.bf16.mxu0 %v9236_v58  ;;  %v9271_v0 = vld [vmem:[#allocation7 + $0x1080] ss:$28 sps:$4 sm:$0xff]  }
 0x32e   :  { %8085 = vmatprep.subr.bf16.mxu1 %v9235_v13  ;;  %v9272_v13 = vld [vmem:[#allocation10 + $0x70] ss:$8 sps:$4 sm:$0xff]  }
 0x32f   :  { %v9275_v58 = vld [vmem:[#allocation7 + $0xec0] ss:$28 sps:$4 sm:$0xff]  }
 0x330   :  { %8116 = vmatpush3.bf16.msra.mxu0 %v9238_v62 }
 0x331   :  { %8086 = vmatpush3.bf16.msra.mxu1 %v9237_v34  ;;  %8145 = vmatprep.subr.bf16.mxu0 %v9240_v1  ;;  %v9279_v34 = vld [vmem:[#allocation10 + $0x64] ss:$8 sps:$4 sm:$0xff]   ;;  %v9280_v1 = vld [vmem:[#allocation7 + $0xe88] ss:$28 sps:$4 sm:$0xff]  }
 0x332   :  { %8087 = vmatprep.subr.bf16.mxu1 %v9239_v63  ;;  %v9277_v63 = vld [vmem:[#allocation10 + $0x60] ss:$8 sps:$4 sm:$0xff]  }
 0x333   :  { %5769 = vmatmul.mubr.bf16.vlgmr.msra.gmra.mxu0 %v9944_v31  ;;  %v1032_v31 = vsub.s32 4, %v9899_v42 }
 0x334   :  { %8146 = vmatpush3.bf16.msra.mxu0 %v9242_v2  ;;  %5848 = vmatprep.mubr.bf16.mxu0 %v9962_v45  ;;  %v9256_v45 = vld [vmem:[#allocation7 + $0x1400] ss:$28 sps:$4 sm:$0xff]  }
 0x335   :  { %8088 = vmatpush3.bf16.msra.mxu1 %v9241_v17  ;;  %8147 = vmatprep.subr.bf16.mxu0 %v9244_v4  ;;  %v1033_v43 = vrot.slane %v10070_v26, %v1032_v31  ;;  %v9281_v17 = vld [vmem:[#allocation7 + $0x1010] ss:$28 sps:$4 sm:$0xff]   ;;  %v9284_v2 = vld [vmem:[#allocation10 + $0x54] ss:$8 sps:$4 sm:$0xff]   ;;  %v9286_v4 = vld [vmem:[#allocation7 + $0xfd8] ss:$28 sps:$4 sm:$0xff]  }
 0x336   :  { %8089 = vmatprep.subr.bf16.mxu1 %v9243_v3  ;;  %v9285_v3 = vld [vmem:[#allocation7 + $0xe50] ss:$28 sps:$4 sm:$0xff]  }
 0x337   :  { %v5364_v35 = vadd.f32 %v10061_v48, %v1033_v43 }
 0x338   :  { %8148 = vmatpush3.bf16.msra.mxu0 %v9246_v20  ;;  %v9290_v20 = vld [vmem:[#allocation7 + $0xe18] ss:$28 sps:$4 sm:$0xff]  }
 0x339   :  { %8090 = vmatpush3.bf16.msra.mxu1 %v9245_v5  ;;  %8149 = vmatprep.subr.bf16.mxu0 %v9248_v9  ;;  %v9289_v5 = vld [vmem:[#allocation10 + $0x44] ss:$8 sps:$4 sm:$0xff]   ;;  %v9291_v9 = vld [vmem:[#allocation10 + $0x30] ss:$8 sps:$4 sm:$0xff]  }
 0x33a   :  { %8091 = vmatprep.subr.bf16.mxu1 %v9247_v8  ;;  %v9293_v8 = vld [vmem:[#allocation10 + $0x34] ss:$8 sps:$4 sm:$0xff]  }
 0x33c   :  { %8150 = vmatpush3.bf16.msra.mxu0 %v9250_v16  ;;  %v9770_v16 = vmov 0.0  }
 0x33d   :  { %8092 = vmatpush3.bf16.msra.mxu1 %v9249_v11  ;;  %8151 = vmatprep.subr.bf16.mxu0 %v9252_v6  ;;  %v9294_v11 = vld [vmem:[#allocation7 + $0x15c0] ss:$28 sps:$4 sm:$0xff]  }
 0x33e   :  { %8093 = vmatprep.subr.bf16.mxu1 %v9251_v19  ;;  %v9297_v19 = vld [vmem:[#allocation10 + $0x24] ss:$8 sps:$4 sm:$0xff]  }
 0x340   :  { %8152 = vmatpush3.bf16.msra.mxu0 %v9254_v22 }
 0x341   :  { %8094 = vmatpush3.bf16.msra.mxu1 %v9253_v60  ;;  %8153 = vmatprep.subr.bf16.mxu0 %v9256_v45  ;;  %v9298_v60 = vld [vmem:[#allocation7 + $0x1588] ss:$28 sps:$4 sm:$0xff]  }
 0x342   :  { %8123 = vmatprep.subr.bf16.mxu1 %v9255_v24  ;;  %v9301_v24 = vld [vmem:[#allocation10 + $0x14] ss:$8 sps:$4 sm:$0xff]  }
 0x344   :  { %v5404_v37 = vpop.f32.mrf.mxu1  ;;  %5729 = vmatmul.mubr.bf16.vlgmr.msra.gmra.mxu1 %v9940_v27  ;;  %8154 = vmatpush3.bf16.msra.mxu0 %v9258_v30  ;;  %v9265_v27 = vld [vmem:[#allocation7 + $0xf30] ss:$28 sps:$4 sm:$0xff]  }
 0x345   :  { %v10077_v38 = vadd.f32 %v5404_v37, %v5364_v35  ;;  %8124 = vmatpush3.bf16.msra.mxu1 %v9257_v29  ;;  %8155 = vmatprep.subr.bf16.mxu0 %v9260_v33  ;;  %v9305_v29 = vld [vmem:[#allocation10 + $0x4] ss:$8 sps:$4 sm:$0xff]   ;;  %v9309_v35 = vld [vmem:[#allocation10 + $0xf4] ss:$8 sps:$4 sm:$0xff]  }
 0x346   :  { %v5406_v46 = vpop.f32.mrf.mxu1  ;;  %8125 = vmatprep.subr.bf16.mxu1 %v9259_v32  ;;  %5808 = vmatprep.mubr.bf16.mxu1 %v9957_v44  ;;  %v5897_v44 = vmax.f32 %v10019_v25, 0.0  ;;  %v9282_v25 = vld [vmem:[#allocation10 + $0x50] ss:$8 sps:$4 sm:$0xff]   ;;  %v9303_v32 = vld [vmem:[#allocation10] ss:$8 sps:$4 sm:$0xff]  }
 0x347   :  { %v10079_v36 = vadd.f32 %v5406_v46, %v5366_v18  ;;  %v9306_v33 = vld [vmem:[#allocation7 + $0x1518] ss:$28 sps:$4 sm:$0xff]   ;;  %v9312_v37 = vld [vmem:[#allocation10 + $0x174] ss:$8 sps:$4 sm:$0xff]   ;;  %v5899_v18 = vmax.f32 %v10055_v15, 0.0 }
 0x348   :  { %v5408_v48 = vpop.f32.mrf.mxu1  ;;  %8156 = vmatpush3.bf16.msra.mxu0 %v9262_v41  ;;  %v5904_v62 = vpack.c.bf16 %v5897_v44, %v5897_v44  ;;  %v9315_v41 = vld [vmem:[#allocation10 + $0xe4] ss:$8 sps:$4 sm:$0xff]   ;;  %v9324_v15 = vld [vmem:[#allocation10 + $0x154] ss:$8 sps:$4 sm:$0xff]  }
 0x349   :  { %8126 = vmatpush3.bf16.msra.mxu1 %v9261_v39  ;;  %8157 = vmatprep.subr.bf16.mxu0 %v9264_v47  ;;  %v9310_v39 = vld [vmem:[#allocation10 + $0x170] ss:$8 sps:$4 sm:$0xff]   ;;  %v9318_v46 = vld [vmem:[#allocation10 + $0x164] ss:$8 sps:$4 sm:$0xff]   ;;  %v9313_v47 = vld [vmem:[#allocation10 + $0xe0] ss:$8 sps:$4 sm:$0xff]  }
 0x34a   :  { %v5409_v52 = vpop.f32.mrf.mxu1  ;;  %8127 = vmatprep.subr.bf16.mxu1 %v9263_v23  ;;  %v5906_v23 = vpack.c.bf16 %v5899_v18, %v5899_v18  ;;  %v9321_v48 = vld [vmem:[#allocation10 + $0xd4] ss:$8 sps:$4 sm:$0xff]   ;;  %v9339_v44 = vld [vmem:[#allocation10 + $0xa4] ss:$8 sps:$4 sm:$0xff]  }
 0x34b   :  { %v9327_v52 = vld [vmem:[#allocation10 + $0xc4] ss:$8 sps:$4 sm:$0xff]   ;;  %v9384_v18 = vld [vmem:[#allocation10 + $0x234] ss:$8 sps:$4 sm:$0xff]  }
 0x34c   :  { %8158 = vmatpush3.bf16.msra.mxu0 %v9266_v50  ;;  %v9322_v50 = vld [vmem:[#allocation10 + $0x150] ss:$8 sps:$4 sm:$0xff]  }
 0x34d   :  { %8128 = vmatpush3.bf16.msra.mxu1 %v9265_v27  ;;  %8159 = vmatprep.subr.bf16.mxu0 %v9268_v54  ;;  %v9319_v27 = vld [vmem:[#allocation10 + $0xd0] ss:$8 sps:$4 sm:$0xff]   ;;  %v9328_v54 = vld [vmem:[#allocation10 + $0x140] ss:$8 sps:$4 sm:$0xff]  }
 0x34e   :  { %8129 = vmatprep.subr.bf16.mxu1 %v9267_v53  ;;  %v9330_v53 = vld [vmem:[#allocation10 + $0x144] ss:$8 sps:$4 sm:$0xff]  }
 0x350   :  { %8160 = vmatpush3.bf16.msra.mxu0 %v9270_v56  ;;  %v9336_v56 = vld [vmem:[#allocation10 + $0x134] ss:$8 sps:$4 sm:$0xff]  }
 0x351   :  { %8130 = vmatpush3.bf16.msra.mxu1 %v9269_v61  ;;  %6594 = vmatprep.subr.bf16.mxu0 %v9274_v57  ;;  %v9333_v61 = vld [vmem:[#allocation10 + $0xb4] ss:$8 sps:$4 sm:$0xff]   ;;  %v9334_v57 = vld [vmem:[#allocation10 + $0x130] ss:$8 sps:$4 sm:$0xff]  }
 0x352   :  { %8131 = vmatprep.subr.bf16.mxu1 %v9271_v0  ;;  %v9331_v0 = vld [vmem:[#allocation10 + $0xb0] ss:$8 sps:$4 sm:$0xff]  }
 0x353   :  { %5849 = vmatmul.mubr.bf16.vlgmr.msra.gmra.mxu0 %v9971_v55  ;;  %v9287_v55 = vld [vmem:[#allocation10 + $0x40] ss:$8 sps:$4 sm:$0xff]  }
 0x354   :  { %6595 = vmatpush1.bf16.msra.mxu0 %v9272_v13  ;;  %6626 = vmatprep.mubr.bf16.mxu0 %v5904_v62  ;;  %v9342_v13 = vld [vmem:[#allocation10 + $0x124] ss:$8 sps:$4 sm:$0xff]   ;;  %v9340_v62 = vld [vmem:[#allocation10 + $0x120] ss:$8 sps:$4 sm:$0xff]  }
 0x355   :  { %8132 = vmatpush3.bf16.msra.mxu1 %v9275_v58  ;;  %6596 = vmatprep.subr.bf16.mxu0 %v9279_v34  ;;  %v9337_v34 = vld [vmem:[#allocation10 + $0xa0] ss:$8 sps:$4 sm:$0xff]  }
 0x356   :  { %8133 = vmatprep.subr.bf16.mxu1 %v9276_v59 }
 0x358   :  { %6597 = vmatpush1.bf16.msra.mxu0 %v9277_v63 }
 0x359   :  { %8134 = vmatpush3.bf16.msra.mxu1 %v9280_v1  ;;  %6598 = vmatprep.subr.bf16.mxu0 %v9284_v2  ;;  %v9345_v1 = vld [vmem:[#allocation10 + $0x94] ss:$8 sps:$4 sm:$0xff]  }
 0x35a   :  { %8135 = vmatprep.subr.bf16.mxu1 %v9281_v17  ;;  %v9348_v17 = vld [vmem:[#allocation10 + $0x114] ss:$8 sps:$4 sm:$0xff]  }
 0x35c   :  { %6599 = vmatpush1.bf16.msra.mxu0 %v9282_v25  ;;  %v9343_v25 = vld [vmem:[#allocation10 + $0x90] ss:$8 sps:$4 sm:$0xff]  }
 0x35d   :  { %8136 = vmatpush3.bf16.msra.mxu1 %v9285_v3  ;;  %6600 = vmatprep.subr.bf16.mxu0 %v9289_v5  ;;  %v9346_v3 = vld [vmem:[#allocation10 + $0x110] ss:$8 sps:$4 sm:$0xff]   ;;  %v9351_v5 = vld [vmem:[#allocation10 + $0x84] ss:$8 sps:$4 sm:$0xff]  }
 0x35e   :  { %8137 = vmatprep.subr.bf16.mxu1 %v9286_v4 }
 0x360   :  { %6601 = vmatpush1.bf16.msra.mxu0 %v9287_v55  ;;  %v9354_v55 = vld [vmem:[#allocation10 + $0x104] ss:$8 sps:$4 sm:$0xff]  }
 0x361   :  { %8138 = vmatpush3.bf16.msra.mxu1 %v9290_v20  ;;  %6602 = vmatprep.subr.bf16.mxu0 %v9293_v8  ;;  %v9349_v20 = vld [vmem:[#allocation10 + $0x80] ss:$8 sps:$4 sm:$0xff]  }
 0x362   :  { %8242 = vmatprep.subr.bf16.mxu1 %v9770_v16  ;;  %v9352_v8 = vld [vmem:[#allocation10 + $0x100] ss:$8 sps:$4 sm:$0xff]  }
 0x363   :  { %v5445_v6 = vpop.f32.mrf.mxu0 }
 0x364   :  { %5809 = vmatmul.mubr.bf16.vlgmr.msra.gmra.mxu1 %v9967_v51  ;;  %v10087_v31 = vadd.f32 %v5445_v6, %v10077_v38  ;;  %6603 = vmatpush1.bf16.msra.mxu0 %v9291_v9  ;;  %v9299_v51 = vld [vmem:[#allocation10 + $0x10] ss:$8 sps:$4 sm:$0xff]   ;;  %v5896_v9 = vmax.f32 %v10017_v21, 0.0  ;;  %v9369_v21 = vld [vmem:[#allocation10 + $0x1d4] ss:$8 sps:$4 sm:$0xff]  }
 0x365   :  { %8243 = vmatpush3.bf16.msra.mxu1 %v9294_v11  ;;  %v5447_v22 = vpop.f32.mrf.mxu0  ;;  %6604 = vmatprep.subr.bf16.mxu0 %v9297_v19  ;;  %v9307_v38 = vld [vmem:[#allocation10 + $0xf0] ss:$8 sps:$4 sm:$0xff]   ;;  %v9357_v11 = vld [vmem:[#allocation10 + $0x1f4] ss:$8 sps:$4 sm:$0xff]  }
 0x366   :  { %8244 = vmatprep.subr.bf16.mxu1 %v9770_v16  ;;  %v10091_v45 = vadd.f32 %v5447_v22, %v10079_v36  ;;  %8250 = vmatprep.mubr.msk.bf16.mxu1 %vm9771_vm1, %v9770_v16  ;;  %v9316_v36 = vld [vmem:[#allocation10 + $0x160] ss:$8 sps:$4 sm:$0xff]   ;;  %v9360_v19 = vld [vmem:[#allocation10 + $0x274] ss:$8 sps:$4 sm:$0xff]   ;;  %v9355_v6 = vld [vmem:[#allocation10 + $0x1f0] ss:$8 sps:$4 sm:$0xff]  }
 0x367   :  { %v5449_v43 = vpop.f32.mrf.mxu0  ;;  %v9366_v22 = vld [vmem:[#allocation10 + $0x264] ss:$8 sps:$4 sm:$0xff]  }
 0x368   :  { %6605 = vmatpush1.bf16.msra.mxu0 %v9295_v49  ;;  %v5903_v49 = vpack.c.bf16 %v5896_v9, %v5896_v9  ;;  %v9364_v43 = vld [vmem:[#allocation10 + $0x260] ss:$8 sps:$4 sm:$0xff]   ;;  %v9414_v9 = vld [vmem:[#allocation10 + $0x2c4] ss:$8 sps:$4 sm:$0xff]  }
 0x369   :  { %8245 = vmatpush3.bf16.msra.mxu1 %v9298_v60  ;;  %6606 = vmatprep.subr.bf16.mxu0 %v9301_v24  ;;  %v5450_v30 = vpop.f32.mrf.mxu0  ;;  %v9363_v60 = vld [vmem:[#allocation10 + $0x1e4] ss:$8 sps:$4 sm:$0xff]   ;;  %v9361_v24 = vld [vmem:[#allocation10 + $0x1e0] ss:$8 sps:$4 sm:$0xff]  }
 0x36a   :  { %8246 = vmatprep.subr.bf16.mxu1 %v9770_v16  ;;  %v9375_v30 = vld [vmem:[#allocation10 + $0x1c4] ss:$8 sps:$4 sm:$0xff]  }
 0x36c   :  { %6607 = vmatpush1.bf16.msra.mxu0 %v9299_v51  ;;  %v9372_v51 = vld [vmem:[#allocation10 + $0x254] ss:$8 sps:$4 sm:$0xff]  }
 0x36d   :  { %8247 = vmatpush3.bf16.msra.mxu1 %v9302_v28  ;;  %6608 = vmatprep.subr.bf16.mxu0 %v9305_v29  ;;  %v9367_v28 = vld [vmem:[#allocation10 + $0x1d0] ss:$8 sps:$4 sm:$0xff]  }
 0x36e   :  { %8248 = vmatprep.subr.bf16.mxu1 %v9770_v16  ;;  %v9370_v29 = vld [vmem:[#allocation10 + $0x250] ss:$8 sps:$4 sm:$0xff]  }
 0x370   :  { %6609 = vmatpush1.bf16.msra.mxu0 %v9303_v32  ;;  %v9378_v32 = vld [vmem:[#allocation10 + $0x244] ss:$8 sps:$4 sm:$0xff]  }
 0x371   :  { %8249 = vmatpush3.bf16.msra.mxu1 %v9306_v33  ;;  %6610 = vmatprep.subr.bf16.mxu0 %v9309_v35  ;;  %v9373_v33 = vld [vmem:[#allocation10 + $0x1c0] ss:$8 sps:$4 sm:$0xff]  }
 0x372   :  { %6635 = vmatprep.subr.bf16.mxu1 %v9312_v37  ;;  %v9376_v35 = vld [vmem:[#allocation10 + $0x240] ss:$8 sps:$4 sm:$0xff]   ;;  %v9381_v37 = vld [vmem:[#allocation10 + $0x1b4] ss:$8 sps:$4 sm:$0xff]  }
 0x374   :  { %8251 = vmatmul.mubr.msk.bf16.vlgmr.msra.gmra.mxu1 %vm4751_vm0, %v9981_v12  ;;  %6611 = vmatpush2.bf16.msra.mxu0 %v9307_v38  ;;  %v9325_v12 = vld [vmem:[#allocation10 + $0xc0] ss:$8 sps:$4 sm:$0xff]   ;;  %v9379_v38 = vld [vmem:[#allocation10 + $0x1b0] ss:$8 sps:$4 sm:$0xff]  }
 0x375   :  { %6636 = vmatpush1.bf16.msra.mxu1 %v9310_v39  ;;  %6667 = vmatprep.mubr.bf16.mxu1 %v5906_v23  ;;  %v9382_v39 = vld [vmem:[#allocation10 + $0x230] ss:$8 sps:$4 sm:$0xff]  }
 0x376   :  { %6612 = vmatprep.subr.bf16.mxu0 %v9315_v41  ;;  %6637 = vmatprep.subr.bf16.mxu1 %v9318_v46  ;;  %v9387_v41 = vld [vmem:[#allocation10 + $0x1a4] ss:$8 sps:$4 sm:$0xff]  }
 0x377   :  { %v9390_v46 = vld [vmem:[#allocation10 + $0x224] ss:$8 sps:$4 sm:$0xff]  }
 0x378   :  { %6613 = vmatpush2.bf16.msra.mxu0 %v9313_v47  ;;  %v9385_v47 = vld [vmem:[#allocation10 + $0x1a0] ss:$8 sps:$4 sm:$0xff]  }
 0x379   :  { %6638 = vmatpush1.bf16.msra.mxu1 %v9316_v36  ;;  %6614 = vmatprep.subr.bf16.mxu0 %v9321_v48  ;;  %v9388_v36 = vld [vmem:[#allocation10 + $0x220] ss:$8 sps:$4 sm:$0xff]  }
 0x37a   :  { %6639 = vmatprep.subr.bf16.mxu1 %v9324_v15  ;;  %v9393_v15 = vld [vmem:[#allocation10 + $0x194] ss:$8 sps:$4 sm:$0xff]  }
 0x37c   :  { %6615 = vmatpush2.bf16.msra.mxu0 %v9319_v27  ;;  %v9396_v27 = vld [vmem:[#allocation10 + $0x214] ss:$8 sps:$4 sm:$0xff]  }
 0x37d   :  { %6640 = vmatpush1.bf16.msra.mxu1 %v9322_v50  ;;  %6616 = vmatprep.subr.bf16.mxu0 %v9327_v52  ;;  %v9391_v52 = vld [vmem:[#allocation10 + $0x190] ss:$8 sps:$4 sm:$0xff]  }
 0x37e   :  { %6641 = vmatprep.subr.bf16.mxu1 %v9330_v53  ;;  %v9394_v53 = vld [vmem:[#allocation10 + $0x210] ss:$8 sps:$4 sm:$0xff]  }
 0x380   :  { %6617 = vmatpush2.bf16.msra.mxu0 %v9325_v12  ;;  %v9399_v12 = vld [vmem:[#allocation10 + $0x184] ss:$8 sps:$4 sm:$0xff]  }
 0x381   :  { %6642 = vmatpush1.bf16.msra.mxu1 %v9328_v54  ;;  %6618 = vmatprep.subr.bf16.mxu0 %v9333_v61  ;;  %v9402_v54 = vld [vmem:[#allocation10 + $0x204] ss:$8 sps:$4 sm:$0xff]  }
 0x382   :  { %6643 = vmatprep.subr.bf16.mxu1 %v9336_v56  ;;  %v9397_v56 = vld [vmem:[#allocation10 + $0x180] ss:$8 sps:$4 sm:$0xff]  }
 0x384   :  { %v5486_v58 = vpop.f32.mrf.mxu1  ;;  %6619 = vmatpush2.bf16.msra.mxu0 %v9331_v0  ;;  %v9400_v0 = vld [vmem:[#allocation10 + $0x200] ss:$8 sps:$4 sm:$0xff]  }
 0x385   :  { %v10100_v59 = vadd.f32 %v5486_v58, %v10087_v31  ;;  %6644 = vmatpush1.bf16.msra.mxu1 %v9334_v57  ;;  %6620 = vmatprep.subr.bf16.mxu0 %v9339_v44  ;;  %v9358_v31 = vld [vmem:[#allocation10 + $0x270] ss:$8 sps:$4 sm:$0xff]   ;;  %v5898_v57 = vmax.f32 %v10053_v7, 0.0  ;;  %v9405_v44 = vld [vmem:[#allocation10 + $0x2f4] ss:$8 sps:$4 sm:$0xff]  }
 0x386   :  { %v10102_v63 = vpop.f32.mrf.mxu1  ;;  %6645 = vmatprep.subr.bf16.mxu1 %v9342_v13  ;;  %v9429_v13 = vld [vmem:[#allocation10 + $0x374] ss:$8 sps:$4 sm:$0xff]   ;;  %v9403_v58 = vld [vmem:[#allocation10 + $0x2f0] ss:$8 sps:$4 sm:$0xff]  }
 0x387   :  { %v9411_v7 = vld [vmem:[#allocation10 + $0x2d4] ss:$8 sps:$4 sm:$0xff]  }
 0x388   :  { %v5490_v2 = vpop.f32.mrf.mxu1  ;;  %6621 = vmatpush2.bf16.msra.mxu0 %v9337_v34  ;;  %v9427_v34 = vld [vmem:[#allocation10 + $0x370] ss:$8 sps:$4 sm:$0xff]  }
 0x389   :  { %6646 = vmatpush1.bf16.msra.mxu1 %v9340_v62  ;;  %6622 = vmatprep.subr.bf16.mxu0 %v9345_v1  ;;  %v5905_v62 = vpack.c.bf16 %v5898_v57, %v5898_v57  ;;  %v9408_v1 = vld [vmem:[#allocation10 + $0x2e4] ss:$8 sps:$4 sm:$0xff]  }
 0x38a   :  { %v5491_v4 = vpop.f32.mrf.mxu1  ;;  %6647 = vmatprep.subr.bf16.mxu1 %v9348_v17  ;;  %v9432_v17 = vld [vmem:[#allocation10 + $0x364] ss:$8 sps:$4 sm:$0xff]  }
 0x38c   :  { %6623 = vmatpush2.bf16.msra.mxu0 %v9343_v25  ;;  %v9406_v25 = vld [vmem:[#allocation10 + $0x2e0] ss:$8 sps:$4 sm:$0xff]  }
 0x38d   :  { %6648 = vmatpush1.bf16.msra.mxu1 %v9346_v3  ;;  %6624 = vmatprep.subr.bf16.mxu0 %v9351_v5  ;;  %v9430_v3 = vld [vmem:[#allocation10 + $0x360] ss:$8 sps:$4 sm:$0xff]   ;;  %v9435_v5 = vld [vmem:[#allocation10 + $0x354] ss:$8 sps:$4 sm:$0xff]  }
 0x38e   :  { %6649 = vmatprep.subr.bf16.mxu1 %v9354_v55 }
 0x390   :  { %6625 = vmatpush2.bf16.msra.mxu0 %v9349_v20  ;;  %v9409_v20 = vld [vmem:[#allocation10 + $0x2d0] ss:$8 sps:$4 sm:$0xff]  }
 0x391   :  { %6650 = vmatpush1.bf16.msra.mxu1 %v9352_v8  ;;  %6676 = vmatprep.subr.bf16.mxu0 %v9360_v19  ;;  %v9433_v8 = vld [vmem:[#allocation10 + $0x350] ss:$8 sps:$4 sm:$0xff]   ;;  %v9438_v19 = vld [vmem:[#allocation10 + $0x344] ss:$8 sps:$4 sm:$0xff]  }
 0x392   :  { %6651 = vmatprep.subr.bf16.mxu1 %v9357_v11 }
 0x393   :  { %6627 = vmatmul.mubr.bf16.vlgmr.msra.gmra.mxu0 %v5903_v49  ;;  %v9417_v49 = vld [vmem:[#allocation10 + $0x2b4] ss:$8 sps:$4 sm:$0xff]  }
 0x394   :  { %6677 = vmatpush1.bf16.msra.mxu0 %v9358_v31  ;;  %v9436_v31 = vld [vmem:[#allocation10 + $0x340] ss:$8 sps:$4 sm:$0xff]  }
 0x395   :  { %6652 = vmatpush2.bf16.msra.mxu1 %v9355_v6  ;;  %6678 = vmatprep.subr.bf16.mxu0 %v9366_v22  ;;  %v9412_v6 = vld [vmem:[#allocation10 + $0x2c0] ss:$8 sps:$4 sm:$0xff]   ;;  %v9439_v22 = vld [vmem:[#allocation10 + $0x330] ss:$8 sps:$4 sm:$0xff]  }
 0x396   :  { %6653 = vmatprep.subr.bf16.mxu1 %v9363_v60  ;;  %v9441_v60 = vld [vmem:[#allocation10 + $0x334] ss:$8 sps:$4 sm:$0xff]  }
 0x398   :  { %6679 = vmatpush1.bf16.msra.mxu0 %v9364_v43  ;;  %v9444_v43 = vld [vmem:[#allocation10 + $0x324] ss:$8 sps:$4 sm:$0xff]  }
 0x399   :  { %6654 = vmatpush2.bf16.msra.mxu1 %v9361_v24  ;;  %6680 = vmatprep.subr.bf16.mxu0 %v9372_v51  ;;  %v9420_v24 = vld [vmem:[#allocation10 + $0x2a4] ss:$8 sps:$4 sm:$0xff]  }
 0x39a   :  { %6655 = vmatprep.subr.bf16.mxu1 %v9369_v21  ;;  %v5489_v21 = vadd.f32 %v10102_v63, %v10091_v45  ;;  %v9421_v45 = vld [vmem:[#allocation10 + $0x290] ss:$8 sps:$4 sm:$0xff]  }
 0x39c   :  { %6681 = vmatpush1.bf16.msra.mxu0 %v9370_v29 }
 0x39d   :  { %6656 = vmatpush2.bf16.msra.mxu1 %v9367_v28  ;;  %6682 = vmatprep.subr.bf16.mxu0 %v9378_v32  ;;  %v9442_v32 = vld [vmem:[#allocation10 + $0x320] ss:$8 sps:$4 sm:$0xff]  }
 0x39e   :  { %6657 = vmatprep.subr.bf16.mxu1 %v9375_v30  ;;  %v9418_v30 = vld [vmem:[#allocation10 + $0x2a0] ss:$8 sps:$4 sm:$0xff]  }
 0x3a0   :  { %6683 = vmatpush1.bf16.msra.mxu0 %v9376_v35 }
 0x3a1   :  { %6658 = vmatpush2.bf16.msra.mxu1 %v9373_v33  ;;  %6684 = vmatprep.subr.bf16.mxu0 %v9384_v18  ;;  %v9447_v18 = vld [vmem:[#allocation10 + $0x314] ss:$8 sps:$4 sm:$0xff]  }
 0x3a2   :  { %6659 = vmatprep.subr.bf16.mxu1 %v9381_v37  ;;  %v9423_v37 = vld [vmem:[#allocation10 + $0x294] ss:$8 sps:$4 sm:$0xff]  }
 0x3a3   :  { %v10105_v23 = vpop.f32.mrf.mxu0 }
 0x3a4   :  { %6685 = vmatpush1.bf16.msra.mxu0 %v9382_v39  ;;  %v5528_v51 = vadd.f32 %v10105_v23, %v10100_v59  ;;  %v9445_v59 = vld [vmem:[#allocation10 + $0x310] ss:$8 sps:$4 sm:$0xff]   ;;  %v9426_v23 = vld [vmem:[#allocation10 + $0x284] ss:$8 sps:$4 sm:$0xff]  }
 0x3a5   :  { %6660 = vmatpush2.bf16.msra.mxu1 %v9379_v38  ;;  %v10107_v48 = vpop.f32.mrf.mxu0  ;;  %6686 = vmatprep.subr.bf16.mxu0 %v9390_v46 }
 0x3a6   :  { %6661 = vmatprep.subr.bf16.mxu1 %v9387_v41  ;;  %v5530_v29 = vadd.f32 %v10107_v48, %v5489_v21 }
 0x3a7   :  { %v5531_v50 = vpop.f32.mrf.mxu0 }
 0x3a8   :  { %6687 = vmatpush1.bf16.msra.mxu0 %v9388_v36 }
 0x3a9   :  { %6662 = vmatpush2.bf16.msra.mxu1 %v9385_v47  ;;  %6688 = vmatprep.subr.bf16.mxu0 %v9396_v27  ;;  %v5532_v61 = vpop.f32.mrf.mxu0  ;;  %v9450_v47 = vld [vmem:[#allocation10 + $0x304] ss:$8 sps:$4 sm:$0xff]   ;;  %v9448_v27 = vld [vmem:[#allocation10 + $0x300] ss:$8 sps:$4 sm:$0xff]  }
 0x3aa   :  { %6663 = vmatprep.subr.bf16.mxu1 %v9393_v15  ;;  %v9424_v15 = vld [vmem:[#allocation10 + $0x280] ss:$8 sps:$4 sm:$0xff]  }
 0x3ac   :  { %6689 = vmatpush1.bf16.msra.mxu0 %v9394_v53 }
 0x3ad   :  { %6664 = vmatpush2.bf16.msra.mxu1 %v9391_v52  ;;  %6690 = vmatprep.subr.bf16.mxu0 %v9402_v54 }
 0x3ae   :  { %6665 = vmatprep.subr.bf16.mxu1 %v9399_v12 }
 0x3b0   :  { %6691 = vmatpush1.bf16.msra.mxu0 %v9400_v0  ;;  %v1040_v0 = vsub.s32 6, %v9899_v42 }
 0x3b1   :  { %6666 = vmatpush2.bf16.msra.mxu1 %v9397_v56  ;;  %6692 = vmatprep.subr.bf16.mxu0 %v9405_v44 }
 0x3b2   :  { %6717 = vmatprep.subr.bf16.mxu1 %v9429_v13  ;;  %v1041_v44 = vrot.slane %v10070_v26, %v1040_v0  ;;  %v6791_v26 = vld [vmem:[%s10329_s6 + $0xf8] sm:$0xff]  ;;  %v6765_v0 = vld [vmem:[%s10329_s6 + $0x28] sm:$0xff] }
 0x3b3   :  { %v5609_v2 = vpop.f32.mrf.mxu0 }
 0x3b4   :  { %6668 = vmatmul.mubr.bf16.vlgmr.msra.gmra.mxu1 %v5905_v62  ;;  %6693 = vmatpush2.bf16.msra.mxu0 %v9403_v58 }
 0x3b5   :  { %6718 = vmatpush1.bf16.msra.mxu1 %v9427_v34  ;;  %6694 = vmatprep.subr.bf16.mxu0 %v9408_v1  ;;  %v5611_v4 = vpop.f32.mrf.mxu0 }
 0x3b6   :  { %6719 = vmatprep.subr.bf16.mxu1 %v9432_v17  ;;  %6749 = vmatprep.mubr.bf16.mxu1 %v9769_v40  ;;  %v9415_v40 = vld [vmem:[#allocation10 + $0x2b0] ss:$8 sps:$4 sm:$0xff]  }
 0x3b7   :  { %v5613_v55 = vpop.f32.mrf.mxu0 }
 0x3b8   :  { %6695 = vmatpush2.bf16.msra.mxu0 %v9406_v25 }
 0x3b9   :  { %6720 = vmatpush1.bf16.msra.mxu1 %v9430_v3  ;;  %6696 = vmatprep.subr.bf16.mxu0 %v9411_v7  ;;  %v5614_v11 = vpop.f32.mrf.mxu0 }
 0x3ba   :  { %6721 = vmatprep.subr.bf16.mxu1 %v9435_v5 }
 0x3bc   :  { %6697 = vmatpush2.bf16.msra.mxu0 %v9409_v20 }
 0x3bd   :  { %6722 = vmatpush1.bf16.msra.mxu1 %v9433_v8  ;;  %6698 = vmatprep.subr.bf16.mxu0 %v9414_v9 }
 0x3be   :  { %6723 = vmatprep.subr.bf16.mxu1 %v9438_v19 }
 0x3c0   :  { %6699 = vmatpush2.bf16.msra.mxu0 %v9412_v6 }
 0x3c1   :  { %6724 = vmatpush1.bf16.msra.mxu1 %v9436_v31  ;;  %6700 = vmatprep.subr.bf16.mxu0 %v9417_v49 }
 0x3c2   :  { %6725 = vmatprep.subr.bf16.mxu1 %v9441_v60 }
 0x3c4   :  { %v5568_v28 = vpop.f32.mrf.mxu1  ;;  %6701 = vmatpush2.bf16.msra.mxu0 %v9415_v40 }
 0x3c5   :  { %6726 = vmatpush1.bf16.msra.mxu1 %v9439_v22  ;;  %v5569_v33 = vadd.f32 %v5568_v28, %v5528_v51  ;;  %6702 = vmatprep.subr.bf16.mxu0 %v9420_v24 }
 0x3c6   :  { %v5570_v35 = vpop.f32.mrf.mxu1  ;;  %6727 = vmatprep.subr.bf16.mxu1 %v9444_v43 }
 0x3c7   :  { %v5571_v38 = vadd.f32 %v5570_v35, %v5530_v29  ;;  %v5610_v63 = vadd.f32 %v5609_v2, %v5569_v33 }
 0x3c8   :  { %v5572_v39 = vpop.f32.mrf.mxu1  ;;  %6703 = vmatpush2.bf16.msra.mxu0 %v9418_v30 }
 0x3c9   :  { %v5612_v41 = vadd.f32 %v5611_v4, %v5571_v38  ;;  %6728 = vmatpush1.bf16.msra.mxu1 %v9442_v32  ;;  %6704 = vmatprep.subr.bf16.mxu0 %v9423_v37  ;;  %v5900_v50 = vmax.f32 %v5610_v63, 0.0  ;;  %v6790_v39 = vld [vmem:[%s10329_s6 + $0xf0] sm:$0xff]  ;;  %v6788_v63 = vld [vmem:[%s10329_s6 + $0xe0] sm:$0xff] }
 0x3ca   :  { %v5573_v46 = vpop.f32.mrf.mxu1  ;;  %6729 = vmatprep.subr.bf16.mxu1 %v9447_v18  ;;  %v6775_v18 = vld [vmem:[%s10329_s6 + $0x78] sm:$0xff] }
 0x3cb   :  { %v5901_v36 = vmax.f32 %v5612_v41, 0.0  ;;  %v5907_v52 = vpack.c.bf16 %v5900_v50, %v5900_v50  ;;  %v6774_v41 = vld [vmem:[%s10329_s6 + $0x70] sm:$0xff]  ;;  %v6772_v46 = vld [vmem:[%s10329_s6 + $0x60] sm:$0xff] }
 0x3cc   :  { %6705 = vmatpush2.bf16.msra.mxu0 %v9421_v45  ;;  %v6789_v45 = vld [vmem:[%s10329_s6 + $0xe8] sm:$0xff]  ;;  %v6784_v50 = vld [vmem:[%s10329_s6 + $0xc0] sm:$0xff] }
 0x3cd   :  { %v5908_v48 = vpack.c.bf16 %v5901_v36, %v5901_v36  ;;  %6730 = vmatpush1.bf16.msra.mxu1 %v9445_v59  ;;  %6706 = vmatprep.subr.bf16.mxu0 %v9426_v23  ;;  %v6773_v59 = vld [vmem:[%s10329_s6 + $0x68] sm:$0xff]  ;;  %v6787_v23 = vld [vmem:[%s10329_s6 + $0xd8] sm:$0xff]  ;;  %v6786_v36 = vld [vmem:[%s10329_s6 + $0xd0] sm:$0xff] }
 0x3ce   :  { %6731 = vmatprep.subr.bf16.mxu1 %v9450_v47  ;;  %v6771_v47 = vld [vmem:[%s10329_s6 + $0x58] sm:$0xff] }
 0x3cf   :  { %6708 = vmatprep.mubr.bf16.mxu0 %v5908_v48  ;;  %v6770_v48 = vld [vmem:[%s10329_s6 + $0x50] sm:$0xff] }
 0x3d0   :  { %6707 = vmatpush2.bf16.msra.mxu0 %v9424_v15  ;;  %v6785_v15 = vld [vmem:[%s10329_s6 + $0xc8] sm:$0xff] }
 0x3d1   :  { %6732 = vmatpush1.bf16.msra.mxu1 %v9448_v27  ;;  %v6769_v27 = vld [vmem:[%s10329_s6 + $0x48] sm:$0xff] }
 0x3d2   :  { %8172 = vmatprep.subr.mxu1 %v6791_v26  ;;  %v6762_v26 = vld [vmem:[%s10329_s6 + $0x10] sm:$0xff] }
 0x3d3   :  { %6709 = vmatmul.mubr.bf16.vlgmr.msra.gmra.mxu0 %v5907_v52  ;;  %v8073_v53 = vpop.f32.mrf.mxu0  ;;  %v6768_v52 = vld [vmem:[%s10329_s6 + $0x40] sm:$0xff] }
 0x3d4   :  { %6985 = vmatprep.mubr.f32.mxu0 %v9770_v16 }
 0x3d5   :  { %v8074_v12 = vpop.f32.mrf.mxu0 }
 0x3d6   :  { %v8075_v54 = vadd.f32 %v8074_v12, %v8073_v53  ;;  %v6783_v53 = vld [vmem:[%s10329_s6 + $0xb8] sm:$0xff] }
 0x3d7   :  { %v8076_v61 = vpop.f32.mrf.mxu0  ;;  %v6767_v12 = vld [vmem:[%s10329_s6 + $0x38] sm:$0xff] }
 0x3d8   :  { %v6766_v61 = vld [vmem:[%s10329_s6 + $0x30] sm:$0xff] }
 0x3d9   :  { %v8077_v56 = vpop.f32.mrf.mxu0 }
 0x3da   :  { %v6781_v56 = vld [vmem:[%s10329_s6 + $0xa8] sm:$0xff] }
 0x3e4   :  { %v8051_v57 = vpop.f32.mrf.mxu1 }
 0x3e6   :  { %v8052_v13 = vpop.f32.mrf.mxu1 }
 0x3e7   :  { %v8053_v58 = vadd.f32 %v8052_v13, %v8051_v57  ;;  %v6780_v57 = vld [vmem:[%s10329_s6 + $0xa0] sm:$0xff] }
 0x3e8   :  { %v8054_v34 = vpop.f32.mrf.mxu1 }
 0x3e9   :  { %v5651_v62 = vadd.f32 %v8053_v58, %v1041_v44  ;;  %v6764_v44 = vld [vmem:[%s10329_s6 + $0x20] sm:$0xff] }
 0x3ea   :  { %v8055_v1 = vpop.f32.mrf.mxu1 }
 0x3eb   :  { %v5691_v17 = vadd.f32 %v8075_v54, %v5651_v62  ;;  %v6782_v54 = vld [vmem:[%s10329_s6 + $0xb0] sm:$0xff]  ;;  %v6022_v1 = vld [vmem:[#allocation11] sm:$0x3] }
 0x3f3   :  { %v8117_v2 = vpop.f32.mrf.mxu0 }
 0x3f5   :  { %v8118_v25 = vpop.f32.mrf.mxu0 }
 0x3f6   :  { %v8119_v40 = vadd.f32 %v8118_v25, %v8117_v2  ;;  %v6031_v2 = vrot.slane %v6022_v1, %v9990_v14 }
 0x3f7   :  { %v8120_v3 = vpop.f32.mrf.mxu0 }
 0x3f9   :  { %v8121_v7 = vpop.f32.mrf.mxu0 }
 0x404   :  { %v8095_v4 = vpop.f32.mrf.mxu1 }
 0x406   :  { %v8096_v5 = vpop.f32.mrf.mxu1 }
 0x407   :  { %v8097_v6 = vadd.f32 %v8096_v5, %v8095_v4 }
 0x408   :  { %v8098_v55 = vpop.f32.mrf.mxu1 }
 0x409   :  { %v5731_v60 = vadd.f32 %v8097_v6, %v5691_v17  ;;  %v6027_v17 = vrot.slane %v6022_v1, %v9987_v10  ;;  %v6761_v6 = vld [vmem:[%s10329_s6 + $0x8] sm:$0xff]  ;;  %v7113_v1 = vld [vmem:[%s10336_s13 + $0xf8] sm:$0xff] }
 0x40a   :  { %v8099_v20 = vpop.f32.mrf.mxu1 }
 0x40b   :  { %v5771_v43 = vadd.f32 %v8119_v40, %v5731_v60  ;;  %v6870_v60 = vld [vmem:[#allocation5] sm:$0x3]  ;;  %v9772_v40 = vmov 1  }
 0x40c   :  { %6874 = vperm.xlu0 %8279, %v6870_v60  }
 0x410   :  { %8280 = vset.pattern.permute.xlu0 %v9772_v40  ;;  %v7103_v40 = vld [vmem:[%s10336_s13 + $0xa8] sm:$0xff] }
 0x411   :  { %6883 = vperm.xlu0 %8280, %v6870_v60   ;;  %v7088_v60 = vld [vmem:[%s10336_s13 + $0x30] sm:$0xff] }
 0x413   :  { %v8161_v8 = vpop.f32.mrf.mxu0 }
 0x415   :  { %v8162_v9 = vpop.f32.mrf.mxu0 }
 0x416   :  { %v8163_v51 = vadd.f32 %v8162_v9, %v8161_v8  ;;  %v6779_v9 = vld [vmem:[%s10329_s6 + $0x98] sm:$0xff] }
 0x417   :  { %v8164_v42 = vpop.f32.mrf.mxu0 }
 0x418   :  { %v6763_v42 = vld [vmem:[%s10329_s6 + $0x18] sm:$0xff] }
 0x419   :  { %v8165_v11 = vpop.f32.mrf.mxu0 }
 0x41a   :  { %v6778_v11 = vld [vmem:[%s10329_s6 + $0x90] sm:$0xff] }
 0x424   :  { %v8139_v19 = vpop.f32.mrf.mxu1 }
 0x426   :  { %v8140_v31 = vpop.f32.mrf.mxu1 }
 0x427   :  { %v8141_v24 = vadd.f32 %v8140_v31, %v8139_v19  ;;  %v6777_v19 = vld [vmem:[%s10329_s6 + $0x88] sm:$0xff]  ;;  %v6776_v31 = vld [vmem:[%s10329_s6 + $0x80] sm:$0xff] }
 0x428   :  { %v8142_v49 = vpop.f32.mrf.mxu1 }
 0x429   :  { %v5811_v21 = vadd.f32 %v8141_v24, %v5771_v43  ;;  %v6760_v49 = vld [vmem:[%s10329_s6] sm:$0xff]  ;;  %v6915_v24 = vld [vmem:[#allocation19 + $0x30] sm:$0xff]  ;;  %v6914_v43 = vld [vmem:[#allocation19 + $0x28] sm:$0xff] }
 0x42a   :  { %v8143_v22 = vpop.f32.mrf.mxu1 }
 0x42b   :  { %v5851_v28 = vadd.f32 %v8163_v51, %v5811_v21  ;;  %v6916_v22 = vld [vmem:[#allocation19 + $0x38] sm:$0xff]  ;;  %v6913_v21 = vld [vmem:[#allocation19 + $0x20] sm:$0xff] }
 0x42c   :  { %6945 = vmatprep.subr.mxu0 %v6916_v22  ;;  %v6912_v51 = vld [vmem:[#allocation19 + $0x18] sm:$0xff]  ;;  %v7087_v22 = vld [vmem:[%s10336_s13 + $0x28] sm:$0xff] }
 0x42d   :  { %6946 = vmatpush1.msra.mxu0 %v6915_v24 }
 0x42e   :  { %6947 = vmatprep.subr.mxu0 %v6914_v43  ;;  %v8030_v43 = vld [vmem:[#allocation13] ss:$0 sm:$0xff] }
 0x42f   :  { %6948 = vmatpush1.msra.mxu0 %v6913_v21 }
 0x430   :  { %6949 = vmatprep.subr.mxu0 %v6912_v51 }
 0x434   :  { %v5890_v29 = vpop.f32.mrf.mxu1 }
 0x435   :  { %v5891_v30 = vadd.f32 %v5890_v29, %v5851_v28  ;;  %v6911_v28 = vld [vmem:[#allocation19 + $0x10] sm:$0xff] }
 0x436   :  { %v8252_v32 = vpop.f32.mrf.mxu1  ;;  %6950 = vmatpush1.msra.mxu0 %v6911_v28 }
 0x437   :  { %v5902_v33 = vmax.f32 %v5891_v30, 0.0 }
 0x438   :  { %v5893_v35 = vpop.f32.mrf.mxu1 }
 0x439   :  { %v5909_v37 = vpack.c.bf16 %v5902_v33, %v5902_v33 }
 0x43a   :  { %v8253_v38 = vpop.f32.mrf.mxu1 }
 0x43b   :  { %6750 = vmatmul.mubr.bf16.vlgmr.msra.gmra.mxu1 %v5909_v37 }
 0x43c   :  { %8173 = vmatpush3.msra.mxu1 %v6775_v18 }
 0x43d   :  { %8174 = vmatprep.subr.mxu1 %v6790_v39 }
 0x43e   :  { %8175 = vmatpush3.msra.mxu1 %v6774_v41 }
 0x43f   :  { %8176 = vmatprep.subr.mxu1 %v6789_v45 }
 0x440   :  { %8177 = vmatpush3.msra.mxu1 %v6773_v59 }
 0x441   :  { %8178 = vmatprep.subr.mxu1 %v6788_v63 }
 0x442   :  { %8179 = vmatpush3.msra.mxu1 %v6772_v46 }
 0x443   :  { %8180 = vmatprep.subr.mxu1 %v6787_v23 }
 0x444   :  { %8181 = vmatpush3.msra.mxu1 %v6771_v47  ;;  %v6871_v47 = vld [vmem:[#allocation14] sm:$0x3] }
 0x445   :  { %8182 = vmatprep.subr.mxu1 %v6786_v36  ;;  %v6880_v36 = vrot.slane %v6871_v47, %v9987_v10 }
 0x446   :  { %8183 = vmatpush3.msra.mxu1 %v6770_v48  ;;  %v6889_v48 = vrot.slane %v6871_v47, %v9990_v14 }
 0x447   :  { %8184 = vmatprep.subr.mxu1 %v6785_v15 }
 0x448   :  { %8185 = vmatpush3.msra.mxu1 %v6769_v27 }
 0x449   :  { %8186 = vmatprep.subr.mxu1 %v6784_v50 }
 0x44a   :  { %8187 = vmatpush3.msra.mxu1 %v6768_v52 }
 0x44b   :  { %8188 = vmatprep.subr.mxu1 %v6783_v53  ;;  %v8031_v53 = vld [vmem:[#allocation16] ss:$0 sm:$0xff] }
 0x44c   :  { %8189 = vmatpush3.msra.mxu1 %v6767_v12 }
 0x44d   :  { %8190 = vmatprep.subr.mxu1 %v6782_v54 }
 0x44e   :  { %8191 = vmatpush3.msra.mxu1 %v6766_v61  ;;  %v6910_v61 = vld [vmem:[#allocation19 + $0x8] sm:$0xff] }
 0x44f   :  { %8192 = vmatprep.subr.mxu1 %v6781_v56  ;;  %v6909_v56 = vld [vmem:[#allocation19] sm:$0xff]  ;;  %6951 = vmatprep.subr.mxu0 %v6910_v61 }
 0x450   :  { %8193 = vmatpush3.msra.mxu1 %v6765_v0  ;;  %v6908_v0 = vld [vmem:[#allocation17 + $0x38] sm:$0xff]  ;;  %6952 = vmatpush1.msra.mxu0 %v6909_v56  ;;  %v8034_v61 = vld [vmem:[#allocation22] ss:$0 sm:$0xff] }
 0x451   :  { %8194 = vmatprep.subr.mxu1 %v6780_v57  ;;  %v6906_v57 = vld [vmem:[#allocation17 + $0x28] sm:$0xff]  ;;  %8207 = vmatprep.subr.mxu0 %v7113_v1 }
 0x452   :  { %8195 = vmatpush3.msra.mxu1 %v6764_v44  ;;  %v6905_v44 = vld [vmem:[#allocation17 + $0x20] sm:$0xff] }
 0x453   :  { %v6628_v13 = vpop.f32.mrf.mxu0  ;;  %8196 = vmatprep.subr.mxu1 %v6779_v9  ;;  %v7092_v9 = vld [vmem:[%s10336_s13 + $0x50] sm:$0xff] }
 0x454   :  { %v6629_v25 = vadd.f32 %v6628_v13, %v6027_v17  ;;  %8197 = vmatpush3.msra.mxu1 %v6763_v42  ;;  %v6904_v13 = vld [vmem:[#allocation17 + $0x18] sm:$0xff]  ;;  %v7107_v42 = vld [vmem:[%s10336_s13 + $0xc8] sm:$0xff] }
 0x455   :  { %v6630_v58 = vpop.f32.mrf.mxu0  ;;  %8198 = vmatprep.subr.mxu1 %v6778_v11  ;;  %v7097_v17 = vld [vmem:[%s10336_s13 + $0x78] sm:$0xff]  ;;  %v7091_v11 = vld [vmem:[%s10336_s13 + $0x48] sm:$0xff] }
 0x456   :  { %v6631_v7 = vadd.f32 %v6630_v58, %v6031_v2  ;;  %8199 = vmatpush3.msra.mxu1 %v6762_v26  ;;  %v6903_v58 = vld [vmem:[#allocation17 + $0x10] sm:$0xff]  ;;  %v7106_v26 = vld [vmem:[%s10336_s13 + $0xc0] sm:$0xff] }
 0x457   :  { %v6632_v34 = vpop.f32.mrf.mxu0  ;;  %8200 = vmatprep.subr.mxu1 %v6777_v19  ;;  %v7112_v2 = vld [vmem:[%s10336_s13 + $0xf0] sm:$0xff]  ;;  %v7090_v19 = vld [vmem:[%s10336_s13 + $0x40] sm:$0xff] }
 0x458   :  { %8201 = vmatpush3.msra.mxu1 %v6761_v6  ;;  %v6902_v34 = vld [vmem:[#allocation17 + $0x8] sm:$0xff]  ;;  %v7105_v6 = vld [vmem:[%s10336_s13 + $0xb8] sm:$0xff] }
 0x459   :  { %v6633_v62 = vpop.f32.mrf.mxu0  ;;  %8202 = vmatprep.subr.mxu1 %v6776_v31  ;;  %v7089_v31 = vld [vmem:[%s10336_s13 + $0x38] sm:$0xff] }
 0x45a   :  { %8203 = vmatpush3.msra.mxu1 %v6760_v49  ;;  %v6901_v62 = vld [vmem:[#allocation17] sm:$0xff]  ;;  %v7104_v49 = vld [vmem:[%s10336_s13 + $0xb0] sm:$0xff] }
 0x45b   :  { %7019 = vmatprep.subr.mxu1 %v6908_v0 }
 0x474   :  { %v6669_v3 = vpop.f32.mrf.mxu1 }
 0x475   :  { %v6670_v4 = vadd.f32 %v6669_v3, %v6629_v25  ;;  %v7096_v25 = vld [vmem:[%s10336_s13 + $0x70] sm:$0xff]  ;;  %v7111_v3 = vld [vmem:[%s10336_s13 + $0xe8] sm:$0xff] }
 0x476   :  { %v6671_v5 = vpop.f32.mrf.mxu1 }
 0x477   :  { %v6672_v55 = vadd.f32 %v6671_v5, %v6631_v7  ;;  %v7095_v7 = vld [vmem:[%s10336_s13 + $0x68] sm:$0xff]  ;;  %v7094_v5 = vld [vmem:[%s10336_s13 + $0x60] sm:$0xff] }
 0x478   :  { %v6673_v20 = vpop.f32.mrf.mxu1 }
 0x479   :  { %v7093_v20 = vld [vmem:[%s10336_s13 + $0x58] sm:$0xff] }
 0x47a   :  { %v6674_v8 = vpop.f32.mrf.mxu1 }
 0x47b   :  { %v7108_v8 = vld [vmem:[%s10336_s13 + $0xd0] sm:$0xff] }
 0x487   :  { %v6875_v23 = vpop.permute.xlu0 %6874 }
 0x488   :  { %v6881_v27 = vmul.f32 %v6880_v36, %v6875_v23 }
 0x48c   :  { %v6884_v15 = vpop.permute.xlu0 %6883 }
 0x48d   :  { %v6890_v50 = vmul.f32 %v6889_v48, %v6884_v15 }
 0x48f   :  { %v6891_v52 = vadd.f32 %v6890_v50, %v6881_v27 }
 0x491   :  { %v6899_v12 = vadd.f32 %v8031_v53, %v6891_v52 }
 0x493   :  { %v6710_v29 = vpop.f32.mrf.mxu0  ;;  %v6900_v54 = vmax.f32 %v6899_v12, 0.0 }
 0x494   :  { %v6711_v30 = vadd.f32 %v6710_v29, %v6670_v4  ;;  %v7110_v4 = vld [vmem:[%s10336_s13 + $0xe0] sm:$0xff] }
 0x495   :  { %v6712_v32 = vpop.f32.mrf.mxu0  ;;  %8032 = vmatmul.mubr.msk.f32.vlgmr.msra.gmra.mxu0 %vm6917_vm2, %v6900_v54 }
 0x496   :  { %v6713_v33 = vadd.f32 %v6712_v32, %v6672_v55  ;;  %8208 = vmatpush3.msra.mxu0 %v7097_v17  ;;  %v7109_v55 = vld [vmem:[%s10336_s13 + $0xd8] sm:$0xff]  ;;  %v7086_v32 = vld [vmem:[%s10336_s13 + $0x20] sm:$0xff] }
 0x497   :  { %v6714_v35 = vpop.f32.mrf.mxu0  ;;  %8209 = vmatprep.subr.mxu0 %v7112_v2 }
 0x498   :  { %8210 = vmatpush3.msra.mxu0 %v7096_v25  ;;  %v7085_v35 = vld [vmem:[%s10336_s13 + $0x18] sm:$0xff] }
 0x499   :  { %v6715_v37 = vpop.f32.mrf.mxu0  ;;  %8211 = vmatprep.subr.mxu0 %v7111_v3 }
 0x49a   :  { %8212 = vmatpush3.msra.mxu0 %v7095_v7  ;;  %v7100_v37 = vld [vmem:[%s10336_s13 + $0x90] sm:$0xff] }
 0x49b   :  { %8213 = vmatprep.subr.mxu0 %v7110_v4 }
 0x49c   :  { %8214 = vmatpush3.msra.mxu0 %v7094_v5 }
 0x49d   :  { %8215 = vmatprep.subr.mxu0 %v7109_v55 }
 0x49e   :  { %8216 = vmatpush3.msra.mxu0 %v7093_v20 }
 0x49f   :  { %8217 = vmatprep.subr.mxu0 %v7108_v8 }
 0x4a0   :  { %8218 = vmatpush3.msra.mxu0 %v7092_v9 }
 0x4a1   :  { %8219 = vmatprep.subr.mxu0 %v7107_v42 }
 0x4a2   :  { %8220 = vmatpush3.msra.mxu0 %v7091_v11 }
 0x4a3   :  { %8221 = vmatprep.subr.mxu0 %v7106_v26 }
 0x4a4   :  { %8222 = vmatpush3.msra.mxu0 %v7090_v19 }
 0x4a5   :  { %8223 = vmatprep.subr.mxu0 %v7105_v6 }
 0x4a6   :  { %8224 = vmatpush3.msra.mxu0 %v7089_v31 }
 0x4a7   :  { %8225 = vmatprep.subr.mxu0 %v7104_v49 }
 0x4a8   :  { %8226 = vmatpush3.msra.mxu0 %v7088_v60 }
 0x4a9   :  { %8227 = vmatprep.subr.mxu0 %v7103_v40 }
 0x4aa   :  { %8228 = vmatpush3.msra.mxu0 %v7087_v22 }
 0x4fb   :  { %v6751_v18 = vpop.f32.mrf.mxu1 }
 0x4fc   :  { %v6752_v38 = vadd.f32 %v6751_v18, %v6711_v30  ;;  %v7102_v30 = vld [vmem:[%s10336_s13 + $0xa0] sm:$0xff]  ;;  %v7084_v18 = vld [vmem:[%s10336_s13 + $0x10] sm:$0xff] }
 0x4fd   :  { %v6753_v39 = vpop.f32.mrf.mxu1  ;;  %8229 = vmatprep.subr.mxu0 %v7102_v30 }
 0x4fe   :  { %v6754_v41 = vadd.f32 %v6753_v39, %v6713_v33  ;;  %v6758_v63 = vmax.f32 %v6752_v38, 0.0  ;;  %8230 = vmatpush3.msra.mxu0 %v7086_v32  ;;  %v7101_v33 = vld [vmem:[%s10336_s13 + $0x98] sm:$0xff]  ;;  %v7099_v38 = vld [vmem:[%s10336_s13 + $0x88] sm:$0xff] }
 0x4ff   :  { %v6755_v45 = vpop.f32.mrf.mxu1  ;;  %8231 = vmatprep.subr.mxu0 %v7101_v33  ;;  %v7083_v39 = vld [vmem:[%s10336_s13 + $0x8] sm:$0xff] }
 0x500   :  { %v6759_v59 = vmax.f32 %v6754_v41, 0.0  ;;  %8232 = vmatpush3.msra.mxu0 %v7085_v35  ;;  %v7098_v41 = vld [vmem:[%s10336_s13 + $0x80] sm:$0xff] }
 0x501   :  { %v6756_v46 = vpop.f32.mrf.mxu1  ;;  %8233 = vmatprep.subr.mxu0 %v7100_v37  ;;  %v7082_v45 = vld [vmem:[%s10336_s13] sm:$0xff]  ;;  %s9773_s13 = smov [#allocation23]  }
 0x502   :  { %6863 = vmatprep.mubr.f32.mxu1 %v6759_v59  ;;  %8234 = vmatpush3.msra.mxu0 %v7084_v18  ;;  %v7066_v59 = vld [vmem:[#allocation20] sm:$0x3]  ;;  %s7199_s21 = sshll.u32 %s9773_s13, 4  ;;  %s7200_s21 = int_to_ptr.vmem [resolvable:$true] %s7199_s21 }
 0x503   :  { %6864 = vmatmul.mubr.f32.vlgmr.msra.gmra.mxu1 %v6758_v63  ;;  %8235 = vmatprep.subr.mxu0 %v7099_v38  ;;  %v7071_v23 = vrot.slane %v7066_v59, %v9987_v10  ;;  %v7075_v36 = vrot.slane %v7066_v59, %v9990_v14  ;;  %s9713_s4 = scalar_lea.vmem %s7200_s21, 32  ;;  %p9718_p10 = scmp.lt.s32.totalorder %s7200_s21, %s7200_s21 }
 0x504   :  { %7059 = vmatprep.mubr.f32.mxu1 %v9770_v16  ;;  %v6907_v16 = vld [vmem:[#allocation17 + $0x30] sm:$0xff]  ;;  %8236 = vmatpush3.msra.mxu0 %v7083_v39  ;;  %p9714_p9 = scmp.ne.s32.totalorder %s7200_s21, %s9713_s4  ;;  %p9719_p11 = scmp.lt.s32.totalorder %s9713_s4, %s9713_s4 }
 0x505   :  { %7020 = vmatpush1.msra.mxu1 %v6907_v16  ;;  %8237 = vmatprep.subr.mxu0 %v7098_v41 }
 0x506   :  { %7021 = vmatprep.subr.mxu1 %v6906_v57  ;;  %8238 = vmatpush3.msra.mxu0 %v7082_v45  ;;  %p9720_p12 = por %p9719_p11, %p9718_p10 }
 0x507   :  { %7022 = vmatpush1.msra.mxu1 %v6905_v44 }
 0x508   :  { %7023 = vmatprep.subr.mxu1 %v6904_v13  ;;  %p9721_p13 = pnand %p9720_p12, %p9714_p9 }
 0x509   :  { %7024 = vmatpush1.msra.mxu1 %v6903_v58 }
 0x50a   :  { %7025 = vmatprep.subr.mxu1 %v6902_v34 }
 0x50b   :  { %7026 = vmatpush1.msra.mxu1 %v6901_v62 }
 0x555   :  { %v6987_v63 = vpop.f32.mrf.mxu0 }
 0x557   :  { %v6989_v48 = vpop.f32.mrf.mxu0 }
 0x5c3   :  { %v8204_v24 = vpop.f32.mrf.mxu1 }
 0x5c5   :  { %v8205_v21 = vpop.f32.mrf.mxu1 }
 0x5c6   :  { %v8206_v51 = vadd.f32 %v8205_v21, %v8204_v24 }
 0x5c8   :  { %v6866_v28 = vadd.f32 %v8206_v51, %v8030_v43 }
 0x5ca   :  { %v6869_v29 = vmax.f32 %v6866_v28, 0.0 }
 0x5cc   :  { %8033 = vmatmul.mubr.msk.f32.vlgmr.msra.gmra.mxu1 %vm6917_vm2, %v6869_v29 }
 0x68c   :  { %v7061_v46 = vpop.f32.mrf.mxu1 }
 0x68d   :  { %v7062_v47 = vadd.f32 %v7061_v46, %v6987_v63 }
 0x68e   :  { %v7063_v15 = vpop.f32.mrf.mxu1 }
 0x68f   :  { %v7064_v27 = vadd.f32 %v7063_v15, %v6989_v48  ;;  %v7078_v50 = vadd.f32 %v7071_v23, %v7062_v47 }
 0x691   :  { %v7079_v52 = vadd.f32 %v7075_v36, %v7064_v27  ;;  %v7080_v12 = vmax.f32 %v7078_v50, 0.0 }
 0x693   :  { %v7081_v53 = vmax.f32 %v7079_v52, 0.0 }
 0x695   :  { %7185 = vmatprep.mubr.f32.mxu0 %v7081_v53 }
 0x696   :  { %7186 = vmatmul.mubr.f32.vlgmr.msra.gmra.mxu0 %v7080_v12 }
 0x756   :  { %v8239_v54 = vpop.f32.mrf.mxu0 }
 0x758   :  { %v8240_v56 = vpop.f32.mrf.mxu0 }
 0x759   :  { %v8241_v0 = vadd.f32 %v8240_v56, %v8239_v54 }
 0x75b   :  { %v7188_v10 = vadd.f32 %v8241_v0, %v8034_v61 }
 0x75d   :  { %7192 = vst.msk [vmem:[#allocation23] sm:$0x3] %vm7191_vm3, %v7188_v10 }
 0x75e   :  { %9724 = shalt.err (!%p9721_p13)
}
 0x75f   :  { %7202 = dma.vmem_to_hbm [thread:$0]  %s7200_s21, 32, %s10338_s15, [#allocation4]  }
 0x760   :  { %9747 = dma.done.wait [#allocation4], 32  }
 0x761   :  { %9748 = vsyncadd [#allocation4], 4294967264 }
 0x762   :  { %7206 = vsyncpa [#allocation3], 1 }
 0x763   :  { %7207 = vsyncpa [#allocation6], 1 }
 0x764   :  { %7208 = vsyncpa [#allocation9], 1 }
 0x765   :  { %7209 = vsyncpa [#allocation12], 1 }
 0x766   :  { %7210 = vsyncpa [#allocation15], 1 }
 0x767   :  { %7211 = vsyncpa [#allocation18], 1 }
 0x768   :  { %7212 = vsyncpa [#allocation21], 1 }
 0x769   :  { %7213 = vsyncpa [#allocation4], 1 }

</bundles_post_ra>
